<compile_context>
chip_gen: v7x
topology: tpu7x:2x2x1
jax: 0.10.0
libtpu: 0.0.40
codegen_flags: <defaults>
</compile_context>

<pallas_src>
import numpy as np

import jax
import jax.numpy as jnp
from jax import lax
from jax.experimental import pallas as pl
from jax.experimental.pallas import tpu as pltpu


# ---------------------------------------------------------------------------
# Fused forward kernel (one grid step == one batch tile of BT samples)
# ---------------------------------------------------------------------------
def _net_kernel(x_ref,
                csel1_ref, a1_ref, b1_ref,
                csel2_ref, a2_ref, b2_ref,
                pcol_ref, prow_ref,
                csel3_ref, a3_ref, b3_ref,
                esel_ref, w1_ref, fb1_ref, w2_ref, fb2_ref, w3_ref, fb3_ref,
                out_ref):
    f32 = jnp.float32

    def conv(xs, csel_ref, a_ref, b_ref):
        # xs: (Cin*Hin, BT*Win).  relu(bias + sum_j A_j @ (xs @ S_j)) is exactly
        # the stride-2 3x3 VALID conv; S_j is block-diagonal over the batch
        # tile, A_j folds the row taps and channel mixing.
        acc = None
        for j in range(3):
            y = jnp.dot(xs, csel_ref[j], preferred_element_type=f32)
            z = jnp.dot(a_ref[j], y, preferred_element_type=f32)
            acc = z if acc is None else acc + z
        return jnp.maximum(acc + b_ref[...], 0.0)

    x1 = conv(x_ref[...], csel1_ref, a1_ref, b1_ref)      # (6*31, BT*31)
    x2 = conv(x1, csel2_ref, a2_ref, b2_ref)               # (6*15, BT*15)

    # MaxPool2d(kernel_size=2, stride=2): max over the four 2x2 corners, each
    # extracted with tiny 0/1 selector matmuls (all in VMEM/vregs).
    pooled = None
    for q in range(2):
        yq = jnp.dot(x2, pcol_ref[q], preferred_element_type=f32)      # (90, BT*7)
        for p in range(2):
            t = jnp.dot(prow_ref[p], yq, preferred_element_type=f32)   # (42, BT*7)
            pooled = t if pooled is None else jnp.maximum(pooled, t)

    x3 = conv(pooled, csel3_ref, a3_ref, b3_ref)            # (9, BT*3)

    # fc1: the PyTorch .view(-1, 27) flatten (k = 9*co + 3*ho + wo) is folded
    # into the weight layout; esel[wo] gathers column wo of every sample.
    # TODO(synk): nn.Dropout(p=0.15) is identity at inference; training-mode
    # dropout is not implemented.
    h = fb1_ref[...]                                        # (64, 1) -> broadcasts
    for wo in range(3):
        c = jnp.dot(x3, esel_ref[wo], preferred_element_type=f32)      # (9, BT)
        h = h + jnp.dot(w1_ref[wo], c, preferred_element_type=f32)     # (64, BT)
    h = jnp.maximum(h, 0.0)

    h = jnp.maximum(
        jnp.dot(w2_ref[...], h, preferred_element_type=f32) + fb2_ref[...], 0.0)  # (128, BT)
    logits = jnp.dot(w3_ref[...], h, preferred_element_type=f32) + fb3_ref[...]   # (2, BT)

    # Numerically-stable softmax over the two classes (pure elementwise ops).
    l0 = logits[0:1, :]
    l1 = logits[1:2, :]
    m = jnp.maximum(l0, l1)
    e0 = jnp.exp(l0 - m)
    e1 = jnp.exp(l1 - m)
    inv = 1.0 / (e0 + e1)
    out_ref[0:1, :] = (e0 * inv).astype(out_ref.dtype)
    out_ref[1:2, :] = (e1 * inv).astype(out_ref.dtype)


# ---------------------------------------------------------------------------
# One-time, parameter-only operand preparation (host side, tiny)
# ---------------------------------------------------------------------------
def _col_selectors(size_in, size_out, stride, taps):
    """sel[j, i_in, i_out] = 1.0 iff i_in == stride * i_out + j."""
    i_in = np.arange(size_in)[:, None]
    i_out = np.arange(size_out)[None, :]
    return np.stack(
        [(i_in == stride * i_out + j) for j in range(taps)]
    ).astype(np.float32)


def _row_selectors(hin, hout, stride, taps):
    """sel[i, ho, h] = 1.0 iff h == stride * ho + i."""
    return _col_selectors(hin, hout, stride, taps).transpose(0, 2, 1)


def _conv_operands(w, b, hin, win, bt, stride=2):
    """Fold a Conv2d (Cout, Cin, kh, kw) into selector/mixing matrices."""
    cout, cin, kh, kw = w.shape
    hout = (hin - kh) // stride + 1
    wout = (win - kw) // stride + 1
    csel_1 = _col_selectors(win, wout, stride, kw)                     # (kw, win, wout)
    eye_b = np.eye(bt, dtype=np.float32)
    csel = jnp.asarray(np.stack(                                       # block-diag over batch tile
        [np.kron(eye_b, csel_1[j]) for j in range(kw)]))               # (kw, bt*win, bt*wout)
    rsel = _row_selectors(hin, hout, stride, kh)                       # (kh, hout, hin)
    a = jnp.stack([
        sum(jnp.kron(w[:, :, i, j].astype(jnp.float32), jnp.asarray(rsel[i]))
            for i in range(kh))
        for j in range(kw)
    ])                                                                 # (kw, cout*hout, cin*hin)
    bias = jnp.repeat(b.astype(jnp.float32), hout)[:, None]            # (cout*hout, 1)
    return csel, a, bias, hout, wout


def _pool_operands(channels, hin, win, bt):
    hout, wout = hin // 2, win // 2
    csel_1 = _col_selectors(win, wout, 2, 2)                           # (2, win, wout)
    eye_b = np.eye(bt, dtype=np.float32)
    pcol = jnp.asarray(np.stack([np.kron(eye_b, csel_1[q]) for q in range(2)]))
    rsel = _row_selectors(hin, hout, 2, 2)                             # (2, hout, hin)
    eye_c = np.eye(channels, dtype=np.float32)
    prow = jnp.asarray(np.stack([np.kron(eye_c, rsel[p]) for p in range(2)]))
    return pcol, prow, hout, wout


def _fc_column_selectors(wout, bt):
    """esel[wo, b*wout + wo', b'] = 1.0 iff b == b' and wo' == wo."""
    e = np.zeros((wout, bt * wout, bt), np.float32)
    for wo in range(wout):
        for b in range(bt):
            e[wo, b * wout + wo, b] = 1.0
    return jnp.asarray(e)


def prepare_params(params, batch_tile=8):
    """Pack PyTorch-layout params into the fused kernel's VMEM operands (one time)."""
    bt = int(batch_tile)
    c1, a1, b1, h, w = _conv_operands(params["conv1_w"], params["conv1_b"], 64, 64, bt)
    c2, a2, b2, h, w = _conv_operands(params["conv2_w"], params["conv2_b"], h, w, bt)
    pc, pr, h, w = _pool_operands(int(params["conv2_w"].shape[0]), h, w, bt)
    c3, a3, b3, h, w = _conv_operands(params["conv3_w"], params["conv3_b"], h, w, bt)
    assert int(params["conv3_w"].shape[0]) * h * w == params["fc1_w"].shape[0]

    fc1_w = params["fc1_w"].astype(jnp.float32)                        # (27, 64)
    # Fold the NCHW flatten (k = 9*co + 3*ho + wo) into fc1 weights: one
    # (64, 9) block per spatial column wo of the conv3 output.
    w1 = jnp.stack([fc1_w[wo::w, :].T for wo in range(w)])             # (3, 64, 9)
    esel = _fc_column_selectors(w, bt)                                 # (3, bt*3, bt)

    return {
        "csel1": c1, "a1": a1, "b1": b1,
        "csel2": c2, "a2": a2, "b2": b2,
        "pcol": pc, "prow": pr,
        "csel3": c3, "a3": a3, "b3": b3,
        "esel": esel,
        "w1": w1, "fb1": params["fc1_b"].astype(jnp.float32)[:, None],
        "w2": params["fc2_w"].astype(jnp.float32).T,
        "fb2": params["fc2_b"].astype(jnp.float32)[:, None],
        "w3": params["fc3_w"].astype(jnp.float32).T,
        "fb3": params["fc3_b"].astype(jnp.float32)[:, None],
    }


_OPERAND_ORDER = ("csel1", "a1", "b1", "csel2", "a2", "b2", "pcol", "prow",
                  "csel3", "a3", "b3", "esel",
                  "w1", "fb1", "w2", "fb2", "w3", "fb3")


# ---------------------------------------------------------------------------
# Forward pass: a single fused pallas_call, batch tiles as a parallel grid axis
# ---------------------------------------------------------------------------
@jax.jit
def net_forward(prepared, x):
    assert x.shape[1:] == (1, 64, 64), "Net implies 1x64x64 inputs (fc_input_size=27)"
    n = x.shape[0]
    bt = prepared["esel"].shape[2]                     # batch-tile size (static)
    n_pad = ((n + bt - 1) // bt) * bt
    t = n_pad // bt

    xs = x.reshape(n, 64, 64).astype(jnp.float32)
    if n_pad != n:
        xs = jnp.concatenate(
            [xs, jnp.zeros((n_pad - n, 64, 64), jnp.float32)], axis=0)
    # Lane-pack each batch tile: slab[t, h, b*64 + w] = x[t*bt + b, h, w].
    xs = xs.reshape(t, bt, 64, 64).transpose(0, 2, 1, 3).reshape(t, 64, bt * 64)

    operands = [prepared[k] for k in _OPERAND_ORDER]

    def _const_spec(arr):
        zeros = (0,) * arr.ndim
        return pl.BlockSpec(tuple(arr.shape), lambda i, _z=zeros: _z)

    out = pl.pallas_call(
        _net_kernel,
        out_shape=jax.ShapeDtypeStruct((t, 2, bt), jnp.float32),
        grid=(t,),
        in_specs=[pl.BlockSpec((None, 64, bt * 64), lambda i: (i, 0, 0))]
                 + [_const_spec(a) for a in operands],
        out_specs=pl.BlockSpec((None, 2, bt), lambda i: (i, 0, 0)),
        compiler_params=pltpu.CompilerParams(
            dimension_semantics=("parallel",)),
    )(xs, *operands)

    # (T, 2, BT) -> (N, 2)
    return out.transpose(0, 2, 1).reshape(n_pad, 2)[:n]


# ---------------------------------------------------------------------------
# Parameters (PyTorch layout) and a pure-JAX reference for validation
# ---------------------------------------------------------------------------
def init_params(key):
    def uniform(k, shape, fan_in):
        bound = 1.0 / (fan_in ** 0.5)
        return jax.random.uniform(k, shape, jnp.float32, -bound, bound)

    ks = jax.random.split(key, 12)
    return {
        "conv1_w": uniform(ks[0], (6, 1, 3, 3), 1 * 9),
        "conv1_b": uniform(ks[1], (6,), 1 * 9),
        "conv2_w": uniform(ks[2], (6, 6, 3, 3), 6 * 9),
        "conv2_b": uniform(ks[3], (6,), 6 * 9),
        "conv3_w": uniform(ks[4], (3, 6, 3, 3), 6 * 9),
        "conv3_b": uniform(ks[5], (3,), 6 * 9),
        "fc1_w": uniform(ks[6], (27, 64), 27),
        "fc1_b": uniform(ks[7], (64,), 27),
        "fc2_w": uniform(ks[8], (64, 128), 64),
        "fc2_b": uniform(ks[9], (128,), 64),
        "fc3_w": uniform(ks[10], (128, 2), 128),
        "fc3_b": uniform(ks[11], (2,), 128),
    }


def net_forward_reference(params, x):
    def conv(y, w, b, stride):
        out = lax.conv_general_dilated(
            y, w, window_strides=(stride, stride), padding="VALID",
            dimension_numbers=("NCHW", "OIHW", "NCHW"))
        return out + b[None, :, None, None]

    y = jax.nn.relu(conv(x, params["conv1_w"], params["conv1_b"], 2))
    y = jax.nn.relu(conv(y, params["conv2_w"], params["conv2_b"], 2))
    y = lax.reduce_window(y, -jnp.inf, lax.max, (1, 1, 2, 2), (1, 1, 2, 2), "VALID")
    y = jax.nn.relu(conv(y, params["conv3_w"], params["conv3_b"], 2))
    y = y.reshape(y.shape[0], -1)                   # NCHW flatten == .view(-1, 27)
    y = jax.nn.relu(y @ params["fc1_w"] + params["fc1_b"])
    y = jax.nn.relu(y @ params["fc2_w"] + params["fc2_b"])
    y = y @ params["fc3_w"] + params["fc3_b"]
    return jax.nn.softmax(y, axis=1)


if __name__ == "__main__":
    key = jax.random.PRNGKey(0)
    pkey, xkey = jax.random.split(key)
    params = init_params(pkey)
    x = jax.random.normal(xkey, (2, 1, 64, 64), dtype=jnp.float32)

    prepared = prepare_params(params, batch_tile=x.shape[0])
    out = jax.block_until_ready(net_forward(prepared, x))

    assert out.shape == (2, 2)
    # softmax rows sum to 1
    assert bool(jnp.all(jnp.abs(jnp.sum(out, axis=1) - 1.0) < 1e-5))
    # matches the plain-JAX reference of the same PyTorch module
    ref = net_forward_reference(params, x)
    assert bool(jnp.all(jnp.abs(out - ref) < 2e-2)), (out, ref)
    print("KERNEL_OK")
</pallas_src>

<mosaic_0001>
module attributes {stable_mosaic.version = 11 : i64} {
  func.func @_net_kernel(%arg0: i32, %arg1: memref<1x64x128xf32, #tpu.memory_space<vmem>>, %arg2: memref<3x128x62xf32, #tpu.memory_space<vmem>>, %arg3: memref<3x186x64xf32, #tpu.memory_space<vmem>>, %arg4: memref<186x1xf32, #tpu.memory_space<vmem>>, %arg5: memref<3x62x30xf32, #tpu.memory_space<vmem>>, %arg6: memref<3x90x186xf32, #tpu.memory_space<vmem>>, %arg7: memref<90x1xf32, #tpu.memory_space<vmem>>, %arg8: memref<2x30x14xf32, #tpu.memory_space<vmem>>, %arg9: memref<2x42x90xf32, #tpu.memory_space<vmem>>, %arg10: memref<3x14x6xf32, #tpu.memory_space<vmem>>, %arg11: memref<3x9x42xf32, #tpu.memory_space<vmem>>, %arg12: memref<9x1xf32, #tpu.memory_space<vmem>>, %arg13: memref<3x6x2xf32, #tpu.memory_space<vmem>>, %arg14: memref<3x64x9xf32, #tpu.memory_space<vmem>>, %arg15: memref<64x1xf32, #tpu.memory_space<vmem>>, %arg16: memref<128x64xf32, #tpu.memory_space<vmem>>, %arg17: memref<128x1xf32, #tpu.memory_space<vmem>>, %arg18: memref<2x128xf32, #tpu.memory_space<vmem>>, %arg19: memref<2x1xf32, #tpu.memory_space<vmem>>, %arg20: memref<1x2x2xf32, #tpu.memory_space<vmem>>) attributes {dimension_semantics = [#tpu.dimension_semantics<parallel>], iteration_bounds = array<i64: 1>, scalar_prefetch = 0 : i64, scratch_operands = 0 : i64, tpu.core_type = #tpu.core_type<tc>, window_params = [{transform_indices = @transform_0, window_bounds = array<i64: 1, 64, 128>}, {pipeline_mode = #tpu.pipeline_mode<synchronous>, transform_indices = @transform_1, window_bounds = array<i64: 3, 128, 62>}, {pipeline_mode = #tpu.pipeline_mode<synchronous>, transform_indices = @transform_2, window_bounds = array<i64: 3, 186, 64>}, {pipeline_mode = #tpu.pipeline_mode<synchronous>, transform_indices = @transform_3, window_bounds = array<i64: 186, 1>}, {pipeline_mode = #tpu.pipeline_mode<synchronous>, transform_indices = @transform_4, window_bounds = array<i64: 3, 62, 30>}, {pipeline_mode = #tpu.pipeline_mode<synchronous>, transform_indices = @transform_5, window_bounds = array<i64: 3, 90, 186>}, {pipeline_mode = #tpu.pipeline_mode<synchronous>, transform_indices = @transform_6, window_bounds = array<i64: 90, 1>}, {pipeline_mode = #tpu.pipeline_mode<synchronous>, transform_indices = @transform_7, window_bounds = array<i64: 2, 30, 14>}, {pipeline_mode = #tpu.pipeline_mode<synchronous>, transform_indices = @transform_8, window_bounds = array<i64: 2, 42, 90>}, {pipeline_mode = #tpu.pipeline_mode<synchronous>, transform_indices = @transform_9, window_bounds = array<i64: 3, 14, 6>}, {pipeline_mode = #tpu.pipeline_mode<synchronous>, transform_indices = @transform_10, window_bounds = array<i64: 3, 9, 42>}, {pipeline_mode = #tpu.pipeline_mode<synchronous>, transform_indices = @transform_11, window_bounds = array<i64: 9, 1>}, {pipeline_mode = #tpu.pipeline_mode<synchronous>, transform_indices = @transform_12, window_bounds = array<i64: 3, 6, 2>}, {pipeline_mode = #tpu.pipeline_mode<synchronous>, transform_indices = @transform_13, window_bounds = array<i64: 3, 64, 9>}, {pipeline_mode = #tpu.pipeline_mode<synchronous>, transform_indices = @transform_14, window_bounds = array<i64: 64, 1>}, {pipeline_mode = #tpu.pipeline_mode<synchronous>, transform_indices = @transform_15, window_bounds = array<i64: 128, 64>}, {pipeline_mode = #tpu.pipeline_mode<synchronous>, transform_indices = @transform_16, window_bounds = array<i64: 128, 1>}, {pipeline_mode = #tpu.pipeline_mode<synchronous>, transform_indices = @transform_17, window_bounds = array<i64: 2, 128>}, {pipeline_mode = #tpu.pipeline_mode<synchronous>, transform_indices = @transform_18, window_bounds = array<i64: 2, 1>}, {transform_indices = @transform_19, window_bounds = array<i64: 1, 2, 2>}]} {
    %c0 = arith.constant 0 : index
    %c0_0 = arith.constant 0 : index
    %c0_1 = arith.constant 0 : index
    %0 = vector.load %arg1[%c0, %c0_0, %c0_1] : memref<1x64x128xf32, #tpu.memory_space<vmem>>, vector<1x64x128xf32>
    %1 = vector.shape_cast %0 : vector<1x64x128xf32> to vector<64x128xf32>
    %c0_2 = arith.constant 0 : index
    %c0_3 = arith.constant 0 : index
    %c0_4 = arith.constant 0 : index
    %2 = vector.load %arg2[%c0_2, %c0_3, %c0_4] : memref<3x128x62xf32, #tpu.memory_space<vmem>>, vector<1x128x62xf32>
    %3 = vector.shape_cast %2 : vector<1x128x62xf32> to vector<128x62xf32>
    %cst = arith.constant dense<0.000000e+00> : vector<64x62xf32>
    %4 = tpu.matmul %1, %3, %cst {dimension_numbers = #tpu.dot_dimension_numbers<[1], [0], [0], [1], [0, 0, 1, 1], [], []>} : vector<64x128xf32>, vector<128x62xf32>, vector<64x62xf32> -> vector<64x62xf32>
    %c0_5 = arith.constant 0 : index
    %c0_6 = arith.constant 0 : index
    %c0_7 = arith.constant 0 : index
    %5 = vector.load %arg3[%c0_5, %c0_6, %c0_7] : memref<3x186x64xf32, #tpu.memory_space<vmem>>, vector<1x186x64xf32>
    %6 = vector.shape_cast %5 : vector<1x186x64xf32> to vector<186x64xf32>
    %cst_8 = arith.constant dense<0.000000e+00> : vector<186x62xf32>
    %7 = tpu.matmul %6, %4, %cst_8 {dimension_numbers = #tpu.dot_dimension_numbers<[1], [0], [0], [1], [0, 0, 1, 1], [], []>} : vector<186x64xf32>, vector<64x62xf32>, vector<186x62xf32> -> vector<186x62xf32>
    %c1 = arith.constant 1 : index
    %c0_9 = arith.constant 0 : index
    %c0_10 = arith.constant 0 : index
    %8 = vector.load %arg2[%c1, %c0_9, %c0_10] : memref<3x128x62xf32, #tpu.memory_space<vmem>>, vector<1x128x62xf32>
    %9 = vector.shape_cast %8 : vector<1x128x62xf32> to vector<128x62xf32>
    %cst_11 = arith.constant dense<0.000000e+00> : vector<64x62xf32>
    %10 = tpu.matmul %1, %9, %cst_11 {dimension_numbers = #tpu.dot_dimension_numbers<[1], [0], [0], [1], [0, 0, 1, 1], [], []>} : vector<64x128xf32>, vector<128x62xf32>, vector<64x62xf32> -> vector<64x62xf32>
    %c1_12 = arith.constant 1 : index
    %c0_13 = arith.constant 0 : index
    %c0_14 = arith.constant 0 : index
    %11 = vector.load %arg3[%c1_12, %c0_13, %c0_14] : memref<3x186x64xf32, #tpu.memory_space<vmem>>, vector<1x186x64xf32>
    %12 = vector.shape_cast %11 : vector<1x186x64xf32> to vector<186x64xf32>
    %cst_15 = arith.constant dense<0.000000e+00> : vector<186x62xf32>
    %13 = tpu.matmul %12, %10, %cst_15 {dimension_numbers = #tpu.dot_dimension_numbers<[1], [0], [0], [1], [0, 0, 1, 1], [], []>} : vector<186x64xf32>, vector<64x62xf32>, vector<186x62xf32> -> vector<186x62xf32>
    %14 = arith.addf %7, %13 : vector<186x62xf32>
    %c2 = arith.constant 2 : index
    %c0_16 = arith.constant 0 : index
    %c0_17 = arith.constant 0 : index
    %15 = vector.load %arg2[%c2, %c0_16, %c0_17] : memref<3x128x62xf32, #tpu.memory_space<vmem>>, vector<1x128x62xf32>
    %16 = vector.shape_cast %15 : vector<1x128x62xf32> to vector<128x62xf32>
    %cst_18 = arith.constant dense<0.000000e+00> : vector<64x62xf32>
    %17 = tpu.matmul %1, %16, %cst_18 {dimension_numbers = #tpu.dot_dimension_numbers<[1], [0], [0], [1], [0, 0, 1, 1], [], []>} : vector<64x128xf32>, vector<128x62xf32>, vector<64x62xf32> -> vector<64x62xf32>
    %c2_19 = arith.constant 2 : index
    %c0_20 = arith.constant 0 : index
    %c0_21 = arith.constant 0 : index
    %18 = vector.load %arg3[%c2_19, %c0_20, %c0_21] : memref<3x186x64xf32, #tpu.memory_space<vmem>>, vector<1x186x64xf32>
    %19 = vector.shape_cast %18 : vector<1x186x64xf32> to vector<186x64xf32>
    %cst_22 = arith.constant dense<0.000000e+00> : vector<186x62xf32>
    %20 = tpu.matmul %19, %17, %cst_22 {dimension_numbers = #tpu.dot_dimension_numbers<[1], [0], [0], [1], [0, 0, 1, 1], [], []>} : vector<186x64xf32>, vector<64x62xf32>, vector<186x62xf32> -> vector<186x62xf32>
    %21 = arith.addf %14, %20 : vector<186x62xf32>
    %c0_23 = arith.constant 0 : index
    %c0_24 = arith.constant 0 : index
    %22 = vector.load %arg4[%c0_23, %c0_24] : memref<186x1xf32, #tpu.memory_space<vmem>>, vector<186x1xf32>
    %23 = vector.broadcast %22 : vector<186x1xf32> to vector<186x62xf32>
    %24 = arith.addf %21, %23 : vector<186x62xf32>
    %cst_25 = arith.constant 0.000000e+00 : f32
    %25 = vector.broadcast %cst_25 : f32 to vector<186x62xf32>
    %26 = arith.maximumf %24, %25 : vector<186x62xf32>
    %c0_26 = arith.constant 0 : index
    %c0_27 = arith.constant 0 : index
    %c0_28 = arith.constant 0 : index
    %27 = vector.load %arg5[%c0_26, %c0_27, %c0_28] : memref<3x62x30xf32, #tpu.memory_space<vmem>>, vector<1x62x30xf32>
    %28 = vector.shape_cast %27 : vector<1x62x30xf32> to vector<62x30xf32>
    %cst_29 = arith.constant dense<0.000000e+00> : vector<186x30xf32>
    %29 = tpu.matmul %26, %28, %cst_29 {dimension_numbers = #tpu.dot_dimension_numbers<[1], [0], [0], [1], [0, 0, 1, 1], [], []>} : vector<186x62xf32>, vector<62x30xf32>, vector<186x30xf32> -> vector<186x30xf32>
    %c0_30 = arith.constant 0 : index
    %c0_31 = arith.constant 0 : index
    %c0_32 = arith.constant 0 : index
    %30 = vector.load %arg6[%c0_30, %c0_31, %c0_32] : memref<3x90x186xf32, #tpu.memory_space<vmem>>, vector<1x90x186xf32>
    %31 = vector.shape_cast %30 : vector<1x90x186xf32> to vector<90x186xf32>
    %cst_33 = arith.constant dense<0.000000e+00> : vector<90x30xf32>
    %32 = tpu.matmul %31, %29, %cst_33 {dimension_numbers = #tpu.dot_dimension_numbers<[1], [0], [0], [1], [0, 0, 1, 1], [], []>} : vector<90x186xf32>, vector<186x30xf32>, vector<90x30xf32> -> vector<90x30xf32>
    %c1_34 = arith.constant 1 : index
    %c0_35 = arith.constant 0 : index
    %c0_36 = arith.constant 0 : index
    %33 = vector.load %arg5[%c1_34, %c0_35, %c0_36] : memref<3x62x30xf32, #tpu.memory_space<vmem>>, vector<1x62x30xf32>
    %34 = vector.shape_cast %33 : vector<1x62x30xf32> to vector<62x30xf32>
    %cst_37 = arith.constant dense<0.000000e+00> : vector<186x30xf32>
    %35 = tpu.matmul %26, %34, %cst_37 {dimension_numbers = #tpu.dot_dimension_numbers<[1], [0], [0], [1], [0, 0, 1, 1], [], []>} : vector<186x62xf32>, vector<62x30xf32>, vector<186x30xf32> -> vector<186x30xf32>
    %c1_38 = arith.constant 1 : index
    %c0_39 = arith.constant 0 : index
    %c0_40 = arith.constant 0 : index
    %36 = vector.load %arg6[%c1_38, %c0_39, %c0_40] : memref<3x90x186xf32, #tpu.memory_space<vmem>>, vector<1x90x186xf32>
    %37 = vector.shape_cast %36 : vector<1x90x186xf32> to vector<90x186xf32>
    %cst_41 = arith.constant dense<0.000000e+00> : vector<90x30xf32>
    %38 = tpu.matmul %37, %35, %cst_41 {dimension_numbers = #tpu.dot_dimension_numbers<[1], [0], [0], [1], [0, 0, 1, 1], [], []>} : vector<90x186xf32>, vector<186x30xf32>, vector<90x30xf32> -> vector<90x30xf32>
    %39 = arith.addf %32, %38 : vector<90x30xf32>
    %c2_42 = arith.constant 2 : index
    %c0_43 = arith.constant 0 : index
    %c0_44 = arith.constant 0 : index
    %40 = vector.load %arg5[%c2_42, %c0_43, %c0_44] : memref<3x62x30xf32, #tpu.memory_space<vmem>>, vector<1x62x30xf32>
    %41 = vector.shape_cast %40 : vector<1x62x30xf32> to vector<62x30xf32>
    %cst_45 = arith.constant dense<0.000000e+00> : vector<186x30xf32>
    %42 = tpu.matmul %26, %41, %cst_45 {dimension_numbers = #tpu.dot_dimension_numbers<[1], [0], [0], [1], [0, 0, 1, 1], [], []>} : vector<186x62xf32>, vector<62x30xf32>, vector<186x30xf32> -> vector<186x30xf32>
    %c2_46 = arith.constant 2 : index
    %c0_47 = arith.constant 0 : index
    %c0_48 = arith.constant 0 : index
    %43 = vector.load %arg6[%c2_46, %c0_47, %c0_48] : memref<3x90x186xf32, #tpu.memory_space<vmem>>, vector<1x90x186xf32>
    %44 = vector.shape_cast %43 : vector<1x90x186xf32> to vector<90x186xf32>
    %cst_49 = arith.constant dense<0.000000e+00> : vector<90x30xf32>
    %45 = tpu.matmul %44, %42, %cst_49 {dimension_numbers = #tpu.dot_dimension_numbers<[1], [0], [0], [1], [0, 0, 1, 1], [], []>} : vector<90x186xf32>, vector<186x30xf32>, vector<90x30xf32> -> vector<90x30xf32>
    %46 = arith.addf %39, %45 : vector<90x30xf32>
    %c0_50 = arith.constant 0 : index
    %c0_51 = arith.constant 0 : index
    %47 = vector.load %arg7[%c0_50, %c0_51] : memref<90x1xf32, #tpu.memory_space<vmem>>, vector<90x1xf32>
    %48 = vector.broadcast %47 : vector<90x1xf32> to vector<90x30xf32>
    %49 = arith.addf %46, %48 : vector<90x30xf32>
    %cst_52 = arith.constant 0.000000e+00 : f32
    %50 = vector.broadcast %cst_52 : f32 to vector<90x30xf32>
    %51 = arith.maximumf %49, %50 : vector<90x30xf32>
    %c0_53 = arith.constant 0 : index
    %c0_54 = arith.constant 0 : index
    %c0_55 = arith.constant 0 : index
    %52 = vector.load %arg8[%c0_53, %c0_54, %c0_55] : memref<2x30x14xf32, #tpu.memory_space<vmem>>, vector<1x30x14xf32>
    %53 = vector.shape_cast %52 : vector<1x30x14xf32> to vector<30x14xf32>
    %cst_56 = arith.constant dense<0.000000e+00> : vector<90x14xf32>
    %54 = tpu.matmul %51, %53, %cst_56 {dimension_numbers = #tpu.dot_dimension_numbers<[1], [0], [0], [1], [0, 0, 1, 1], [], []>} : vector<90x30xf32>, vector<30x14xf32>, vector<90x14xf32> -> vector<90x14xf32>
    %c0_57 = arith.constant 0 : index
    %c0_58 = arith.constant 0 : index
    %c0_59 = arith.constant 0 : index
    %55 = vector.load %arg9[%c0_57, %c0_58, %c0_59] : memref<2x42x90xf32, #tpu.memory_space<vmem>>, vector<1x42x90xf32>
    %56 = vector.shape_cast %55 : vector<1x42x90xf32> to vector<42x90xf32>
    %cst_60 = arith.constant dense<0.000000e+00> : vector<42x14xf32>
    %57 = tpu.matmul %56, %54, %cst_60 {dimension_numbers = #tpu.dot_dimension_numbers<[1], [0], [0], [1], [0, 0, 1, 1], [], []>} : vector<42x90xf32>, vector<90x14xf32>, vector<42x14xf32> -> vector<42x14xf32>
    %c1_61 = arith.constant 1 : index
    %c0_62 = arith.constant 0 : index
    %c0_63 = arith.constant 0 : index
    %58 = vector.load %arg9[%c1_61, %c0_62, %c0_63] : memref<2x42x90xf32, #tpu.memory_space<vmem>>, vector<1x42x90xf32>
    %59 = vector.shape_cast %58 : vector<1x42x90xf32> to vector<42x90xf32>
    %cst_64 = arith.constant dense<0.000000e+00> : vector<42x14xf32>
    %60 = tpu.matmul %59, %54, %cst_64 {dimension_numbers = #tpu.dot_dimension_numbers<[1], [0], [0], [1], [0, 0, 1, 1], [], []>} : vector<42x90xf32>, vector<90x14xf32>, vector<42x14xf32> -> vector<42x14xf32>
    %61 = arith.maximumf %57, %60 : vector<42x14xf32>
    %c1_65 = arith.constant 1 : index
    %c0_66 = arith.constant 0 : index
    %c0_67 = arith.constant 0 : index
    %62 = vector.load %arg8[%c1_65, %c0_66, %c0_67] : memref<2x30x14xf32, #tpu.memory_space<vmem>>, vector<1x30x14xf32>
    %63 = vector.shape_cast %62 : vector<1x30x14xf32> to vector<30x14xf32>
    %cst_68 = arith.constant dense<0.000000e+00> : vector<90x14xf32>
    %64 = tpu.matmul %51, %63, %cst_68 {dimension_numbers = #tpu.dot_dimension_numbers<[1], [0], [0], [1], [0, 0, 1, 1], [], []>} : vector<90x30xf32>, vector<30x14xf32>, vector<90x14xf32> -> vector<90x14xf32>
    %c0_69 = arith.constant 0 : index
    %c0_70 = arith.constant 0 : index
    %c0_71 = arith.constant 0 : index
    %65 = vector.load %arg9[%c0_69, %c0_70, %c0_71] : memref<2x42x90xf32, #tpu.memory_space<vmem>>, vector<1x42x90xf32>
    %66 = vector.shape_cast %65 : vector<1x42x90xf32> to vector<42x90xf32>
    %cst_72 = arith.constant dense<0.000000e+00> : vector<42x14xf32>
    %67 = tpu.matmul %66, %64, %cst_72 {dimension_numbers = #tpu.dot_dimension_numbers<[1], [0], [0], [1], [0, 0, 1, 1], [], []>} : vector<42x90xf32>, vector<90x14xf32>, vector<42x14xf32> -> vector<42x14xf32>
    %68 = arith.maximumf %61, %67 : vector<42x14xf32>
    %c1_73 = arith.constant 1 : index
    %c0_74 = arith.constant 0 : index
    %c0_75 = arith.constant 0 : index
    %69 = vector.load %arg9[%c1_73, %c0_74, %c0_75] : memref<2x42x90xf32, #tpu.memory_space<vmem>>, vector<1x42x90xf32>
    %70 = vector.shape_cast %69 : vector<1x42x90xf32> to vector<42x90xf32>
    %cst_76 = arith.constant dense<0.000000e+00> : vector<42x14xf32>
    %71 = tpu.matmul %70, %64, %cst_76 {dimension_numbers = #tpu.dot_dimension_numbers<[1], [0], [0], [1], [0, 0, 1, 1], [], []>} : vector<42x90xf32>, vector<90x14xf32>, vector<42x14xf32> -> vector<42x14xf32>
    %72 = arith.maximumf %68, %71 : vector<42x14xf32>
    %c0_77 = arith.constant 0 : index
    %c0_78 = arith.constant 0 : index
    %c0_79 = arith.constant 0 : index
    %73 = vector.load %arg10[%c0_77, %c0_78, %c0_79] : memref<3x14x6xf32, #tpu.memory_space<vmem>>, vector<1x14x6xf32>
    %74 = vector.shape_cast %73 : vector<1x14x6xf32> to vector<14x6xf32>
    %cst_80 = arith.constant dense<0.000000e+00> : vector<42x6xf32>
    %75 = tpu.matmul %72, %74, %cst_80 {dimension_numbers = #tpu.dot_dimension_numbers<[1], [0], [0], [1], [0, 0, 1, 1], [], []>} : vector<42x14xf32>, vector<14x6xf32>, vector<42x6xf32> -> vector<42x6xf32>
    %c0_81 = arith.constant 0 : index
    %c0_82 = arith.constant 0 : index
    %c0_83 = arith.constant 0 : index
    %76 = vector.load %arg11[%c0_81, %c0_82, %c0_83] : memref<3x9x42xf32, #tpu.memory_space<vmem>>, vector<1x9x42xf32>
    %77 = vector.shape_cast %76 : vector<1x9x42xf32> to vector<9x42xf32>
    %cst_84 = arith.constant dense<0.000000e+00> : vector<9x6xf32>
    %78 = tpu.matmul %77, %75, %cst_84 {dimension_numbers = #tpu.dot_dimension_numbers<[1], [0], [0], [1], [0, 0, 1, 1], [], []>} : vector<9x42xf32>, vector<42x6xf32>, vector<9x6xf32> -> vector<9x6xf32>
    %c1_85 = arith.constant 1 : index
    %c0_86 = arith.constant 0 : index
    %c0_87 = arith.constant 0 : index
    %79 = vector.load %arg10[%c1_85, %c0_86, %c0_87] : memref<3x14x6xf32, #tpu.memory_space<vmem>>, vector<1x14x6xf32>
    %80 = vector.shape_cast %79 : vector<1x14x6xf32> to vector<14x6xf32>
    %cst_88 = arith.constant dense<0.000000e+00> : vector<42x6xf32>
    %81 = tpu.matmul %72, %80, %cst_88 {dimension_numbers = #tpu.dot_dimension_numbers<[1], [0], [0], [1], [0, 0, 1, 1], [], []>} : vector<42x14xf32>, vector<14x6xf32>, vector<42x6xf32> -> vector<42x6xf32>
    %c1_89 = arith.constant 1 : index
    %c0_90 = arith.constant 0 : index
    %c0_91 = arith.constant 0 : index
    %82 = vector.load %arg11[%c1_89, %c0_90, %c0_91] : memref<3x9x42xf32, #tpu.memory_space<vmem>>, vector<1x9x42xf32>
    %83 = vector.shape_cast %82 : vector<1x9x42xf32> to vector<9x42xf32>
    %cst_92 = arith.constant dense<0.000000e+00> : vector<9x6xf32>
    %84 = tpu.matmul %83, %81, %cst_92 {dimension_numbers = #tpu.dot_dimension_numbers<[1], [0], [0], [1], [0, 0, 1, 1], [], []>} : vector<9x42xf32>, vector<42x6xf32>, vector<9x6xf32> -> vector<9x6xf32>
    %85 = arith.addf %78, %84 : vector<9x6xf32>
    %c2_93 = arith.constant 2 : index
    %c0_94 = arith.constant 0 : index
    %c0_95 = arith.constant 0 : index
    %86 = vector.load %arg10[%c2_93, %c0_94, %c0_95] : memref<3x14x6xf32, #tpu.memory_space<vmem>>, vector<1x14x6xf32>
    %87 = vector.shape_cast %86 : vector<1x14x6xf32> to vector<14x6xf32>
    %cst_96 = arith.constant dense<0.000000e+00> : vector<42x6xf32>
    %88 = tpu.matmul %72, %87, %cst_96 {dimension_numbers = #tpu.dot_dimension_numbers<[1], [0], [0], [1], [0, 0, 1, 1], [], []>} : vector<42x14xf32>, vector<14x6xf32>, vector<42x6xf32> -> vector<42x6xf32>
    %c2_97 = arith.constant 2 : index
    %c0_98 = arith.constant 0 : index
    %c0_99 = arith.constant 0 : index
    %89 = vector.load %arg11[%c2_97, %c0_98, %c0_99] : memref<3x9x42xf32, #tpu.memory_space<vmem>>, vector<1x9x42xf32>
    %90 = vector.shape_cast %89 : vector<1x9x42xf32> to vector<9x42xf32>
    %cst_100 = arith.constant dense<0.000000e+00> : vector<9x6xf32>
    %91 = tpu.matmul %90, %88, %cst_100 {dimension_numbers = #tpu.dot_dimension_numbers<[1], [0], [0], [1], [0, 0, 1, 1], [], []>} : vector<9x42xf32>, vector<42x6xf32>, vector<9x6xf32> -> vector<9x6xf32>
    %92 = arith.addf %85, %91 : vector<9x6xf32>
    %c0_101 = arith.constant 0 : index
    %c0_102 = arith.constant 0 : index
    %93 = vector.load %arg12[%c0_101, %c0_102] : memref<9x1xf32, #tpu.memory_space<vmem>>, vector<9x1xf32>
    %94 = vector.broadcast %93 : vector<9x1xf32> to vector<9x6xf32>
    %95 = arith.addf %92, %94 : vector<9x6xf32>
    %cst_103 = arith.constant 0.000000e+00 : f32
    %96 = vector.broadcast %cst_103 : f32 to vector<9x6xf32>
    %97 = arith.maximumf %95, %96 : vector<9x6xf32>
    %c0_104 = arith.constant 0 : index
    %c0_105 = arith.constant 0 : index
    %98 = vector.load %arg15[%c0_104, %c0_105] : memref<64x1xf32, #tpu.memory_space<vmem>>, vector<64x1xf32>
    %c0_106 = arith.constant 0 : index
    %c0_107 = arith.constant 0 : index
    %c0_108 = arith.constant 0 : index
    %99 = vector.load %arg13[%c0_106, %c0_107, %c0_108] : memref<3x6x2xf32, #tpu.memory_space<vmem>>, vector<1x6x2xf32>
    %100 = vector.shape_cast %99 : vector<1x6x2xf32> to vector<6x2xf32>
    %cst_109 = arith.constant dense<0.000000e+00> : vector<9x2xf32>
    %101 = tpu.matmul %97, %100, %cst_109 {dimension_numbers = #tpu.dot_dimension_numbers<[1], [0], [0], [1], [0, 0, 1, 1], [], []>} : vector<9x6xf32>, vector<6x2xf32>, vector<9x2xf32> -> vector<9x2xf32>
    %c0_110 = arith.constant 0 : index
    %c0_111 = arith.constant 0 : index
    %c0_112 = arith.constant 0 : index
    %102 = vector.load %arg14[%c0_110, %c0_111, %c0_112] : memref<3x64x9xf32, #tpu.memory_space<vmem>>, vector<1x64x9xf32>
    %103 = vector.shape_cast %102 : vector<1x64x9xf32> to vector<64x9xf32>
    %cst_113 = arith.constant dense<0.000000e+00> : vector<64x2xf32>
    %104 = tpu.matmul %103, %101, %cst_113 {dimension_numbers = #tpu.dot_dimension_numbers<[1], [0], [0], [1], [0, 0, 1, 1], [], []>} : vector<64x9xf32>, vector<9x2xf32>, vector<64x2xf32> -> vector<64x2xf32>
    %105 = vector.broadcast %98 : vector<64x1xf32> to vector<64x2xf32>
    %106 = arith.addf %105, %104 : vector<64x2xf32>
    %c1_114 = arith.constant 1 : index
    %c0_115 = arith.constant 0 : index
    %c0_116 = arith.constant 0 : index
    %107 = vector.load %arg13[%c1_114, %c0_115, %c0_116] : memref<3x6x2xf32, #tpu.memory_space<vmem>>, vector<1x6x2xf32>
    %108 = vector.shape_cast %107 : vector<1x6x2xf32> to vector<6x2xf32>
    %cst_117 = arith.constant dense<0.000000e+00> : vector<9x2xf32>
    %109 = tpu.matmul %97, %108, %cst_117 {dimension_numbers = #tpu.dot_dimension_numbers<[1], [0], [0], [1], [0, 0, 1, 1], [], []>} : vector<9x6xf32>, vector<6x2xf32>, vector<9x2xf32> -> vector<9x2xf32>
    %c1_118 = arith.constant 1 : index
    %c0_119 = arith.constant 0 : index
    %c0_120 = arith.constant 0 : index
    %110 = vector.load %arg14[%c1_118, %c0_119, %c0_120] : memref<3x64x9xf32, #tpu.memory_space<vmem>>, vector<1x64x9xf32>
    %111 = vector.shape_cast %110 : vector<1x64x9xf32> to vector<64x9xf32>
    %cst_121 = arith.constant dense<0.000000e+00> : vector<64x2xf32>
    %112 = tpu.matmul %111, %109, %cst_121 {dimension_numbers = #tpu.dot_dimension_numbers<[1], [0], [0], [1], [0, 0, 1, 1], [], []>} : vector<64x9xf32>, vector<9x2xf32>, vector<64x2xf32> -> vector<64x2xf32>
    %113 = arith.addf %106, %112 : vector<64x2xf32>
    %c2_122 = arith.constant 2 : index
    %c0_123 = arith.constant 0 : index
    %c0_124 = arith.constant 0 : index
    %114 = vector.load %arg13[%c2_122, %c0_123, %c0_124] : memref<3x6x2xf32, #tpu.memory_space<vmem>>, vector<1x6x2xf32>
    %115 = vector.shape_cast %114 : vector<1x6x2xf32> to vector<6x2xf32>
    %cst_125 = arith.constant dense<0.000000e+00> : vector<9x2xf32>
    %116 = tpu.matmul %97, %115, %cst_125 {dimension_numbers = #tpu.dot_dimension_numbers<[1], [0], [0], [1], [0, 0, 1, 1], [], []>} : vector<9x6xf32>, vector<6x2xf32>, vector<9x2xf32> -> vector<9x2xf32>
    %c2_126 = arith.constant 2 : index
    %c0_127 = arith.constant 0 : index
    %c0_128 = arith.constant 0 : index
    %117 = vector.load %arg14[%c2_126, %c0_127, %c0_128] : memref<3x64x9xf32, #tpu.memory_space<vmem>>, vector<1x64x9xf32>
    %118 = vector.shape_cast %117 : vector<1x64x9xf32> to vector<64x9xf32>
    %cst_129 = arith.constant dense<0.000000e+00> : vector<64x2xf32>
    %119 = tpu.matmul %118, %116, %cst_129 {dimension_numbers = #tpu.dot_dimension_numbers<[1], [0], [0], [1], [0, 0, 1, 1], [], []>} : vector<64x9xf32>, vector<9x2xf32>, vector<64x2xf32> -> vector<64x2xf32>
    %120 = arith.addf %113, %119 : vector<64x2xf32>
    %cst_130 = arith.constant 0.000000e+00 : f32
    %121 = vector.broadcast %cst_130 : f32 to vector<64x2xf32>
    %122 = arith.maximumf %120, %121 : vector<64x2xf32>
    %c0_131 = arith.constant 0 : index
    %c0_132 = arith.constant 0 : index
    %123 = vector.load %arg16[%c0_131, %c0_132] : memref<128x64xf32, #tpu.memory_space<vmem>>, vector<128x64xf32>
    %cst_133 = arith.constant dense<0.000000e+00> : vector<128x2xf32>
    %124 = tpu.matmul %123, %122, %cst_133 {dimension_numbers = #tpu.dot_dimension_numbers<[1], [0], [0], [1], [0, 0, 1, 1], [], []>} : vector<128x64xf32>, vector<64x2xf32>, vector<128x2xf32> -> vector<128x2xf32>
    %c0_134 = arith.constant 0 : index
    %c0_135 = arith.constant 0 : index
    %125 = vector.load %arg17[%c0_134, %c0_135] : memref<128x1xf32, #tpu.memory_space<vmem>>, vector<128x1xf32>
    %126 = vector.broadcast %125 : vector<128x1xf32> to vector<128x2xf32>
    %127 = arith.addf %124, %126 : vector<128x2xf32>
    %cst_136 = arith.constant 0.000000e+00 : f32
    %128 = vector.broadcast %cst_136 : f32 to vector<128x2xf32>
    %129 = arith.maximumf %127, %128 : vector<128x2xf32>
    %c0_137 = arith.constant 0 : index
    %c0_138 = arith.constant 0 : index
    %130 = vector.load %arg18[%c0_137, %c0_138] : memref<2x128xf32, #tpu.memory_space<vmem>>, vector<2x128xf32>
    %cst_139 = arith.constant dense<0.000000e+00> : vector<2x2xf32>
    %131 = tpu.matmul %130, %129, %cst_139 {dimension_numbers = #tpu.dot_dimension_numbers<[1], [0], [0], [1], [0, 0, 1, 1], [], []>} : vector<2x128xf32>, vector<128x2xf32>, vector<2x2xf32> -> vector<2x2xf32>
    %c0_140 = arith.constant 0 : index
    %c0_141 = arith.constant 0 : index
    %132 = vector.load %arg19[%c0_140, %c0_141] : memref<2x1xf32, #tpu.memory_space<vmem>>, vector<2x1xf32>
    %133 = vector.broadcast %132 : vector<2x1xf32> to vector<2x2xf32>
    %134 = arith.addf %131, %133 : vector<2x2xf32>
    %135 = vector.extract_strided_slice %134 {offsets = [0, 0], sizes = [1, 2], strides = [1, 1]} : vector<2x2xf32> to vector<1x2xf32>
    %136 = vector.extract_strided_slice %134 {offsets = [1, 0], sizes = [1, 2], strides = [1, 1]} : vector<2x2xf32> to vector<1x2xf32>
    %137 = arith.maximumf %135, %136 : vector<1x2xf32>
    %138 = arith.subf %135, %137 : vector<1x2xf32>
    %139 = math.exp %138 : vector<1x2xf32>
    %140 = arith.subf %136, %137 : vector<1x2xf32>
    %141 = math.exp %140 : vector<1x2xf32>
    %142 = arith.addf %139, %141 : vector<1x2xf32>
    %cst_142 = arith.constant 1.000000e+00 : f32
    %143 = vector.broadcast %cst_142 : f32 to vector<1x2xf32>
    %144 = arith.divf %143, %142 : vector<1x2xf32>
    %145 = arith.mulf %139, %144 : vector<1x2xf32>
    %c0_143 = arith.constant 0 : index
    %c0_144 = arith.constant 0 : index
    %c0_145 = arith.constant 0 : index
    %146 = vector.load %arg20[%c0_143, %c0_144, %c0_145] : memref<1x2x2xf32, #tpu.memory_space<vmem>>, vector<1x1x2xf32>
    %147 = vector.shape_cast %146 : vector<1x1x2xf32> to vector<1x2xf32>
    %148 = vector.shape_cast %145 : vector<1x2xf32> to vector<1x1x2xf32>
    tpu.vector_store %arg20[%c0_143, %c0_144, %c0_145], %148 {strides = array<i32>} : memref<1x2x2xf32, #tpu.memory_space<vmem>>, vector<1x1x2xf32>,
    %149 = arith.mulf %141, %144 : vector<1x2xf32>
    %c0_146 = arith.constant 0 : index
    %c1_147 = arith.constant 1 : index
    %c0_148 = arith.constant 0 : index
    %150 = vector.load %arg20[%c0_146, %c1_147, %c0_148] : memref<1x2x2xf32, #tpu.memory_space<vmem>>, vector<1x1x2xf32>
    %151 = vector.shape_cast %150 : vector<1x1x2xf32> to vector<1x2xf32>
    %152 = vector.shape_cast %149 : vector<1x2xf32> to vector<1x1x2xf32>
    tpu.vector_store %arg20[%c0_146, %c1_147, %c0_148], %152 {strides = array<i32>} : memref<1x2x2xf32, #tpu.memory_space<vmem>>, vector<1x1x2xf32>,
    return
  }
  func.func @transform_0(%arg0: i32) -> (i32, i32, i32) {
    %c0_i32 = arith.constant 0 : i32
    %c0_i32_0 = arith.constant 0 : i32
    %c0_i32_1 = arith.constant 0 : i32
    return %arg0, %c0_i32, %c0_i32_0 : i32, i32, i32
  }
  func.func @transform_1(%arg0: i32) -> (i32, i32, i32) {
    %c0_i32 = arith.constant 0 : i32
    %c0_i32_0 = arith.constant 0 : i32
    %c0_i32_1 = arith.constant 0 : i32
    %c0_i32_2 = arith.constant 0 : i32
    return %c0_i32, %c0_i32_0, %c0_i32_1 : i32, i32, i32
  }
  func.func @transform_2(%arg0: i32) -> (i32, i32, i32) {
    %c0_i32 = arith.constant 0 : i32
    %c0_i32_0 = arith.constant 0 : i32
    %c0_i32_1 = arith.constant 0 : i32
    %c0_i32_2 = arith.constant 0 : i32
    return %c0_i32, %c0_i32_0, %c0_i32_1 : i32, i32, i32
  }
  func.func @transform_3(%arg0: i32) -> (i32, i32) {
    %c0_i32 = arith.constant 0 : i32
    %c0_i32_0 = arith.constant 0 : i32
    %c0_i32_1 = arith.constant 0 : i32
    return %c0_i32, %c0_i32_0 : i32, i32
  }
  func.func @transform_4(%arg0: i32) -> (i32, i32, i32) {
    %c0_i32 = arith.constant 0 : i32
    %c0_i32_0 = arith.constant 0 : i32
    %c0_i32_1 = arith.constant 0 : i32
    %c0_i32_2 = arith.constant 0 : i32
    return %c0_i32, %c0_i32_0, %c0_i32_1 : i32, i32, i32
  }
  func.func @transform_5(%arg0: i32) -> (i32, i32, i32) {
    %c0_i32 = arith.constant 0 : i32
    %c0_i32_0 = arith.constant 0 : i32
    %c0_i32_1 = arith.constant 0 : i32
    %c0_i32_2 = arith.constant 0 : i32
    return %c0_i32, %c0_i32_0, %c0_i32_1 : i32, i32, i32
  }
  func.func @transform_6(%arg0: i32) -> (i32, i32) {
    %c0_i32 = arith.constant 0 : i32
    %c0_i32_0 = arith.constant 0 : i32
    %c0_i32_1 = arith.constant 0 : i32
    return %c0_i32, %c0_i32_0 : i32, i32
  }
  func.func @transform_7(%arg0: i32) -> (i32, i32, i32) {
    %c0_i32 = arith.constant 0 : i32
    %c0_i32_0 = arith.constant 0 : i32
    %c0_i32_1 = arith.constant 0 : i32
    %c0_i32_2 = arith.constant 0 : i32
    return %c0_i32, %c0_i32_0, %c0_i32_1 : i32, i32, i32
  }
  func.func @transform_8(%arg0: i32) -> (i32, i32, i32) {
    %c0_i32 = arith.constant 0 : i32
    %c0_i32_0 = arith.constant 0 : i32
    %c0_i32_1 = arith.constant 0 : i32
    %c0_i32_2 = arith.constant 0 : i32
    return %c0_i32, %c0_i32_0, %c0_i32_1 : i32, i32, i32
  }
  func.func @transform_9(%arg0: i32) -> (i32, i32, i32) {
    %c0_i32 = arith.constant 0 : i32
    %c0_i32_0 = arith.constant 0 : i32
    %c0_i32_1 = arith.constant 0 : i32
    %c0_i32_2 = arith.constant 0 : i32
    return %c0_i32, %c0_i32_0, %c0_i32_1 : i32, i32, i32
  }
  func.func @transform_10(%arg0: i32) -> (i32, i32, i32) {
    %c0_i32 = arith.constant 0 : i32
    %c0_i32_0 = arith.constant 0 : i32
    %c0_i32_1 = arith.constant 0 : i32
    %c0_i32_2 = arith.constant 0 : i32
    return %c0_i32, %c0_i32_0, %c0_i32_1 : i32, i32, i32
  }
  func.func @transform_11(%arg0: i32) -> (i32, i32) {
    %c0_i32 = arith.constant 0 : i32
    %c0_i32_0 = arith.constant 0 : i32
    %c0_i32_1 = arith.constant 0 : i32
    return %c0_i32, %c0_i32_0 : i32, i32
  }
  func.func @transform_12(%arg0: i32) -> (i32, i32, i32) {
    %c0_i32 = arith.constant 0 : i32
    %c0_i32_0 = arith.constant 0 : i32
    %c0_i32_1 = arith.constant 0 : i32
    %c0_i32_2 = arith.constant 0 : i32
    return %c0_i32, %c0_i32_0, %c0_i32_1 : i32, i32, i32
  }
  func.func @transform_13(%arg0: i32) -> (i32, i32, i32) {
    %c0_i32 = arith.constant 0 : i32
    %c0_i32_0 = arith.constant 0 : i32
    %c0_i32_1 = arith.constant 0 : i32
    %c0_i32_2 = arith.constant 0 : i32
    return %c0_i32, %c0_i32_0, %c0_i32_1 : i32, i32, i32
  }
  func.func @transform_14(%arg0: i32) -> (i32, i32) {
    %c0_i32 = arith.constant 0 : i32
    %c0_i32_0 = arith.constant 0 : i32
    %c0_i32_1 = arith.constant 0 : i32
    return %c0_i32, %c0_i32_0 : i32, i32
  }
  func.func @transform_15(%arg0: i32) -> (i32, i32) {
    %c0_i32 = arith.constant 0 : i32
    %c0_i32_0 = arith.constant 0 : i32
    %c0_i32_1 = arith.constant 0 : i32
    return %c0_i32, %c0_i32_0 : i32, i32
  }
  func.func @transform_16(%arg0: i32) -> (i32, i32) {
    %c0_i32 = arith.constant 0 : i32
    %c0_i32_0 = arith.constant 0 : i32
    %c0_i32_1 = arith.constant 0 : i32
    return %c0_i32, %c0_i32_0 : i32, i32
  }
  func.func @transform_17(%arg0: i32) -> (i32, i32) {
    %c0_i32 = arith.constant 0 : i32
    %c0_i32_0 = arith.constant 0 : i32
    %c0_i32_1 = arith.constant 0 : i32
    return %c0_i32, %c0_i32_0 : i32, i32
  }
  func.func @transform_18(%arg0: i32) -> (i32, i32) {
    %c0_i32 = arith.constant 0 : i32
    %c0_i32_0 = arith.constant 0 : i32
    %c0_i32_1 = arith.constant 0 : i32
    return %c0_i32, %c0_i32_0 : i32, i32
  }
  func.func @transform_19(%arg0: i32) -> (i32, i32, i32) {
    %c0_i32 = arith.constant 0 : i32
    %c0_i32_0 = arith.constant 0 : i32
    %c0_i32_1 = arith.constant 0 : i32
    return %arg0, %c0_i32, %c0_i32_0 : i32, i32, i32
  }
}

</mosaic_0001>

<bundles_post_ra>
// kernel: net_forward.1
= control target key start
LH: loop header
LB: loop body
LE: loop exit
PB: predicated region body
PF: predicated region fallthrough
CT: control target
= control target key end

     0   :  { %vm362_vm0 = vcmask 523264   ;;  %vm1578_vm1 = vcmask 1045504   ;;  %vm7862_vm2 = vmmov 1   ;;  %vm1505_vm4 = vcmask 506880   ;;  %s9875_s1 = inlined_call_operand.vmem [shape: f32[3,128,62], index: 1, kind: input, shape index: {}]   ;;  %s9876_s0 = inlined_call_operand.vmem [shape: f32[1,64,128], index: 0, kind: input, shape index: {}]   ;;  %s9877_s2 = inlined_call_operand.vmem [shape: f32[3,186,64], index: 2, kind: input, shape index: {}]   ;;  %s9878_s3 = inlined_call_operand.vmem [shape: f32[186,1], index: 3, kind: input, shape index: {}]   ;;  %s9879_s6 = inlined_call_operand.vmem [shape: f32[90,1], index: 6, kind: input, shape index: {}]   ;;  %s9880_s11 = inlined_call_operand.vmem [shape: f32[9,1], index: 11, kind: input, shape index: {}]   ;;  %s9881_s14 = inlined_call_operand.vmem [shape: f32[64,1], index: 14, kind: input, shape index: {}]   ;;  %s9882_s16 = inlined_call_operand.vmem [shape: f32[128,1], index: 16, kind: input, shape index: {}]   ;;  %s9883_s4 = inlined_call_operand.vmem [shape: f32[3,62,30], index: 4, kind: input, shape index: {}]   ;;  %s9884_s18 = inlined_call_operand.vmem [shape: f32[2,1], index: 18, kind: input, shape index: {}]   ;;  %s9885_s5 = inlined_call_operand.vmem [shape: f32[3,90,186], index: 5, kind: input, shape index: {}]   ;;  %s9886_s7 = inlined_call_operand.vmem [shape: f32[2,30,14], index: 7, kind: input, shape index: {}]   ;;  %s9887_s8 = inlined_call_operand.vmem [shape: f32[2,42,90], index: 8, kind: input, shape index: {}]   ;;  %s9888_s9 = inlined_call_operand.vmem [shape: f32[3,14,6], index: 9, kind: input, shape index: {}]   ;;  %s9889_s10 = inlined_call_operand.vmem [shape: f32[3,9,42], index: 10, kind: input, shape index: {}]   ;;  %s9890_s12 = inlined_call_operand.vmem [shape: f32[3,6,2], index: 12, kind: input, shape index: {}]   ;;  %s9891_s13 = inlined_call_operand.vmem [shape: f32[3,64,9], index: 13, kind: input, shape index: {}]   ;;  %s9892_s15 = inlined_call_operand.vmem [shape: f32[128,64], index: 15, kind: input, shape index: {}]   ;;  %s9893_s17 = inlined_call_operand.vmem [shape: f32[2,128], index: 17, kind: input, shape index: {}]   ;;  %s9894_s19 = inlined_call_operand.vmem [shape: f32[1,2,2], index: 19, kind: output, shape index: {}]  }
   0x1   :  { %9899 = sst [smem:[#allocation2_spill]] %s9875_s1  ;;  %vm8658_vm3 = vmpackc.low %vm1578_vm1, %vm7862_vm2  ;;  %vm2013_vm5 = vcmask 474112   ;;  %vm2050_vm6 = vcmask 1041408   ;;  %vm2841_vm8 = vcmask 244736   ;;  %vm3012_vm9 = vcmask 736256  }
   0x2   :  { %9900 = sst [smem:[#allocation3_spill]] %s9876_s0  ;;  %s9903_s20 = sld [smem:[#allocation2_spill]]  ;;  %vm8859_vm7 = vmpackc.low %vm2050_vm6, %vm7862_vm2  ;;  %vm3595_vm10 = vcmask 113664   ;;  %vm3818_vm11 = vcmask 343040   ;;  %vm4202_vm12 = vcmask 48128   ;;  %vm4295_vm13 = vcmask 72704  }
   0x3   :  { %9901 = sst [smem:[#allocation4_spill]] %s9877_s2  ;;  %s9904_s21 = sld [smem:[#allocation3_spill]]  ;;  %vm4320_vm14 = vcmask 1040384  }
   0x4   :  { %9902 = sst [smem:[#allocation5_spill]] %s9878_s3  ;;  %s9905_s25 = sld [smem:[#allocation4_spill]]  ;;  %vm9686_vm15 = vmpackc.low %vm4320_vm14, %vm7862_vm2  ;;  %vm5367_vm2 = vcmask 9217  }
   0x5   :  { %s9906_s26 = sld [smem:[#allocation5_spill]] }
   0x8   :  { %v5373_v0 = vld [vmem:[%s9903_s20 + $0x80] sm:$0xff]  ;;  %v5374_v1 = vld [vmem:[%s9903_s20 + $0x88] sm:$0xff]  ;;  %v5375_v2 = vld [vmem:[%s9903_s20 + $0x90] sm:$0xff] }
   0x9   :  { %v7253_v3 = vpack.c.bf16 %v5374_v1, %v5373_v0  ;;  %v5376_v4 = vld [vmem:[%s9903_s20 + $0x98] sm:$0xff]  ;;  %v5377_v6 = vld [vmem:[%s9903_s20 + $0xa0] sm:$0xff]  ;;  %v5378_v7 = vld [vmem:[%s9903_s20 + $0xa8] sm:$0xff] }
   0xa   :  { %v7257_v5 = vpack.c.bf16 %v5376_v4, %v5375_v2  ;;  %v70_v8 = vld [vmem:[%s9903_s20] sm:$0xff]  ;;  %v71_v9 = vld [vmem:[%s9903_s20 + $0x8] sm:$0xff]  ;;  %v72_v11 = vld [vmem:[%s9903_s20 + $0x10] sm:$0xff]  ;;  %v7261_v12 = vpack.c.bf16 %v5378_v7, %v5377_v6 }
   0xb   :  { %7254 = vmatprep.subr.bf16.mxu1 %v7253_v3  ;;  %v7221_v10 = vpack.c.bf16 %v71_v9, %v70_v8  ;;  %v5379_v13 = vld [vmem:[%s9903_s20 + $0xb0] sm:$0xff]  ;;  %v73_v14 = vld [vmem:[%s9903_s20 + $0x18] sm:$0xff]  ;;  %v74_v17 = vld [vmem:[%s9903_s20 + $0x20] sm:$0xff] }
   0xc   :  { %7256 = vmatpush3.bf16.msra.mxu1 %v7253_v3  ;;  %v5380_v15 = vld [vmem:[%s9903_s20 + $0xb8] sm:$0xff]  ;;  %v7225_v16 = vpack.c.bf16 %v73_v14, %v72_v11  ;;  %v75_v18 = vld [vmem:[%s9903_s20 + $0x28] sm:$0xff]  ;;  %v8011_v20 = vld [vmem:[%s9904_s21] sm:$0xff] }
   0xd   :  { %7258 = vmatprep.subr.bf16.mxu1 %v7257_v5  ;;  %7222 = vmatprep.subr.bf16.mxu0 %v7221_v10  ;;  %v7229_v19 = vpack.c.bf16 %v75_v18, %v74_v17  ;;  %v7265_v21 = vpack.c.bf16 %v5380_v15, %v5379_v13  ;;  %v76_v22 = vld [vmem:[%s9903_s20 + $0x30] sm:$0xff]  ;;  %v77_v23 = vld [vmem:[%s9903_s20 + $0x38] sm:$0xff]  ;;  %v5381_v24 = vld [vmem:[%s9903_s20 + $0xc0] sm:$0xff]  ;;  %v7861_v17 = vmov 0  }
   0xe   :  { %7224 = vmatpush3.bf16.msra.mxu0 %v7221_v10  ;;  %6447 = vmatprep.mubr.f32.mxu1 %v8011_v20  ;;  %v5382_v25 = vld [vmem:[%s9903_s20 + $0xc8] sm:$0xff]  ;;  %v7233_v26 = vpack.c.bf16 %v77_v23, %v76_v22  ;;  %v78_v28 = vld [vmem:[%s9903_s20 + $0x40] sm:$0xff]  ;;  %v5383_v30 = vld [vmem:[%s9903_s20 + $0xd0] sm:$0xff] }
   0xf   :  { %7226 = vmatprep.subr.bf16.mxu0 %v7225_v16  ;;  %6403 = vmatprep.mubr.f32.mxu0 %v8011_v20  ;;  %v7269_v27 = vpack.c.bf16 %v5382_v25, %v5381_v24  ;;  %v79_v29 = vld [vmem:[%s9903_s20 + $0x48] sm:$0xff]  ;;  %v5384_v31 = vld [vmem:[%s9903_s20 + $0xd8] sm:$0xff]  ;;  %v80_v34 = vld [vmem:[%s9903_s20 + $0x50] sm:$0xff] }
  0x10   :  { %7260 = vmatpush3.bf16.msra.mxu1 %v7257_v5  ;;  %v7237_v32 = vpack.c.bf16 %v79_v29, %v78_v28  ;;  %v7273_v33 = vpack.c.bf16 %v5384_v31, %v5383_v30  ;;  %v81_v35 = vld [vmem:[%s9903_s20 + $0x58] sm:$0xff]  ;;  %v5385_v36 = vld [vmem:[%s9903_s20 + $0xe0] sm:$0xff]  ;;  %v5386_v37 = vld [vmem:[%s9903_s20 + $0xe8] sm:$0xff]  ;;  %7853 = vset.pattern.permute.xlu0 %v7861_v17 }
  0x11   :  { %7262 = vmatprep.subr.bf16.mxu1 %v7261_v12  ;;  %v7241_v38 = vpack.c.bf16 %v81_v35, %v80_v34  ;;  %v7277_v39 = vpack.c.bf16 %v5386_v37, %v5385_v36  ;;  %v82_v40 = vld [vmem:[%s9903_s20 + $0x60] sm:$0xff]  ;;  %v83_v41 = vld [vmem:[%s9903_s20 + $0x68] sm:$0xff]  ;;  %v5387_v42 = vld [vmem:[%s9903_s20 + $0xf0] sm:$0xff]  ;;  %7854 = vset.pattern.permute.xlu1 %v7861_v17 }
  0x12   :  { %7228 = vmatpush3.bf16.msra.mxu0 %v7225_v16  ;;  %v5388_v43 = vld [vmem:[%s9903_s20 + $0xf8] sm:$0xff]  ;;  %v7245_v44 = vpack.c.bf16 %v83_v41, %v82_v40  ;;  %v84_v46 = vld [vmem:[%s9903_s20 + $0x70] sm:$0xff]  ;;  %v5461_v48 = vld [vmem:[%s9903_s20 + $0x100] sm:$0xff] }
  0x13   :  { %7230 = vmatprep.subr.bf16.mxu0 %v7229_v19  ;;  %v7281_v45 = vpack.c.bf16 %v5388_v43, %v5387_v42  ;;  %v85_v47 = vld [vmem:[%s9903_s20 + $0x78] sm:$0xff]  ;;  %v5462_v49 = vld [vmem:[%s9903_s20 + $0x108] sm:$0xff]  ;;  %v5463_v52 = vld [vmem:[%s9903_s20 + $0x110] sm:$0xff] }
  0x14   :  { %7264 = vmatpush3.bf16.msra.mxu1 %v7261_v12  ;;  %v7249_v50 = vpack.c.bf16 %v85_v47, %v84_v46  ;;  %v7317_v51 = vpack.c.bf16 %v5462_v49, %v5461_v48  ;;  %v5464_v53 = vld [vmem:[%s9903_s20 + $0x118] sm:$0xff]  ;;  %v63_v54 = vld [vmem:[%s9904_s21 + $0x8] sm:$0xff]  ;;  %v64_v55 = vld [vmem:[%s9904_s21 + $0x10] sm:$0xff] }
  0x15   :  { %7266 = vmatprep.subr.bf16.mxu1 %v7265_v21  ;;  %v7321_v56 = vpack.c.bf16 %v5464_v53, %v5463_v52  ;;  %v5465_v57 = vld [vmem:[%s9903_s20 + $0x120] sm:$0xff]  ;;  %v5466_v58 = vld [vmem:[%s9903_s20 + $0x128] sm:$0xff]  ;;  %v65_v59 = vld [vmem:[%s9904_s21 + $0x18] sm:$0xff] }
  0x16   :  { %7232 = vmatpush3.bf16.msra.mxu0 %v7229_v19  ;;  %v66_v60 = vld [vmem:[%s9904_s21 + $0x20] sm:$0xff]  ;;  %v7325_v61 = vpack.c.bf16 %v5466_v58, %v5465_v57  ;;  %v5467_v62 = vld [vmem:[%s9903_s20 + $0x130] sm:$0xff]  ;;  %v5468_v63 = vld [vmem:[%s9903_s20 + $0x138] sm:$0xff] }
  0x17   :  { %7234 = vmatprep.subr.bf16.mxu0 %v7233_v26  ;;  %v67_v0 = vld [vmem:[%s9904_s21 + $0x28] sm:$0xff]  ;;  %v68_v1 = vld [vmem:[%s9904_s21 + $0x30] sm:$0xff]  ;;  %v7329_v2 = vpack.c.bf16 %v5468_v63, %v5467_v62  ;;  %v5469_v3 = vld [vmem:[%s9903_s20 + $0x140] sm:$0xff] }
  0x18   :  { %7268 = vmatpush3.bf16.msra.mxu1 %v7265_v21  ;;  %v5470_v4 = vld [vmem:[%s9903_s20 + $0x148] sm:$0xff]  ;;  %v69_v5 = vld [vmem:[%s9904_s21 + $0x38] sm:$0xff]  ;;  %v5471_v7 = vld [vmem:[%s9903_s20 + $0x150] sm:$0xff] }
  0x19   :  { %7270 = vmatprep.subr.bf16.mxu1 %v7269_v27  ;;  %v7333_v6 = vpack.c.bf16 %v5470_v4, %v5469_v3  ;;  %v5472_v8 = vld [vmem:[%s9903_s20 + $0x158] sm:$0xff]  ;;  %v5473_v10 = vld [vmem:[%s9903_s20 + $0x160] sm:$0xff]  ;;  %v5474_v11 = vld [vmem:[%s9903_s20 + $0x168] sm:$0xff] }
  0x1a   :  { %7236 = vmatpush3.bf16.msra.mxu0 %v7233_v26  ;;  %v7337_v9 = vpack.c.bf16 %v5472_v8, %v5471_v7  ;;  %v7341_v12 = vpack.c.bf16 %v5474_v11, %v5473_v10  ;;  %v5475_v13 = vld [vmem:[%s9903_s20 + $0x170] sm:$0xff]  ;;  %v5476_v14 = vld [vmem:[%s9903_s20 + $0x178] sm:$0xff]  ;;  %v5389_v16 = vld [vmem:[%s9905_s25 + $0xc0] sm:$0xff] }
  0x1b   :  { %7238 = vmatprep.subr.bf16.mxu0 %v7237_v32  ;;  %v7345_v15 = vpack.c.bf16 %v5476_v14, %v5475_v13  ;;  %v1305_v18 = vld [vmem:[%s9906_s26] sm:$0xff]  ;;  %v1306_v19 = vld [vmem:[%s9906_s26 + $0x8] sm:$0xff]  ;;  %v1308_v22 = vld [vmem:[%s9906_s26 + $0x18] sm:$0xff] }
  0x1c   :  { %7272 = vmatpush3.bf16.msra.mxu1 %v7269_v27  ;;  %1331 = vperm.xlu0 %7853, %v1305_v18   ;;  %v1309_v21 = vld [vmem:[%s9906_s26 + $0x20] sm:$0xff]  ;;  %v1311_v23 = vld [vmem:[%s9906_s26 + $0x30] sm:$0xff]  ;;  %v1310_v24 = vld [vmem:[%s9906_s26 + $0x28] sm:$0xff] }
  0x1d   :  { %7274 = vmatprep.subr.bf16.mxu1 %v7273_v33  ;;  %v1313_v25 = vld [vmem:[%s9906_s26 + $0x40] sm:$0xff]  ;;  %v1312_v26 = vld [vmem:[%s9906_s26 + $0x38] sm:$0xff]  ;;  %v1315_v27 = vld [vmem:[%s9906_s26 + $0x50] sm:$0xff] }
  0x1e   :  { %7240 = vmatpush3.bf16.msra.mxu0 %v7237_v32  ;;  %v1314_v28 = vld [vmem:[%s9906_s26 + $0x48] sm:$0xff]  ;;  %v1317_v29 = vld [vmem:[%s9906_s26 + $0x60] sm:$0xff]  ;;  %v1316_v30 = vld [vmem:[%s9906_s26 + $0x58] sm:$0xff] }
  0x1f   :  { %7242 = vmatprep.subr.bf16.mxu0 %v7241_v38  ;;  %v1319_v31 = vld [vmem:[%s9906_s26 + $0x70] sm:$0xff]  ;;  %v1318_v32 = vld [vmem:[%s9906_s26 + $0x68] sm:$0xff]  ;;  %v1320_v34 = vld [vmem:[%s9906_s26 + $0x78] sm:$0xff] }
  0x20   :  { %7276 = vmatpush3.bf16.msra.mxu1 %v7273_v33  ;;  %1336 = vperm.xlu0 %7853, %v1306_v19   ;;  %v1321_v33 = vld [vmem:[%s9906_s26 + $0x80] sm:$0xff]  ;;  %v1323_v35 = vld [vmem:[%s9906_s26 + $0x90] sm:$0xff]  ;;  %v1322_v36 = vld [vmem:[%s9906_s26 + $0x88] sm:$0xff] }
  0x21   :  { %7278 = vmatprep.subr.bf16.mxu1 %v7277_v39  ;;  %v1325_v37 = vld [vmem:[%s9906_s26 + $0xa0] sm:$0xff]  ;;  %v1326_v40 = vld [vmem:[%s9906_s26 + $0xa8] sm:$0xff]  ;;  %v1328_v42 = vld [vmem:[%s9906_s26 + $0xb8] sm:$0x3] }
  0x22   :  { %7244 = vmatpush3.bf16.msra.mxu0 %v7241_v38  ;;  %v1324_v38 = vld [vmem:[%s9906_s26 + $0x98] sm:$0xff]  ;;  %v2741_v41 = vld [vmem:[%s9879_s6] sm:$0xff]  ;;  %v2743_v43 = vld [vmem:[%s9879_s6 + $0x10] sm:$0xff] }
  0x23   :  { %7246 = vmatprep.subr.bf16.mxu0 %v7245_v44  ;;  %v2745_v46 = vld [vmem:[%s9879_s6 + $0x20] sm:$0xff]  ;;  %v2744_v52 = vld [vmem:[%s9879_s6 + $0x18] sm:$0xff]  ;;  %v2747_v53 = vld [vmem:[%s9879_s6 + $0x30] sm:$0xff] }
  0x24   :  { %7280 = vmatpush3.bf16.msra.mxu1 %v7277_v39  ;;  %1351 = vperm.xlu0 %7853, %v1309_v21   ;;  %v1327_v39 = vld [vmem:[%s9906_s26 + $0xb0] sm:$0xff]  ;;  %v2748_v4 = vld [vmem:[%s9879_s6 + $0x38] sm:$0xff]  ;;  %v2750_v11 = vld [vmem:[%s9879_s6 + $0x48] sm:$0xff] }
  0x25   :  { %7282 = vmatprep.subr.bf16.mxu1 %v7281_v45  ;;  %v4177_v14 = vld [vmem:[%s9880_s11] sm:$0xff]  ;;  %v5392_v17 = vld [vmem:[%s9905_s25 + $0xd8] sm:$0xff]  ;;  %v4195_v21 = vld [vmem:[%s9881_s14 + $0x10] sm:$0xff] }
  0x26   :  { %7248 = vmatpush3.bf16.msra.mxu0 %v7245_v44  ;;  %v4193_v18 = vld [vmem:[%s9881_s14] sm:$0xff] }
  0x27   :  { %7250 = vmatprep.subr.bf16.mxu0 %v7249_v50  ;;  %v5393_v19 = vld [vmem:[%s9905_s25 + $0xe0] sm:$0xff] }
  0x28   :  { %7284 = vmatpush3.bf16.msra.mxu1 %v7281_v45  ;;  %1361 = vperm.xlu0 %7853, %v1311_v23   ;;  %v2742_v45 = vld [vmem:[%s9879_s6 + $0x8] sm:$0xff]  ;;  %v5395_v23 = vld [vmem:[%s9905_s25 + $0xf0] sm:$0xff] }
  0x29   :  { %7318 = vmatprep.subr.bf16.mxu1 %v7317_v51 }
  0x2a   :  { %7252 = vmatpush3.bf16.msra.mxu0 %v7249_v50 }
  0x2b   :  { %6448 = vmatmul.mubr.f32.vlgmr.msra.gmra.mrb[0].mxu1 %v63_v54 }
  0x2c   :  { %6450 = vmatprep.mubr.f32.mxu1 %v64_v55  ;;  %7320 = vmatpush3.bf16.msra.mxu1 %v7317_v51 }
  0x2d   :  { %7322 = vmatprep.subr.bf16.mxu1 %v7321_v56  ;;  %6404 = vmatmul.mubr.f32.vlgmr.msra.gmra.mrb[0].mxu0 %v63_v54 }
  0x2e   :  { %6406 = vmatprep.mubr.f32.mxu0 %v64_v55  ;;  %1371 = vperm.xlu0 %7853, %v1313_v25   ;;  %v4197_v25 = vld [vmem:[%s9881_s14 + $0x20] sm:$0xff] }
  0x2f   :  { %6451 = vmatmul.mubr.f32.gmra.mrb[2].mxu1 %v65_v59 }
  0x30   :  { %6453 = vmatprep.mubr.f32.mxu1 %v66_v60  ;;  %7324 = vmatpush3.bf16.msra.mxu1 %v7321_v56 }
  0x31   :  { %7326 = vmatprep.subr.bf16.mxu1 %v7325_v61  ;;  %6407 = vmatmul.mubr.f32.gmra.mrb[2].mxu0 %v65_v59 }
  0x32   :  { %6409 = vmatprep.mubr.f32.mxu0 %v66_v60  ;;  %1381 = vperm.xlu0 %7853, %v1315_v27   ;;  %v5397_v27 = vld [vmem:[%s9905_s25 + $0x100] sm:$0xff] }
  0x33   :  { %6454 = vmatmul.mubr.f32.gmra.mrb[4].mxu1 %v67_v0 }
  0x34   :  { %6456 = vmatprep.mubr.f32.mxu1 %v68_v1  ;;  %7328 = vmatpush3.bf16.msra.mxu1 %v7325_v61  ;;  %v2749_v61 = vld [vmem:[%s9879_s6 + $0x40] sm:$0xff] }
  0x35   :  { %7330 = vmatprep.subr.bf16.mxu1 %v7329_v2  ;;  %6410 = vmatmul.mubr.f32.gmra.mrb[4].mxu0 %v67_v0 }
  0x36   :  { %6412 = vmatprep.mubr.f32.mxu0 %v68_v1  ;;  %1391 = vperm.xlu0 %7853, %v1317_v29   ;;  %v4196_v29 = vld [vmem:[%s9881_s14 + $0x18] sm:$0xff] }
  0x37   :  { %6457 = vmatmul.mubr.f32.gmra.mrb[6].mxu1 %v69_v5 }
  0x38   :  { %7332 = vmatpush3.bf16.msra.mxu1 %v7329_v2  ;;  %6595 = vmatprep.mubr.f32.mxu1 %v8011_v20  ;;  %v1307_v20 = vld [vmem:[%s9906_s26 + $0x10] sm:$0xff] }
  0x39   :  { %7334 = vmatprep.subr.bf16.mxu1 %v7333_v6  ;;  %6413 = vmatmul.mubr.f32.gmra.mrb[6].mxu0 %v69_v5 }
  0x3a   :  { %6475 = vmatprep.mubr.msk.f32.mxu0 %vm362_vm0, %v5389_v16  ;;  %1341 = vperm.xlu1 %7854, %v1307_v20   ;;  %v2752_v16 = vld [vmem:[%s9879_s6 + $0x58] sm:$0x3]  ;;  %v4178_v20 = vld [vmem:[%s9880_s11 + $0x8] sm:$0x1] }
  0x3b   :  { %1401 = vperm.xlu0 %7853, %v1319_v31   ;;  %v5398_v31 = vld [vmem:[%s9905_s25 + $0x108] sm:$0xff] }
  0x3c   :  { %7336 = vmatpush3.bf16.msra.mxu1 %v7333_v6 }
  0x3d   :  { %7338 = vmatprep.subr.bf16.mxu1 %v7337_v9 }
  0x3e   :  { %1346 = vperm.xlu1 %7854, %v1308_v22   ;;  %v5394_v22 = vld [vmem:[%s9905_s25 + $0xe8] sm:$0xff] }
  0x3f   :  { %1411 = vperm.xlu0 %7853, %v1321_v33   ;;  %v5399_v33 = vld [vmem:[%s9905_s25 + $0x110] sm:$0xff] }
  0x40   :  { %7340 = vmatpush3.bf16.msra.mxu1 %v7337_v9 }
  0x41   :  { %7342 = vmatprep.subr.bf16.mxu1 %v7341_v12 }
  0x42   :  { %1356 = vperm.xlu1 %7854, %v1310_v24   ;;  %v4194_v24 = vld [vmem:[%s9881_s14 + $0x8] sm:$0xff] }
  0x43   :  { %1421 = vperm.xlu0 %7853, %v1323_v35   ;;  %v4198_v35 = vld [vmem:[%s9881_s14 + $0x28] sm:$0xff] }
  0x44   :  { %7344 = vmatpush3.bf16.msra.mxu1 %v7341_v12  ;;  %v5390_v12 = vld [vmem:[%s9905_s25 + $0xc8] sm:$0xff] }
  0x45   :  { %7346 = vmatprep.subr.bf16.mxu1 %v7345_v15 }
  0x46   :  { %1366 = vperm.xlu1 %7854, %v1312_v26   ;;  %v5396_v26 = vld [vmem:[%s9905_s25 + $0xf8] sm:$0xff] }
  0x47   :  { %1431 = vperm.xlu0 %7853, %v1325_v37   ;;  %v4959_v37 = vld [vmem:[%s9882_s16] sm:$0xff] }
  0x48   :  { %7348 = vmatpush3.bf16.msra.mxu1 %v7345_v15  ;;  %v5391_v15 = vld [vmem:[%s9905_s25 + $0xd0] sm:$0xff] }
  0x4a   :  { %1376 = vperm.xlu1 %7854, %v1314_v28  }
  0x4b   :  { %6596 = vmatmul.mubr.f32.vlgmr.msra.gmra.mrb[8].mxu1 %v63_v54  ;;  %1441 = vperm.xlu0 %7853, %v1327_v39  }
  0x4c   :  { %6598 = vmatprep.mubr.f32.mxu1 %v64_v55 }
  0x4e   :  { %1386 = vperm.xlu1 %7854, %v1316_v30   ;;  %v4199_v30 = vld [vmem:[%s9881_s14 + $0x30] sm:$0xff] }
  0x4f   :  { %6599 = vmatmul.mubr.f32.gmra.mrb[10].mxu1 %v65_v59  ;;  %2755 = vperm.xlu0 %7853, %v2741_v41  }
  0x50   :  { %6601 = vmatprep.mubr.f32.mxu1 %v66_v60  ;;  %v2746_v60 = vld [vmem:[%s9879_s6 + $0x28] sm:$0xff] }
  0x52   :  { %1396 = vperm.xlu1 %7854, %v1318_v32  }
  0x53   :  { %6602 = vmatmul.mubr.f32.gmra.mrb[12].mxu1 %v67_v0  ;;  %2765 = vperm.xlu0 %7853, %v2743_v43  }
  0x54   :  { %6604 = vmatprep.mubr.f32.mxu1 %v68_v1 }
  0x56   :  { %1406 = vperm.xlu1 %7854, %v1320_v34  }
  0x57   :  { %6605 = vmatmul.mubr.f32.gmra.mrb[14].mxu1 %v69_v5  ;;  %2775 = vperm.xlu0 %7853, %v2745_v46   ;;  %v2751_v5 = vld [vmem:[%s9879_s6 + $0x50] sm:$0xff] }
  0x5a   :  { %1416 = vperm.xlu1 %7854, %v1322_v36  }
  0x5b   :  { %2785 = vperm.xlu0 %7853, %v2747_v53  }
  0x5e   :  { %1426 = vperm.xlu1 %7854, %v1324_v38   ;;  %v5400_v38 = vld [vmem:[%s9905_s25 + $0x118] sm:$0xff] }
  0x5f   :  { %2795 = vperm.xlu0 %7853, %v2749_v61   ;;  %v4967_v61 = vld [vmem:[%s9882_s16 + $0x40] sm:$0xff] }
  0x62   :  { %1436 = vperm.xlu1 %7854, %v1326_v40   ;;  %v5401_v40 = vld [vmem:[%s9905_s25 + $0x120] sm:$0xff] }
  0x63   :  { %2805 = vperm.xlu0 %7853, %v2751_v5   ;;  %v4971_v5 = vld [vmem:[%s9882_s16 + $0x60] sm:$0xff] }
  0x66   :  { %1446 = vperm.xlu1 %7854, %v1328_v42   ;;  %v4200_v42 = vld [vmem:[%s9881_s14 + $0x38] sm:$0xff] }
  0x67   :  { %4181 = vperm.xlu0 %7853, %v4177_v14   ;;  %v193_v14 = vld [vmem:[%s9905_s25 + $0x10] sm:$0xff] }
  0x6a   :  { %2760 = vperm.xlu1 %7854, %v2742_v45   ;;  %v5402_v45 = vld [vmem:[%s9905_s25 + $0x128] sm:$0xff] }
  0x6b   :  { %4431 = vperm.xlu0 %7853, %v4193_v18  }
  0x6e   :  { %2770 = vperm.xlu1 %7854, %v2744_v52   ;;  %v5404_v52 = vld [vmem:[%s9905_s25 + $0x138] sm:$0xff] }
  0x6f   :  { %4441 = vperm.xlu0 %7853, %v4195_v21   ;;  %v195_v21 = vld [vmem:[%s9905_s25 + $0x20] sm:$0xff] }
  0x72   :  { %2780 = vperm.xlu1 %7854, %v2746_v60   ;;  %v4964_v60 = vld [vmem:[%s9882_s16 + $0x28] sm:$0xff] }
  0x73   :  { %4451 = vperm.xlu0 %7853, %v4197_v25  }
  0x76   :  { %2790 = vperm.xlu1 %7854, %v2748_v4   ;;  %v4968_v4 = vld [vmem:[%s9882_s16 + $0x48] sm:$0xff] }
  0x77   :  { %4461 = vperm.xlu0 %7853, %v4199_v30   ;;  %v200_v30 = vld [vmem:[%s9905_s25 + $0x48] sm:$0xff] }
  0x7a   :  { %2800 = vperm.xlu1 %7854, %v2750_v11   ;;  %v4973_v11 = vld [vmem:[%s9882_s16 + $0x70] sm:$0xff] }
  0x7b   :  { %4977 = vperm.xlu0 %7853, %v4959_v37   ;;  %v207_v37 = vld [vmem:[%s9905_s25 + $0x80] sm:$0xff] }
  0x7e   :  { %2810 = vperm.xlu1 %7854, %v2752_v16   ;;  %v1500_v16 = vld [vmem:[%s9883_s4 + $0x18] sm:$0xff] }
  0x82   :  { %4186 = vperm.xlu1 %7854, %v4178_v20   ;;  %v194_v20 = vld [vmem:[%s9905_s25 + $0x18] sm:$0xff] }
  0x86   :  { %4436 = vperm.xlu1 %7854, %v4194_v24   ;;  %v4974_v24 = vld [vmem:[%s9882_s16 + $0x78] sm:$0xff] }
  0x8a   :  { %4446 = vperm.xlu1 %7854, %v4196_v29   ;;  %v199_v29 = vld [vmem:[%s9905_s25 + $0x40] sm:$0xff] }
  0x8e   :  { %4456 = vperm.xlu1 %7854, %v4198_v35   ;;  %v205_v35 = vld [vmem:[%s9905_s25 + $0x70] sm:$0xff] }
  0x92   :  { %4466 = vperm.xlu1 %7854, %v4200_v42   ;;  %v212_v42 = vld [vmem:[%s9905_s25 + $0xa8] sm:$0xff] }
  0xfe   :  { %v6449_v44 = vpop.f32.mrb[0].mxu1 }
  0xff   :  { %v298_v47 = vpop.f32.mrb[1].mxu1 }
 0x100   :  { %v7285_v48 = vpack.c.bf16 %v6449_v44, %v298_v47  ;;  %v6405_v49 = vpop.f32.mrb[0].mxu0  ;;  %v4961_v44 = vld [vmem:[%s9882_s16 + $0x10] sm:$0xff] }
 0x101   :  { %v152_v51 = vpop.f32.mrb[1].mxu0  ;;  %v5403_v47 = vld [vmem:[%s9905_s25 + $0x130] sm:$0xff]  ;;  %4987 = vperm.xlu0 %7853, %v4961_v44   ;;  %v214_v44 = vld [vmem:[%s9905_s25 + $0xb8] sm:$0x3] }
 0x102   :  { %v6452_v50 = vpop.f32.mrb[2].mxu1  ;;  %7286 = vmatprep.subr.bf16.mxu0 %v7285_v48  ;;  %v7301_v55 = vpack.c.bf16 %v6405_v49, %v152_v51  ;;  %v4960_v49 = vld [vmem:[%s9882_s16 + $0x8] sm:$0xff]  ;;  %v4963_v51 = vld [vmem:[%s9882_s16 + $0x20] sm:$0xff] }
 0x103   :  { %v308_v54 = vpop.f32.mrb[3].mxu1  ;;  %7288 = vmatpush3.bf16.msra.mxu0 %v7285_v48  ;;  %4982 = vperm.xlu1 %7854, %v4960_v49   ;;  %v5481_v49 = vld [vmem:[%s9905_s25 + $0x1a0] sm:$0xff] }
 0x104   :  { %v7289_v56 = vpack.c.bf16 %v6452_v50, %v308_v54  ;;  %v6408_v57 = vpop.f32.mrb[2].mxu0  ;;  %v5405_v54 = vld [vmem:[%s9905_s25 + $0x140] sm:$0xff] }
 0x105   :  { %v162_v59 = vpop.f32.mrb[3].mxu0  ;;  %4997 = vperm.xlu0 %7853, %v4963_v51   ;;  %v5483_v51 = vld [vmem:[%s9905_s25 + $0x1b0] sm:$0xff] }
 0x106   :  { %v6455_v58 = vpop.f32.mrb[4].mxu1  ;;  %7290 = vmatprep.subr.bf16.mxu0 %v7289_v56  ;;  %v7305_v63 = vpack.c.bf16 %v6408_v57, %v162_v59  ;;  %v4965_v57 = vld [vmem:[%s9882_s16 + $0x30] sm:$0xff] }
 0x107   :  { %v318_v62 = vpop.f32.mrb[5].mxu1  ;;  %7292 = vmatpush3.bf16.msra.mxu0 %v7289_v56  ;;  %v4962_v56 = vld [vmem:[%s9882_s16 + $0x18] sm:$0xff]  ;;  %v5407_v59 = vld [vmem:[%s9905_s25 + $0x150] sm:$0xff] }
 0x108   :  { %v7293_v0 = vpack.c.bf16 %v6455_v58, %v318_v62  ;;  %v6411_v1 = vpop.f32.mrb[4].mxu0  ;;  %v5406_v58 = vld [vmem:[%s9905_s25 + $0x148] sm:$0xff]  ;;  %4992 = vperm.xlu1 %7854, %v4962_v56   ;;  %v5408_v62 = vld [vmem:[%s9905_s25 + $0x158] sm:$0xff] }
 0x109   :  { %v172_v3 = vpop.f32.mrb[5].mxu0  ;;  %5007 = vperm.xlu0 %7853, %v4965_v57   ;;  %v5488_v56 = vld [vmem:[%s9905_s25 + $0x1d8] sm:$0xff]  ;;  %v5489_v57 = vld [vmem:[%s9905_s25 + $0x1e0] sm:$0xff] }
 0x10a   :  { %v6458_v2 = vpop.f32.mrb[6].mxu1  ;;  %7294 = vmatprep.subr.bf16.mxu0 %v7293_v0  ;;  %v7309_v7 = vpack.c.bf16 %v6411_v1, %v172_v3  ;;  %v4969_v1 = vld [vmem:[%s9882_s16 + $0x50] sm:$0xff] }
 0x10b   :  { %v328_v6 = vpop.f32.mrb[7].mxu1  ;;  %7296 = vmatpush3.bf16.msra.mxu0 %v7293_v0  ;;  %v4966_v0 = vld [vmem:[%s9882_s16 + $0x38] sm:$0xff]  ;;  %v5411_v3 = vld [vmem:[%s9905_s25 + $0x170] sm:$0xff] }
 0x10c   :  { %v7297_v8 = vpack.c.bf16 %v6458_v2, %v328_v6  ;;  %v6414_v9 = vpop.f32.mrb[6].mxu0  ;;  %5002 = vperm.xlu1 %7854, %v4964_v60   ;;  %v5410_v2 = vld [vmem:[%s9905_s25 + $0x168] sm:$0xff]  ;;  %v5412_v6 = vld [vmem:[%s9905_s25 + $0x178] sm:$0x3] }
 0x10d   :  { %v182_v10 = vpop.f32.mrb[7].mxu0  ;;  %5017 = vperm.xlu0 %7853, %v4967_v61   ;;  %v5492_v60 = vld [vmem:[%s9905_s25 + $0x1f8] sm:$0xff]  ;;  %v5493_v61 = vld [vmem:[%s9905_s25 + $0x200] sm:$0xff] }
 0x10e   :  { %7298 = vmatprep.subr.bf16.mxu0 %v7297_v8  ;;  %v7313_v13 = vpack.c.bf16 %v6414_v9, %v182_v10  ;;  %v1497_v9 = vld [vmem:[%s9883_s4] sm:$0xff]  ;;  %v1498_v10 = vld [vmem:[%s9883_s4 + $0x8] sm:$0xff] }
 0x10f   :  { %7300 = vmatpush3.bf16.msra.mxu0 %v7297_v8  ;;  %v4970_v8 = vld [vmem:[%s9882_s16 + $0x58] sm:$0xff] }
 0x110   :  { %7302 = vmatprep.subr.bf16.mxu0 %v7301_v55  ;;  %5012 = vperm.xlu1 %7854, %v4966_v0   ;;  %v5496_v0 = vld [vmem:[%s9905_s25 + $0x218] sm:$0xff] }
 0x111   :  { %5027 = vperm.xlu0 %7853, %v4969_v1   ;;  %v5497_v1 = vld [vmem:[%s9905_s25 + $0x220] sm:$0xff] }
 0x112   :  { %6476 = vmatmul.mubr.msk.f32.vlgmr.msra.gmra.mrb[8].mxu0 %vm362_vm0, %v5390_v12  ;;  %v7365_v12 = vpack.c.bf16 %v1498_v10, %v1497_v9  ;;  %v5550_v9 = vld [vmem:[%s9883_s4 + $0x40] sm:$0xff]  ;;  %v5551_v10 = vld [vmem:[%s9883_s4 + $0x48] sm:$0xff] }
 0x113   :  { %6478 = vmatprep.mubr.msk.f32.mxu0 %vm362_vm0, %v5391_v15  ;;  %7304 = vmatpush3.bf16.msra.mxu0 %v7301_v55  ;;  %v1499_v15 = vld [vmem:[%s9883_s4 + $0x10] sm:$0xff] }
 0x114   :  { %7306 = vmatprep.subr.bf16.mxu0 %v7305_v63  ;;  %5022 = vperm.xlu1 %7854, %v4968_v4   ;;  %v7369_v18 = vpack.c.bf16 %v1500_v16, %v1499_v15  ;;  %v5500_v4 = vld [vmem:[%s9905_s25 + $0x238] sm:$0x3] }
 0x115   :  { %5037 = vperm.xlu0 %7853, %v4971_v5   ;;  %7366 = vmatprep.subr.bf16.mxu1 %v7365_v12  ;;  %v1503_v5 = vld [vmem:[%s9883_s4 + $0x30] sm:$0xff] }
 0x116   :  { %6479 = vmatmul.mubr.msk.f32.gmra.mrb[10].mxu0 %vm362_vm0, %v5392_v17  ;;  %v4972_v17 = vld [vmem:[%s9882_s16 + $0x68] sm:$0xff]  ;;  %7368 = vmatpush3.bf16.msra.mxu1 %v7365_v12  ;;  %v1342_v12 = vpop.permute.xlu1 %1341 }
 0x117   :  { %6481 = vmatprep.mubr.msk.f32.mxu0 %vm362_vm0, %v5393_v19  ;;  %7308 = vmatpush3.bf16.msra.mxu0 %v7305_v63  ;;  %v5409_v63 = vld [vmem:[%s9905_s25 + $0x160] sm:$0xff] }
 0x118   :  { %7310 = vmatprep.subr.bf16.mxu0 %v7309_v7  ;;  %5032 = vperm.xlu1 %7854, %v4970_v8   ;;  %v5265_v19 = vld [vmem:[%s9884_s18] sm:$0x3] }
 0x119   :  { %5047 = vperm.xlu0 %7853, %v4973_v11   ;;  %7370 = vmatprep.subr.bf16.mxu1 %v7369_v18  ;;  %v7383_v11 = vpack.c.bf16 %v5551_v10, %v5550_v9  ;;  %v3712_v8 = vld [vmem:[%s9889_s10] sm:$0xff] }
 0x11a   :  { %6482 = vmatmul.mubr.msk.f32.gmra.mrb[12].mxu0 %vm362_vm0, %v5394_v22  ;;  %v1501_v22 = vld [vmem:[%s9883_s4 + $0x20] sm:$0xff]  ;;  %7372 = vmatpush3.bf16.msra.mxu1 %v7369_v18 }
 0x11b   :  { %6484 = vmatprep.mubr.msk.f32.mxu0 %vm362_vm0, %v5395_v23  ;;  %7312 = vmatpush3.bf16.msra.mxu0 %v7309_v7  ;;  %v191_v7 = vld [vmem:[%s9905_s25] sm:$0xff]  ;;  %v1502_v23 = vld [vmem:[%s9883_s4 + $0x28] sm:$0xff] }
 0x11c   :  { %7314 = vmatprep.subr.bf16.mxu0 %v7313_v13  ;;  %5042 = vperm.xlu1 %7854, %v4972_v17   ;;  %v7373_v25 = vpack.c.bf16 %v1502_v23, %v1501_v22 }
 0x11d   :  { %5268 = vperm.xlu0 %7853, %v5265_v19  }
 0x11e   :  { %6485 = vmatmul.mubr.msk.f32.gmra.mrb[14].mxu0 %vm362_vm0, %v5396_v26  ;;  %v6597_v28 = vpop.f32.mrb[8].mxu1  ;;  %v196_v26 = vld [vmem:[%s9905_s25 + $0x28] sm:$0xff]  ;;  %7374 = vmatprep.subr.bf16.mxu1 %v7373_v25 }
 0x11f   :  { %6487 = vmatprep.mubr.msk.f32.mxu0 %vm362_vm0, %v5397_v27  ;;  %7316 = vmatpush3.bf16.msra.mxu0 %v7313_v13  ;;  %v960_v32 = vpop.f32.mrb[9].mxu1  ;;  %v192_v13 = vld [vmem:[%s9905_s25 + $0x8] sm:$0xff]  ;;  %v197_v27 = vld [vmem:[%s9905_s25 + $0x30] sm:$0xff] }
 0x120   :  { %v8313_v34 = vpack.c.bf16 %v6597_v28, %v960_v32  ;;  %5052 = vperm.xlu1 %7854, %v4974_v24   ;;  %7376 = vmatpush3.bf16.msra.mxu1 %v7373_v25  ;;  %v198_v28 = vld [vmem:[%s9905_s25 + $0x38] sm:$0xff]  ;;  %v5552_v25 = vld [vmem:[%s9883_s4 + $0x50] sm:$0xff] }
 0x121   :  { %v202_v32 = vld [vmem:[%s9905_s25 + $0x58] sm:$0xff] }
 0x122   :  { %6488 = vmatmul.mubr.msk.f32.gmra.mrb[16].mxu0 %vm362_vm0, %v5398_v31  ;;  %7350 = vmatprep.subr.bf16.mxu0 %v8313_v34  ;;  %v6600_v36 = vpop.f32.mrb[10].mxu1  ;;  %v201_v31 = vld [vmem:[%s9905_s25 + $0x50] sm:$0xff] }
 0x123   :  { %6490 = vmatprep.mubr.msk.f32.mxu0 %vm362_vm0, %v5399_v33  ;;  %v970_v39 = vpop.f32.mrb[11].mxu1  ;;  %v203_v33 = vld [vmem:[%s9905_s25 + $0x60] sm:$0xff] }
 0x124   :  { %v8330_v41 = vpack.c.bf16 %v6600_v36, %v970_v39  ;;  %v206_v36 = vld [vmem:[%s9905_s25 + $0x78] sm:$0xff]  ;;  %v209_v39 = vld [vmem:[%s9905_s25 + $0x90] sm:$0xff] }
 0x126   :  { %6491 = vmatmul.mubr.msk.f32.gmra.mrb[18].mxu0 %vm362_vm0, %v5400_v38  ;;  %v6603_v43 = vpop.f32.mrb[12].mxu1  ;;  %v208_v38 = vld [vmem:[%s9905_s25 + $0x88] sm:$0xff] }
 0x127   :  { %6493 = vmatprep.mubr.msk.f32.mxu0 %vm362_vm0, %v5401_v40  ;;  %v980_v46 = vpop.f32.mrb[13].mxu1  ;;  %v210_v40 = vld [vmem:[%s9905_s25 + $0x98] sm:$0xff] }
 0x128   :  { %v8346_v48 = vpack.c.bf16 %v6603_v43, %v980_v46  ;;  %v213_v43 = vld [vmem:[%s9905_s25 + $0xb0] sm:$0xff]  ;;  %v5478_v46 = vld [vmem:[%s9905_s25 + $0x188] sm:$0xff] }
 0x12a   :  { %6494 = vmatmul.mubr.msk.f32.gmra.mrb[20].mxu0 %vm362_vm0, %v5402_v45  ;;  %v6606_v50 = vpop.f32.mrb[14].mxu1  ;;  %v5477_v45 = vld [vmem:[%s9905_s25 + $0x180] sm:$0xff] }
 0x12b   :  { %6496 = vmatprep.mubr.msk.f32.mxu0 %vm362_vm0, %v5403_v47  ;;  %v990_v53 = vpop.f32.mrb[15].mxu1  ;;  %v5479_v47 = vld [vmem:[%s9905_s25 + $0x190] sm:$0xff] }
 0x12c   :  { %v8362_v55 = vpack.c.bf16 %v6606_v50, %v990_v53  ;;  %v5482_v50 = vld [vmem:[%s9905_s25 + $0x1a8] sm:$0xff]  ;;  %v5485_v53 = vld [vmem:[%s9905_s25 + $0x1c0] sm:$0xff] }
 0x12e   :  { %6497 = vmatmul.mubr.msk.f32.gmra.mrb[22].mxu0 %vm362_vm0, %v5404_v52  ;;  %v5484_v52 = vld [vmem:[%s9905_s25 + $0x1b8] sm:$0xff] }
 0x12f   :  { %6499 = vmatprep.mubr.msk.f32.mxu0 %vm362_vm0, %v5405_v54  ;;  %v5486_v54 = vld [vmem:[%s9905_s25 + $0x1c8] sm:$0xff] }
 0x132   :  { %6500 = vmatmul.mubr.msk.f32.gmra.mrb[24].mxu0 %vm362_vm0, %v5406_v58  ;;  %v5490_v58 = vld [vmem:[%s9905_s25 + $0x1e8] sm:$0xff] }
 0x133   :  { %6502 = vmatprep.mubr.msk.f32.mxu0 %vm362_vm0, %v5407_v59  ;;  %v5491_v59 = vld [vmem:[%s9905_s25 + $0x1f0] sm:$0xff] }
 0x136   :  { %6503 = vmatmul.mubr.msk.f32.gmra.mrb[26].mxu0 %vm362_vm0, %v5408_v62  ;;  %v5494_v62 = vld [vmem:[%s9905_s25 + $0x208] sm:$0xff] }
 0x137   :  { %6505 = vmatprep.mubr.msk.f32.mxu0 %vm362_vm0, %v5409_v63  ;;  %v5495_v63 = vld [vmem:[%s9905_s25 + $0x210] sm:$0xff] }
 0x13a   :  { %6506 = vmatmul.mubr.msk.f32.gmra.mrb[28].mxu0 %vm362_vm0, %v5410_v2  ;;  %v5498_v2 = vld [vmem:[%s9905_s25 + $0x228] sm:$0xff] }
 0x13b   :  { %6508 = vmatprep.mubr.msk.f32.mxu0 %vm362_vm0, %v5411_v3  ;;  %v5499_v3 = vld [vmem:[%s9905_s25 + $0x230] sm:$0xff] }
 0x13e   :  { %6509 = vmatmul.mubr.msk.f32.gmra.mrb[30].mxu0 %vm362_vm0, %v5412_v6  ;;  %v1504_v6 = vld [vmem:[%s9883_s4 + $0x38] sm:$0x3f] }
 0x13f   :  { %6527 = vmatprep.mubr.msk.f32.mxu0 %vm362_vm0, %v191_v7  ;;  %v7377_v7 = vpack.c.bf16 %v1504_v6, %v1503_v5 }
 0x141   :  { %7379 = vmatprep.subr.msk.bf16.mxu1 %vm8658_vm3, %v7377_v7 }
 0x142   :  { %6528 = vmatmul.mubr.msk.f32.vlgmr.msra.gmra.mrb[8].mxu0 %vm362_vm0, %v192_v13  ;;  %7382 = vmatpush3.bf16.msk.msra.mxu1 %vm8658_vm3, %v7377_v7  ;;  %v1332_v13 = vpop.permute.xlu0 %1331 }
 0x143   :  { %6530 = vmatprep.mubr.msk.f32.mxu0 %vm362_vm0, %v193_v14  ;;  %7352 = vmatpush3.bf16.msra.mxu0 %v8313_v34  ;;  %v204_v34 = vld [vmem:[%s9905_s25 + $0x68] sm:$0xff]  ;;  %v1347_v14 = vpop.permute.xlu1 %1346 }
 0x144   :  { %7354 = vmatprep.subr.bf16.mxu0 %v8330_v41  ;;  %7384 = vmatprep.subr.bf16.mxu1 %v7383_v11 }
 0x146   :  { %6531 = vmatmul.mubr.msk.f32.gmra.mrb[10].mxu0 %vm362_vm0, %v194_v20  ;;  %v1337_v15 = vpop.permute.xlu0 %1336 }
 0x147   :  { %6533 = vmatprep.mubr.msk.f32.mxu0 %vm362_vm0, %v195_v21  ;;  %7356 = vmatpush3.bf16.msra.mxu0 %v8330_v41  ;;  %v211_v41 = vld [vmem:[%s9905_s25 + $0xa0] sm:$0xff]  ;;  %v1357_v16 = vpop.permute.xlu1 %1356 }
 0x148   :  { %7358 = vmatprep.subr.bf16.mxu0 %v8346_v48 }
 0x14a   :  { %6534 = vmatmul.mubr.msk.f32.gmra.mrb[12].mxu0 %vm362_vm0, %v196_v26  ;;  %v1352_v17 = vpop.permute.xlu0 %1351  ;;  %v5553_v26 = vld [vmem:[%s9883_s4 + $0x58] sm:$0xff] }
 0x14b   :  { %6536 = vmatprep.mubr.msk.f32.mxu0 %vm362_vm0, %v197_v27  ;;  %7360 = vmatpush3.bf16.msra.mxu0 %v8346_v48  ;;  %v5480_v48 = vld [vmem:[%s9905_s25 + $0x198] sm:$0xff]  ;;  %v1367_v18 = vpop.permute.xlu1 %1366 }
 0x14c   :  { %7362 = vmatprep.subr.bf16.mxu0 %v8362_v55 }
 0x14e   :  { %6537 = vmatmul.mubr.msk.f32.gmra.mrb[14].mxu0 %vm362_vm0, %v198_v28  ;;  %v1362_v19 = vpop.permute.xlu0 %1361 }
 0x14f   :  { %6539 = vmatprep.mubr.msk.f32.mxu0 %vm362_vm0, %v199_v29  ;;  %7364 = vmatpush3.bf16.msra.mxu0 %v8362_v55  ;;  %v5487_v55 = vld [vmem:[%s9905_s25 + $0x1d0] sm:$0xff]  ;;  %v1377_v23 = vpop.permute.xlu1 %1376 }
 0x152   :  { %6540 = vmatmul.mubr.msk.f32.gmra.mrb[16].mxu0 %vm362_vm0, %v200_v30  ;;  %v1372_v27 = vpop.permute.xlu0 %1371 }
 0x153   :  { %6542 = vmatprep.mubr.msk.f32.mxu0 %vm362_vm0, %v201_v31 }
 0x156   :  { %6543 = vmatmul.mubr.msk.f32.gmra.mrb[18].mxu0 %vm362_vm0, %v202_v32 }
 0x157   :  { %6545 = vmatprep.mubr.msk.f32.mxu0 %vm362_vm0, %v203_v33  ;;  %v7387_v33 = vpack.c.bf16 %v5553_v26, %v5552_v25 }
 0x15a   :  { %6546 = vmatmul.mubr.msk.f32.gmra.mrb[20].mxu0 %vm362_vm0, %v204_v34 }
 0x15b   :  { %6548 = vmatprep.mubr.msk.f32.mxu0 %vm362_vm0, %v205_v35  ;;  %v5554_v35 = vld [vmem:[%s9883_s4 + $0x60] sm:$0xff] }
 0x15e   :  { %6549 = vmatmul.mubr.msk.f32.gmra.mrb[22].mxu0 %vm362_vm0, %v206_v36  ;;  %v5555_v36 = vld [vmem:[%s9883_s4 + $0x68] sm:$0xff] }
 0x15f   :  { %6551 = vmatprep.mubr.msk.f32.mxu0 %vm362_vm0, %v207_v37  ;;  %v1387_v37 = vpop.permute.xlu1 %1386 }
 0x162   :  { %6552 = vmatmul.mubr.msk.f32.gmra.mrb[24].mxu0 %vm362_vm0, %v208_v38 }
 0x163   :  { %6554 = vmatprep.mubr.msk.f32.mxu0 %vm362_vm0, %v209_v39 }
 0x166   :  { %6555 = vmatmul.mubr.msk.f32.gmra.mrb[26].mxu0 %vm362_vm0, %v210_v40  ;;  %v1382_v40 = vpop.permute.xlu0 %1381 }
 0x167   :  { %6557 = vmatprep.mubr.msk.f32.mxu0 %vm362_vm0, %v211_v41 }
 0x16a   :  { %6558 = vmatmul.mubr.msk.f32.gmra.mrb[28].mxu0 %vm362_vm0, %v212_v42 }
 0x16b   :  { %6560 = vmatprep.mubr.msk.f32.mxu0 %vm362_vm0, %v213_v43 }
 0x16e   :  { %6561 = vmatmul.mubr.msk.f32.gmra.mrb[30].mxu0 %vm362_vm0, %v214_v44  ;;  %v7391_v44 = vpack.c.bf16 %v5555_v36, %v5554_v35 }
 0x16f   :  { %6623 = vmatprep.mubr.msk.f32.mxu0 %vm362_vm0, %v5477_v45 }
 0x172   :  { %6624 = vmatmul.mubr.msk.f32.vlgmr.msra.gmra.mrb[8].mxu0 %vm362_vm0, %v5478_v46  ;;  %v5556_v46 = vld [vmem:[%s9883_s4 + $0x70] sm:$0xff] }
 0x173   :  { %6626 = vmatprep.mubr.msk.f32.mxu0 %vm362_vm0, %v5479_v47  ;;  %v5557_v47 = vld [vmem:[%s9883_s4 + $0x78] sm:$0x3f] }
 0x176   :  { %6627 = vmatmul.mubr.msk.f32.gmra.mrb[10].mxu0 %vm362_vm0, %v5480_v48 }
 0x177   :  { %6629 = vmatprep.mubr.msk.f32.mxu0 %vm362_vm0, %v5481_v49 }
 0x17a   :  { %6630 = vmatmul.mubr.msk.f32.gmra.mrb[12].mxu0 %vm362_vm0, %v5482_v50 }
 0x17b   :  { %6632 = vmatprep.mubr.msk.f32.mxu0 %vm362_vm0, %v5483_v51 }
 0x17e   :  { %6633 = vmatmul.mubr.msk.f32.gmra.mrb[14].mxu0 %vm362_vm0, %v5484_v52 }
 0x17f   :  { %6635 = vmatprep.mubr.msk.f32.mxu0 %vm362_vm0, %v5485_v53  ;;  %v7395_v53 = vpack.c.bf16 %v5557_v47, %v5556_v46 }
 0x182   :  { %6636 = vmatmul.mubr.msk.f32.gmra.mrb[16].mxu0 %vm362_vm0, %v5486_v54  ;;  %v1397_v54 = vpop.permute.xlu1 %1396 }
 0x183   :  { %6638 = vmatprep.mubr.msk.f32.mxu0 %vm362_vm0, %v5487_v55 }
 0x186   :  { %6639 = vmatmul.mubr.msk.f32.gmra.mrb[18].mxu0 %vm362_vm0, %v5488_v56  ;;  %v1392_v56 = vpop.permute.xlu0 %1391 }
 0x187   :  { %6641 = vmatprep.mubr.msk.f32.mxu0 %vm362_vm0, %v5489_v57 }
 0x18a   :  { %6642 = vmatmul.mubr.msk.f32.gmra.mrb[20].mxu0 %vm362_vm0, %v5490_v58 }
 0x18b   :  { %6644 = vmatprep.mubr.msk.f32.mxu0 %vm362_vm0, %v5491_v59 }
 0x18e   :  { %6645 = vmatmul.mubr.msk.f32.gmra.mrb[22].mxu0 %vm362_vm0, %v5492_v60 }
 0x18f   :  { %6647 = vmatprep.mubr.msk.f32.mxu0 %vm362_vm0, %v5493_v61 }
 0x192   :  { %6648 = vmatmul.mubr.msk.f32.gmra.mrb[24].mxu0 %vm362_vm0, %v5494_v62 }
 0x193   :  { %6650 = vmatprep.mubr.msk.f32.mxu0 %vm362_vm0, %v5495_v63  ;;  %v1407_v63 = vpop.permute.xlu1 %1406 }
 0x196   :  { %6651 = vmatmul.mubr.msk.f32.gmra.mrb[26].mxu0 %vm362_vm0, %v5496_v0 }
 0x197   :  { %6653 = vmatprep.mubr.msk.f32.mxu0 %vm362_vm0, %v5497_v1 }
 0x19a   :  { %6654 = vmatmul.mubr.msk.f32.gmra.mrb[28].mxu0 %vm362_vm0, %v5498_v2  ;;  %v1402_v2 = vpop.permute.xlu0 %1401 }
 0x19b   :  { %6656 = vmatprep.mubr.msk.f32.mxu0 %vm362_vm0, %v5499_v3 }
 0x19e   :  { %6657 = vmatmul.mubr.msk.f32.gmra.mrb[30].mxu0 %vm362_vm0, %v5500_v4 }
 0x245   :  { %v6625_v20 = vpop.f32.mrb[8].mxu0 }
 0x246   :  { %v1450_v21 = vadd.f32 %v6625_v20, %v1337_v15  ;;  %v1162_v22 = vpop.f32.mrb[9].mxu0  ;;  %v1412_v15 = vpop.permute.xlu0 %1411 }
 0x247   :  { %v1449_v24 = vadd.f32 %v1332_v13, %v1162_v22  ;;  %v1417_v13 = vpop.permute.xlu1 %1416 }
 0x248   :  { %v8680_v30 = vmax.f32 %v1450_v21, 0.0 }
 0x249   :  { %v8678_v28 = vmax.f32 %v1449_v24, 0.0  ;;  %v6628_v29 = vpop.f32.mrb[10].mxu0 }
 0x24a   :  { %v1452_v31 = vadd.f32 %v6628_v29, %v1347_v14  ;;  %v1172_v32 = vpop.f32.mrb[11].mxu0  ;;  %v1422_v25 = vpop.permute.xlu0 %1421 }
 0x24b   :  { %v1451_v34 = vadd.f32 %v1342_v12, %v1172_v32  ;;  %6675 = vmatprep.mubr.msk.f32.mxu1 %vm1505_vm4, %v8678_v28  ;;  %v1427_v22 = vpop.permute.xlu1 %1426 }
 0x24c   :  { %6676 = vmatmul.mubr.msk.f32.vlgmr.msra.gmra.mrb[16].mxu1 %vm1505_vm4, %v8680_v30  ;;  %v8694_v41 = vmax.f32 %v1452_v31, 0.0 }
 0x24d   :  { %v8692_v38 = vmax.f32 %v1451_v34, 0.0  ;;  %v6631_v39 = vpop.f32.mrb[12].mxu0  ;;  %7386 = vmatpush3.bf16.msra.mxu1 %v7383_v11 }
 0x24e   :  { %v1454_v42 = vadd.f32 %v6631_v39, %v1357_v16  ;;  %v1182_v43 = vpop.f32.mrb[13].mxu0  ;;  %7388 = vmatprep.subr.bf16.mxu1 %v7387_v33 }
 0x24f   :  { %v1453_v45 = vadd.f32 %v1352_v17, %v1182_v43  ;;  %6678 = vmatprep.mubr.msk.f32.mxu1 %vm1505_vm4, %v8692_v38 }
 0x250   :  { %6679 = vmatmul.mubr.msk.f32.gmra.mrb[18].mxu1 %vm1505_vm4, %v8694_v41  ;;  %v8708_v50 = vmax.f32 %v1454_v42, 0.0 }
 0x251   :  { %v8706_v48 = vmax.f32 %v1453_v45, 0.0  ;;  %v6634_v49 = vpop.f32.mrb[14].mxu0  ;;  %7390 = vmatpush3.bf16.msra.mxu1 %v7387_v33 }
 0x252   :  { %v1456_v51 = vadd.f32 %v6634_v49, %v1367_v18  ;;  %v1192_v52 = vpop.f32.mrb[15].mxu0  ;;  %7392 = vmatprep.subr.bf16.mxu1 %v7391_v44 }
 0x253   :  { %v1455_v55 = vadd.f32 %v1362_v19, %v1192_v52  ;;  %6681 = vmatprep.mubr.msk.f32.mxu1 %vm1505_vm4, %v8706_v48 }
 0x254   :  { %6682 = vmatmul.mubr.msk.f32.gmra.mrb[20].mxu1 %vm1505_vm4, %v8708_v50  ;;  %v8716_v59 = vmax.f32 %v1456_v51, 0.0 }
 0x255   :  { %v8714_v57 = vmax.f32 %v1455_v55, 0.0  ;;  %v6637_v58 = vpop.f32.mrb[16].mxu0  ;;  %7394 = vmatpush3.bf16.msra.mxu1 %v7391_v44 }
 0x256   :  { %v1458_v60 = vadd.f32 %v6637_v58, %v1377_v23  ;;  %v1202_v61 = vpop.f32.mrb[17].mxu0  ;;  %7397 = vmatprep.subr.msk.bf16.mxu1 %vm8658_vm3, %v7395_v53 }
 0x257   :  { %v1457_v62 = vadd.f32 %v1372_v27, %v1202_v61  ;;  %6684 = vmatprep.mubr.msk.f32.mxu1 %vm1505_vm4, %v8714_v57 }
 0x258   :  { %6685 = vmatmul.mubr.msk.f32.gmra.mrb[22].mxu1 %vm1505_vm4, %v8716_v59  ;;  %v8728_v3 = vmax.f32 %v1458_v60, 0.0 }
 0x259   :  { %v8724_v0 = vmax.f32 %v1457_v62, 0.0  ;;  %v6640_v1 = vpop.f32.mrb[18].mxu0  ;;  %7400 = vmatpush3.bf16.msk.msra.mxu1 %vm8658_vm3, %v7395_v53  ;;  %v7863_v62 = vmov 0.0|0.0  }
 0x25a   :  { %v1460_v4 = vadd.f32 %v6640_v1, %v1387_v37  ;;  %v1212_v5 = vpop.f32.mrb[19].mxu0  ;;  %v1437_v37 = vpop.permute.xlu1 %1436  ;;  %7438 = vmatprep.subr.bf16.mxu0 %v7863_v62  ;;  %7401 = vmatprep.subr.bf16.mxu1 %v7863_v62  ;;  %v1768_v1 = vld [vmem:[%s9885_s5 + $0x8] sm:$0xff] }
 0x25b   :  { %v1459_v6 = vadd.f32 %v1382_v40, %v1212_v5  ;;  %6687 = vmatprep.mubr.msk.f32.mxu1 %vm1505_vm4, %v8724_v0  ;;  %v1432_v40 = vpop.permute.xlu0 %1431  ;;  %5621 = vmatprep.mubr.msk.f32.mxu0 %vm2013_vm5, %v1768_v1 }
 0x25c   :  { %6688 = vmatmul.mubr.msk.f32.gmra.mrb[24].mxu1 %vm1505_vm4, %v8728_v3  ;;  %v8736_v10 = vmax.f32 %v1460_v4, 0.0 }
 0x25d   :  { %v8734_v7 = vmax.f32 %v1459_v6, 0.0  ;;  %v6643_v9 = vpop.f32.mrb[20].mxu0 }
 0x25e   :  { %v1462_v11 = vadd.f32 %v6643_v9, %v1397_v54  ;;  %v1222_v12 = vpop.f32.mrb[21].mxu0  ;;  %v1447_v49 = vpop.permute.xlu1 %1446 }
 0x25f   :  { %v1461_v14 = vadd.f32 %v1392_v56, %v1222_v12  ;;  %6690 = vmatprep.mubr.msk.f32.mxu1 %vm1505_vm4, %v8734_v7  ;;  %v1442_v53 = vpop.permute.xlu0 %1441 }
 0x260   :  { %6691 = vmatmul.mubr.msk.f32.gmra.mrb[26].mxu1 %vm1505_vm4, %v8736_v10  ;;  %v8744_v18 = vmax.f32 %v1462_v11, 0.0 }
 0x261   :  { %v8742_v16 = vmax.f32 %v1461_v14, 0.0  ;;  %v6646_v17 = vpop.f32.mrb[22].mxu0 }
 0x262   :  { %v1464_v19 = vadd.f32 %v6646_v17, %v1407_v63  ;;  %v1232_v20 = vpop.f32.mrb[23].mxu0  ;;  %v5584_v63 = vld [vmem:[%s9885_s5 + $0xc8] sm:$0xff] }
 0x263   :  { %v1463_v21 = vadd.f32 %v1402_v2, %v1232_v20  ;;  %6693 = vmatprep.mubr.msk.f32.mxu1 %vm1505_vm4, %v8742_v16 }
 0x264   :  { %6694 = vmatmul.mubr.msk.f32.gmra.mrb[28].mxu1 %vm1505_vm4, %v8744_v18  ;;  %v8752_v26 = vmax.f32 %v1464_v19, 0.0 }
 0x265   :  { %v8750_v23 = vmax.f32 %v1463_v21, 0.0  ;;  %v6649_v24 = vpop.f32.mrb[24].mxu0 }
 0x266   :  { %v1466_v27 = vadd.f32 %v6649_v24, %v1417_v13  ;;  %v1242_v29 = vpop.f32.mrb[25].mxu0 }
 0x267   :  { %v1465_v31 = vadd.f32 %v1412_v15, %v1242_v29  ;;  %6696 = vmatprep.mubr.msk.f32.mxu1 %vm1505_vm4, %v8750_v23 }
 0x268   :  { %6697 = vmatmul.mubr.msk.f32.gmra.mrb[30].mxu1 %vm1505_vm4, %v8752_v26  ;;  %v8760_v34 = vmax.f32 %v1466_v27, 0.0 }
 0x269   :  { %v8758_v32 = vmax.f32 %v1465_v31, 0.0  ;;  %v6652_v33 = vpop.f32.mrb[26].mxu0 }
 0x26a   :  { %v1468_v35 = vadd.f32 %v6652_v33, %v1427_v22  ;;  %v1252_v36 = vpop.f32.mrb[27].mxu0 }
 0x26b   :  { %v1467_v39 = vadd.f32 %v1422_v25, %v1252_v36  ;;  %6699 = vmatprep.mubr.msk.f32.mxu1 %vm1505_vm4, %v8758_v32 }
 0x26c   :  { %6700 = vmatmul.mubr.msk.f32.gmra.mrb[32].mxu1 %vm1505_vm4, %v8760_v34  ;;  %v8768_v44 = vmax.f32 %v1468_v35, 0.0 }
 0x26d   :  { %v8766_v42 = vmax.f32 %v1467_v39, 0.0  ;;  %v6655_v43 = vpop.f32.mrb[28].mxu0 }
 0x26e   :  { %v1470_v45 = vadd.f32 %v6655_v43, %v1437_v37  ;;  %v1262_v46 = vpop.f32.mrb[29].mxu0 }
 0x26f   :  { %v1469_v47 = vadd.f32 %v1432_v40, %v1262_v46  ;;  %6702 = vmatprep.mubr.msk.f32.mxu1 %vm1505_vm4, %v8766_v42 }
 0x270   :  { %6703 = vmatmul.mubr.msk.f32.gmra.mrb[34].mxu1 %vm1505_vm4, %v8768_v44  ;;  %v8776_v54 = vmax.f32 %v1470_v45, 0.0 }
 0x271   :  { %v8774_v51 = vmax.f32 %v1469_v47, 0.0  ;;  %v6658_v52 = vpop.f32.mrb[30].mxu0 }
 0x272   :  { %v1472_v55 = vadd.f32 %v6658_v52, %v1447_v49  ;;  %v1272_v56 = vpop.f32.mrb[31].mxu0 }
 0x273   :  { %v1471_v58 = vadd.f32 %v1442_v53, %v1272_v56  ;;  %6705 = vmatprep.mubr.msk.f32.mxu1 %vm1505_vm4, %v8774_v51  ;;  %v5838_v56 = vld [vmem:[%s9890_s12 + $0x10] sm:$0x3f] }
 0x274   :  { %6706 = vmatmul.mubr.msk.f32.gmra.mrb[36].mxu1 %vm1505_vm4, %v8776_v54  ;;  %v8784_v61 = vmax.f32 %v1472_v55, 0.0 }
 0x275   :  { %v8782_v60 = vmax.f32 %v1471_v58, 0.0 }
 0x277   :  { %6708 = vmatprep.mubr.msk.f32.mxu1 %vm1505_vm4, %v8782_v60 }
 0x278   :  { %6709 = vmatmul.mubr.msk.f32.gmra.mrb[38].mxu1 %vm1505_vm4, %v8784_v61 }
 0x279   :  { %6727 = vmatprep.mubr.msk.f32.mxu1 %vm1505_vm4, %v8678_v28 }
 0x27c   :  { %6728 = vmatmul.mubr.msk.f32.vlgmr.msra.gmra.mrb[40].mxu1 %vm1505_vm4, %v8680_v30 }
 0x27d   :  { %6730 = vmatprep.mubr.msk.f32.mxu1 %vm1505_vm4, %v8692_v38 }
 0x280   :  { %6731 = vmatmul.mubr.msk.f32.gmra.mrb[42].mxu1 %vm1505_vm4, %v8694_v41 }
 0x281   :  { %6733 = vmatprep.mubr.msk.f32.mxu1 %vm1505_vm4, %v8706_v48 }
 0x284   :  { %6734 = vmatmul.mubr.msk.f32.gmra.mrb[44].mxu1 %vm1505_vm4, %v8708_v50 }
 0x285   :  { %6736 = vmatprep.mubr.msk.f32.mxu1 %vm1505_vm4, %v8714_v57 }
 0x288   :  { %6737 = vmatmul.mubr.msk.f32.gmra.mrb[46].mxu1 %vm1505_vm4, %v8716_v59 }
 0x289   :  { %6739 = vmatprep.mubr.msk.f32.mxu1 %vm1505_vm4, %v8724_v0 }
 0x28c   :  { %6740 = vmatmul.mubr.msk.f32.gmra.mrb[48].mxu1 %vm1505_vm4, %v8728_v3 }
 0x28d   :  { %6742 = vmatprep.mubr.msk.f32.mxu1 %vm1505_vm4, %v8734_v7 }
 0x290   :  { %6743 = vmatmul.mubr.msk.f32.gmra.mrb[50].mxu1 %vm1505_vm4, %v8736_v10 }
 0x291   :  { %6745 = vmatprep.mubr.msk.f32.mxu1 %vm1505_vm4, %v8742_v16 }
 0x294   :  { %6746 = vmatmul.mubr.msk.f32.gmra.mrb[52].mxu1 %vm1505_vm4, %v8744_v18 }
 0x295   :  { %6748 = vmatprep.mubr.msk.f32.mxu1 %vm1505_vm4, %v8750_v23 }
 0x298   :  { %6749 = vmatmul.mubr.msk.f32.gmra.mrb[54].mxu1 %vm1505_vm4, %v8752_v26 }
 0x299   :  { %6751 = vmatprep.mubr.msk.f32.mxu1 %vm1505_vm4, %v8758_v32 }
 0x29c   :  { %6752 = vmatmul.mubr.msk.f32.gmra.mrb[56].mxu1 %vm1505_vm4, %v8760_v34 }
 0x29d   :  { %6754 = vmatprep.mubr.msk.f32.mxu1 %vm1505_vm4, %v8766_v42 }
 0x2a0   :  { %6755 = vmatmul.mubr.msk.f32.gmra.mrb[58].mxu1 %vm1505_vm4, %v8768_v44 }
 0x2a1   :  { %6757 = vmatprep.mubr.msk.f32.mxu1 %vm1505_vm4, %v8774_v51 }
 0x2a4   :  { %6758 = vmatmul.mubr.msk.f32.gmra.mrb[60].mxu1 %vm1505_vm4, %v8776_v54 }
 0x2a5   :  { %6760 = vmatprep.mubr.msk.f32.mxu1 %vm1505_vm4, %v8782_v60 }
 0x2a8   :  { %6761 = vmatmul.mubr.msk.f32.gmra.mrb[62].mxu1 %vm1505_vm4, %v8784_v61 }
 0x2a9   :  { %5608 = vmatprep.mubr.msk.f32.mxu1 %vm2013_vm5, %v5584_v63 }
 0x31f   :  { %v6677_v2 = vpop.f32.mrb[16].mxu1 }
 0x320   :  { %v1648_v4 = vpop.f32.mrb[17].mxu1 }
 0x321   :  { %v7439_v5 = vpack.c.bf16 %v6677_v2, %v1648_v4  ;;  %v1767_v2 = vld [vmem:[%s9885_s5] sm:$0xff] }
 0x323   :  { %v6680_v6 = vpop.f32.mrb[18].mxu1  ;;  %7440 = vmatpush1.bf16.msra.mxu0 %v7439_v5  ;;  %v1770_v5 = vld [vmem:[%s9885_s5 + $0x18] sm:$0xff] }
 0x324   :  { %v1658_v9 = vpop.f32.mrb[19].mxu1  ;;  %7441 = vmatprep.subr.bf16.mxu0 %v7863_v62 }
 0x325   :  { %v7442_v11 = vpack.c.bf16 %v6680_v6, %v1658_v9 }
 0x327   :  { %v6683_v12 = vpop.f32.mrb[20].mxu1  ;;  %7443 = vmatpush1.bf16.msra.mxu0 %v7442_v11  ;;  %v1769_v11 = vld [vmem:[%s9885_s5 + $0x10] sm:$0xff] }
 0x328   :  { %v1668_v13 = vpop.f32.mrb[21].mxu1  ;;  %7444 = vmatprep.subr.bf16.mxu0 %v7863_v62 }
 0x329   :  { %v7445_v14 = vpack.c.bf16 %v6683_v12, %v1668_v13  ;;  %v1772_v13 = vld [vmem:[%s9885_s5 + $0x28] sm:$0xff] }
 0x32b   :  { %v6686_v15 = vpop.f32.mrb[22].mxu1  ;;  %7446 = vmatpush1.bf16.msra.mxu0 %v7445_v14 }
 0x32c   :  { %v1678_v17 = vpop.f32.mrb[23].mxu1  ;;  %7447 = vmatprep.subr.bf16.mxu0 %v7863_v62 }
 0x32d   :  { %v7448_v19 = vpack.c.bf16 %v6686_v15, %v1678_v17  ;;  %v1771_v17 = vld [vmem:[%s9885_s5 + $0x20] sm:$0xff] }
 0x32f   :  { %v6689_v20 = vpop.f32.mrb[24].mxu1  ;;  %7449 = vmatpush1.bf16.msra.mxu0 %v7448_v19 }
 0x330   :  { %v1688_v21 = vpop.f32.mrb[25].mxu1  ;;  %7450 = vmatprep.subr.bf16.mxu0 %v7863_v62 }
 0x331   :  { %v7451_v22 = vpack.c.bf16 %v6689_v20, %v1688_v21  ;;  %v1774_v20 = vld [vmem:[%s9885_s5 + $0x38] sm:$0xff] }
 0x333   :  { %v6692_v24 = vpop.f32.mrb[26].mxu1  ;;  %7452 = vmatpush1.bf16.msra.mxu0 %v7451_v22 }
 0x334   :  { %v1698_v25 = vpop.f32.mrb[27].mxu1  ;;  %7453 = vmatprep.subr.bf16.mxu0 %v7863_v62 }
 0x335   :  { %v7454_v27 = vpack.c.bf16 %v6692_v24, %v1698_v25  ;;  %v1773_v24 = vld [vmem:[%s9885_s5 + $0x30] sm:$0xff] }
 0x337   :  { %v6695_v29 = vpop.f32.mrb[28].mxu1  ;;  %7455 = vmatpush1.bf16.msra.mxu0 %v7454_v27  ;;  %v1776_v27 = vld [vmem:[%s9885_s5 + $0x48] sm:$0xff] }
 0x338   :  { %v1708_v31 = vpop.f32.mrb[29].mxu1  ;;  %7456 = vmatprep.subr.bf16.mxu0 %v7863_v62 }
 0x339   :  { %v7457_v33 = vpack.c.bf16 %v6695_v29, %v1708_v31 }
 0x33b   :  { %v6698_v35 = vpop.f32.mrb[30].mxu1  ;;  %7458 = vmatpush1.bf16.msra.mxu0 %v7457_v33  ;;  %v1775_v33 = vld [vmem:[%s9885_s5 + $0x40] sm:$0xff] }
 0x33c   :  { %v1718_v36 = vpop.f32.mrb[31].mxu1  ;;  %7459 = vmatprep.subr.bf16.mxu0 %v7863_v62 }
 0x33d   :  { %v7460_v37 = vpack.c.bf16 %v6698_v35, %v1718_v36  ;;  %v1778_v36 = vld [vmem:[%s9885_s5 + $0x58] sm:$0xff] }
 0x33f   :  { %v6701_v39 = vpop.f32.mrb[32].mxu1  ;;  %7461 = vmatpush1.bf16.msra.mxu0 %v7460_v37 }
 0x340   :  { %v1728_v40 = vpop.f32.mrb[33].mxu1  ;;  %7462 = vmatprep.subr.bf16.mxu0 %v7863_v62 }
 0x341   :  { %v7463_v43 = vpack.c.bf16 %v6701_v39, %v1728_v40  ;;  %v1777_v40 = vld [vmem:[%s9885_s5 + $0x50] sm:$0xff] }
 0x343   :  { %v6704_v45 = vpop.f32.mrb[34].mxu1  ;;  %7464 = vmatpush1.bf16.msra.mxu0 %v7463_v43 }
 0x344   :  { %v1738_v46 = vpop.f32.mrb[35].mxu1  ;;  %7465 = vmatprep.subr.bf16.mxu0 %v7863_v62 }
 0x345   :  { %v7466_v47 = vpack.c.bf16 %v6704_v45, %v1738_v46  ;;  %v1780_v45 = vld [vmem:[%s9885_s5 + $0x68] sm:$0xff] }
 0x347   :  { %v6707_v49 = vpop.f32.mrb[36].mxu1  ;;  %7467 = vmatpush1.bf16.msra.mxu0 %v7466_v47 }
 0x348   :  { %v1748_v52 = vpop.f32.mrb[37].mxu1  ;;  %7468 = vmatprep.subr.bf16.mxu0 %v7863_v62 }
 0x349   :  { %v7469_v53 = vpack.c.bf16 %v6707_v49, %v1748_v52  ;;  %v1779_v49 = vld [vmem:[%s9885_s5 + $0x60] sm:$0xff] }
 0x34b   :  { %v6710_v55 = vpop.f32.mrb[38].mxu1  ;;  %7470 = vmatpush1.bf16.msra.mxu0 %v7469_v53  ;;  %v1782_v53 = vld [vmem:[%s9885_s5 + $0x78] sm:$0xff] }
 0x34c   :  { %v1758_v58 = vpop.f32.mrb[39].mxu1  ;;  %7471 = vmatprep.subr.bf16.mxu0 %v7863_v62 }
 0x34d   :  { %v7472_v63 = vpack.c.bf16 %v6710_v55, %v1758_v58 }
 0x34f   :  { %v6729_v1 = vpop.f32.mrb[40].mxu1  ;;  %7474 = vmatpush1.bf16.msk.msra.mxu0 %vm8859_vm7, %v7472_v63  ;;  %v1781_v63 = vld [vmem:[%s9885_s5 + $0x70] sm:$0xff] }
 0x350   :  { %v1869_v4 = vpop.f32.mrb[41].mxu1  ;;  %7493 = vmatprep.subr.bf16.mxu0 %v7863_v62 }
 0x351   :  { %v7402_v6 = vpack.c.bf16 %v6729_v1, %v1869_v4 }
 0x352   :  { %2283 = vmatmul.mubr.f32.vlgmr.msra.gmra.mrb[32].mxu0 %v1767_v2  ;;  %v1784_v2 = vld [vmem:[%s9885_s5 + $0x88] sm:$0xff] }
 0x353   :  { %v6732_v9 = vpop.f32.mrb[42].mxu1  ;;  %7403 = vmatpush1.bf16.msra.mxu1 %v7402_v6  ;;  %5622 = vmatprep.mubr.msk.f32.mxu0 %vm2013_vm5, %v1770_v5  ;;  %v1783_v6 = vld [vmem:[%s9885_s5 + $0x80] sm:$0xff] }
 0x354   :  { %v1879_v12 = vpop.f32.mrb[43].mxu1  ;;  %7404 = vmatprep.subr.bf16.mxu1 %v7863_v62 }
 0x355   :  { %v7405_v14 = vpack.c.bf16 %v6732_v9, %v1879_v12 }
 0x356   :  { %2288 = vmatmul.mubr.f32.gmra.mrb[34].mxu0 %v1769_v11  ;;  %v1786_v11 = vld [vmem:[%s9885_s5 + $0x98] sm:$0xff] }
 0x357   :  { %v6735_v15 = vpop.f32.mrb[44].mxu1  ;;  %7406 = vmatpush1.bf16.msra.mxu1 %v7405_v14  ;;  %5623 = vmatprep.mubr.msk.f32.mxu0 %vm2013_vm5, %v1772_v13  ;;  %v1785_v14 = vld [vmem:[%s9885_s5 + $0x90] sm:$0xff] }
 0x358   :  { %v1889_v19 = vpop.f32.mrb[45].mxu1  ;;  %7407 = vmatprep.subr.bf16.mxu1 %v7863_v62 }
 0x359   :  { %v7408_v21 = vpack.c.bf16 %v6735_v15, %v1889_v19 }
 0x35a   :  { %2293 = vmatmul.mubr.f32.gmra.mrb[36].mxu0 %v1771_v17  ;;  %v1788_v17 = vld [vmem:[%s9885_s5 + $0xa8] sm:$0xff] }
 0x35b   :  { %v6738_v22 = vpop.f32.mrb[46].mxu1  ;;  %7409 = vmatpush1.bf16.msra.mxu1 %v7408_v21  ;;  %5624 = vmatprep.mubr.msk.f32.mxu0 %vm2013_vm5, %v1774_v20  ;;  %v1787_v21 = vld [vmem:[%s9885_s5 + $0xa0] sm:$0xff] }
 0x35c   :  { %v1899_v25 = vpop.f32.mrb[47].mxu1  ;;  %7410 = vmatprep.subr.bf16.mxu1 %v7863_v62 }
 0x35d   :  { %v7411_v29 = vpack.c.bf16 %v6738_v22, %v1899_v25 }
 0x35e   :  { %2298 = vmatmul.mubr.f32.gmra.mrb[38].mxu0 %v1773_v24  ;;  %v1790_v24 = vld [vmem:[%s9885_s5 + $0xb8] sm:$0x3] }
 0x35f   :  { %v6741_v31 = vpop.f32.mrb[48].mxu1  ;;  %7412 = vmatpush1.bf16.msra.mxu1 %v7411_v29  ;;  %5625 = vmatprep.mubr.msk.f32.mxu0 %vm2013_vm5, %v1776_v27  ;;  %v5633_v27 = vld [vmem:[%s9883_s4 + $0x80] sm:$0xff]  ;;  %v5634_v29 = vld [vmem:[%s9883_s4 + $0x88] sm:$0xff] }
 0x360   :  { %v1909_v35 = vpop.f32.mrb[49].mxu1  ;;  %7413 = vmatprep.subr.bf16.mxu1 %v7863_v62 }
 0x361   :  { %v7414_v37 = vpack.c.bf16 %v6741_v31, %v1909_v35 }
 0x362   :  { %2303 = vmatmul.mubr.f32.gmra.mrb[40].mxu0 %v1775_v33  ;;  %v1789_v33 = vld [vmem:[%s9885_s5 + $0xb0] sm:$0x3] }
 0x363   :  { %v6744_v39 = vpop.f32.mrb[50].mxu1  ;;  %7415 = vmatpush1.bf16.msra.mxu1 %v7414_v37  ;;  %5626 = vmatprep.mubr.msk.f32.mxu0 %vm2013_vm5, %v1778_v36  ;;  %v7475_v36 = vpack.c.bf16 %v5634_v29, %v5633_v27  ;;  %v5606_v27 = vld [vmem:[%s9885_s5 + $0x178] sm:$0x3]  ;;  %v5605_v29 = vld [vmem:[%s9885_s5 + $0x170] sm:$0x3] }
 0x364   :  { %v1919_v43 = vpop.f32.mrb[51].mxu1  ;;  %7416 = vmatprep.subr.bf16.mxu1 %v7863_v62 }
 0x365   :  { %v7417_v46 = vpack.c.bf16 %v6744_v39, %v1919_v43  ;;  %v5635_v39 = vld [vmem:[%s9883_s4 + $0x90] sm:$0xff]  ;;  %v5583_v43 = vld [vmem:[%s9885_s5 + $0xc0] sm:$0xff] }
 0x366   :  { %2308 = vmatmul.mubr.f32.gmra.mrb[42].mxu0 %v1777_v40  ;;  %v5636_v40 = vld [vmem:[%s9883_s4 + $0x98] sm:$0xff] }
 0x367   :  { %v6747_v47 = vpop.f32.mrb[52].mxu1  ;;  %7418 = vmatpush1.bf16.msra.mxu1 %v7417_v46  ;;  %5627 = vmatprep.mubr.msk.f32.mxu0 %vm2013_vm5, %v1780_v45  ;;  %v5586_v45 = vld [vmem:[%s9885_s5 + $0xd8] sm:$0xff]  ;;  %v7479_v46 = vpack.c.bf16 %v5636_v40, %v5635_v39 }
 0x368   :  { %v1929_v52 = vpop.f32.mrb[53].mxu1  ;;  %7419 = vmatprep.subr.bf16.mxu1 %v7863_v62 }
 0x369   :  { %v7420_v55 = vpack.c.bf16 %v6747_v47, %v1929_v52  ;;  %v5637_v47 = vld [vmem:[%s9883_s4 + $0xa0] sm:$0xff]  ;;  %v5585_v52 = vld [vmem:[%s9885_s5 + $0xd0] sm:$0xff] }
 0x36a   :  { %2313 = vmatmul.mubr.f32.gmra.mrb[44].mxu0 %v1779_v49  ;;  %v5638_v49 = vld [vmem:[%s9883_s4 + $0xa8] sm:$0xff] }
 0x36b   :  { %v6750_v58 = vpop.f32.mrb[54].mxu1  ;;  %7421 = vmatpush1.bf16.msra.mxu1 %v7420_v55  ;;  %5628 = vmatprep.mubr.msk.f32.mxu0 %vm2013_vm5, %v1782_v53  ;;  %v5588_v53 = vld [vmem:[%s9885_s5 + $0xe8] sm:$0xff]  ;;  %v7483_v55 = vpack.c.bf16 %v5638_v49, %v5637_v47 }
 0x36c   :  { %v1939_v1 = vpop.f32.mrb[55].mxu1  ;;  %7422 = vmatprep.subr.bf16.mxu1 %v7863_v62 }
 0x36d   :  { %v7423_v4 = vpack.c.bf16 %v6750_v58, %v1939_v1  ;;  %v5639_v58 = vld [vmem:[%s9883_s4 + $0xb0] sm:$0xff]  ;;  %v5587_v1 = vld [vmem:[%s9885_s5 + $0xe0] sm:$0xff] }
 0x36e   :  { %2318 = vmatmul.mubr.f32.gmra.mrb[46].mxu0 %v1781_v63  ;;  %v5640_v63 = vld [vmem:[%s9883_s4 + $0xb8] sm:$0x3f] }
 0x36f   :  { %v6753_v5 = vpop.f32.mrb[56].mxu1  ;;  %7424 = vmatpush1.bf16.msra.mxu1 %v7423_v4  ;;  %5629 = vmatprep.mubr.msk.f32.mxu0 %vm2013_vm5, %v1784_v2  ;;  %v5590_v2 = vld [vmem:[%s9885_s5 + $0xf8] sm:$0xff]  ;;  %v7487_v4 = vpack.c.bf16 %v5640_v63, %v5639_v58  ;;  %v2838_v58 = vld [vmem:[%s9886_s7 + $0x8] sm:$0xff] }
 0x370   :  { %v1949_v9 = vpop.f32.mrb[57].mxu1  ;;  %7425 = vmatprep.subr.bf16.mxu1 %v7863_v62 }
 0x371   :  { %v7426_v12 = vpack.c.bf16 %v6753_v5, %v1949_v9  ;;  %v5589_v5 = vld [vmem:[%s9885_s5 + $0xf0] sm:$0xff]  ;;  %v5591_v9 = vld [vmem:[%s9885_s5 + $0x100] sm:$0xff] }
 0x372   :  { %2323 = vmatmul.mubr.f32.gmra.mrb[48].mxu0 %v1783_v6  ;;  %v5592_v6 = vld [vmem:[%s9885_s5 + $0x108] sm:$0xff] }
 0x373   :  { %v6756_v13 = vpop.f32.mrb[58].mxu1  ;;  %7427 = vmatpush1.bf16.msra.mxu1 %v7426_v12  ;;  %5630 = vmatprep.mubr.msk.f32.mxu0 %vm2013_vm5, %v1786_v11  ;;  %v5594_v11 = vld [vmem:[%s9885_s5 + $0x118] sm:$0xff]  ;;  %v5593_v12 = vld [vmem:[%s9885_s5 + $0x110] sm:$0xff] }
 0x374   :  { %v1959_v15 = vpop.f32.mrb[59].mxu1  ;;  %7428 = vmatprep.subr.bf16.mxu1 %v7863_v62 }
 0x375   :  { %v7429_v19 = vpack.c.bf16 %v6756_v13, %v1959_v15  ;;  %v5596_v13 = vld [vmem:[%s9885_s5 + $0x128] sm:$0xff]  ;;  %v5598_v15 = vld [vmem:[%s9885_s5 + $0x138] sm:$0xff] }
 0x376   :  { %2328 = vmatmul.mubr.f32.gmra.mrb[50].mxu0 %v1785_v14  ;;  %v5595_v14 = vld [vmem:[%s9885_s5 + $0x120] sm:$0xff] }
 0x377   :  { %v6759_v20 = vpop.f32.mrb[60].mxu1  ;;  %7430 = vmatpush1.bf16.msra.mxu1 %v7429_v19  ;;  %5631 = vmatprep.mubr.msk.f32.mxu0 %vm2013_vm5, %v1788_v17  ;;  %v5597_v17 = vld [vmem:[%s9885_s5 + $0x130] sm:$0xff]  ;;  %v5600_v19 = vld [vmem:[%s9885_s5 + $0x148] sm:$0xff] }
 0x378   :  { %v1969_v22 = vpop.f32.mrb[61].mxu1  ;;  %7431 = vmatprep.subr.bf16.mxu1 %v7863_v62 }
 0x379   :  { %v7432_v25 = vpack.c.bf16 %v6759_v20, %v1969_v22  ;;  %v5599_v20 = vld [vmem:[%s9885_s5 + $0x140] sm:$0xff]  ;;  %v5601_v22 = vld [vmem:[%s9885_s5 + $0x150] sm:$0xff] }
 0x37a   :  { %2333 = vmatmul.mubr.f32.gmra.mrb[52].mxu0 %v1787_v21  ;;  %v5602_v21 = vld [vmem:[%s9885_s5 + $0x158] sm:$0xff] }
 0x37b   :  { %v6762_v31 = vpop.f32.mrb[62].mxu1  ;;  %7433 = vmatpush1.bf16.msra.mxu1 %v7432_v25  ;;  %5632 = vmatprep.mubr.msk.f32.mxu0 %vm2013_vm5, %v1790_v24  ;;  %v5604_v24 = vld [vmem:[%s9885_s5 + $0x168] sm:$0xff]  ;;  %v5603_v25 = vld [vmem:[%s9885_s5 + $0x160] sm:$0xff] }
 0x37c   :  { %v1979_v35 = vpop.f32.mrb[63].mxu1  ;;  %7434 = vmatprep.subr.bf16.mxu1 %v7863_v62 }
 0x37d   :  { %v7435_v37 = vpack.c.bf16 %v6762_v31, %v1979_v35 }
 0x37e   :  { %2338 = vmatmul.mubr.f32.gmra.mrb[54].mxu0 %v1789_v33 }
 0x37f   :  { %7437 = vmatpush1.bf16.msk.msra.mxu1 %vm8859_vm7, %v7435_v37 }
 0x380   :  { %7476 = vmatprep.subr.bf16.mxu1 %v7475_v36 }
 0x382   :  { %2119 = vmatmul.mubr.f32.vlgmr.msra.gmra.mrb[64].mxu1 %v5583_v43 }
 0x383   :  { %5609 = vmatprep.mubr.msk.f32.mxu1 %vm2013_vm5, %v5586_v45  ;;  %7478 = vmatpush3.bf16.msra.mxu1 %v7475_v36 }
 0x384   :  { %7480 = vmatprep.subr.bf16.mxu1 %v7479_v46 }
 0x386   :  { %2124 = vmatmul.mubr.f32.gmra.mrb[66].mxu1 %v5585_v52 }
 0x387   :  { %5610 = vmatprep.mubr.msk.f32.mxu1 %vm2013_vm5, %v5588_v53  ;;  %7482 = vmatpush3.bf16.msra.mxu1 %v7479_v46 }
 0x388   :  { %7484 = vmatprep.subr.bf16.mxu1 %v7483_v55 }
 0x38a   :  { %2129 = vmatmul.mubr.f32.gmra.mrb[68].mxu1 %v5587_v1 }
 0x38b   :  { %5611 = vmatprep.mubr.msk.f32.mxu1 %vm2013_vm5, %v5590_v2  ;;  %7486 = vmatpush3.bf16.msra.mxu1 %v7483_v55  ;;  %v2837_v55 = vld [vmem:[%s9886_s7] sm:$0xff] }
 0x38c   :  { %7489 = vmatprep.subr.msk.bf16.mxu1 %vm8658_vm3, %v7487_v4  ;;  %v7530_v2 = vpack.c.bf16 %v2838_v58, %v2837_v55 }
 0x38e   :  { %2134 = vmatmul.mubr.f32.gmra.mrb[70].mxu1 %v5589_v5 }
 0x38f   :  { %5612 = vmatprep.mubr.msk.f32.mxu1 %vm2013_vm5, %v5592_v6  ;;  %7492 = vmatpush3.bf16.msk.msra.mxu1 %vm8658_vm3, %v7487_v4 }
 0x390   :  { %7531 = vmatprep.subr.bf16.mxu1 %v7530_v2 }
 0x392   :  { %2139 = vmatmul.mubr.f32.gmra.mrb[72].mxu1 %v5591_v9 }
 0x393   :  { %5613 = vmatprep.mubr.msk.f32.mxu1 %vm2013_vm5, %v5594_v11 }
 0x396   :  { %2144 = vmatmul.mubr.f32.gmra.mrb[74].mxu1 %v5593_v12 }
 0x397   :  { %5614 = vmatprep.mubr.msk.f32.mxu1 %vm2013_vm5, %v5596_v13 }
 0x39a   :  { %2149 = vmatmul.mubr.f32.gmra.mrb[76].mxu1 %v5595_v14 }
 0x39b   :  { %5615 = vmatprep.mubr.msk.f32.mxu1 %vm2013_vm5, %v5598_v15 }
 0x39e   :  { %2154 = vmatmul.mubr.f32.gmra.mrb[78].mxu1 %v5597_v17 }
 0x39f   :  { %5616 = vmatprep.mubr.msk.f32.mxu1 %vm2013_vm5, %v5600_v19 }
 0x3a2   :  { %2159 = vmatmul.mubr.f32.gmra.mrb[80].mxu1 %v5599_v20 }
 0x3a3   :  { %5617 = vmatprep.mubr.msk.f32.mxu1 %vm2013_vm5, %v5602_v21 }
 0x3a6   :  { %2164 = vmatmul.mubr.f32.gmra.mrb[82].mxu1 %v5601_v22 }
 0x3a7   :  { %5618 = vmatprep.mubr.msk.f32.mxu1 %vm2013_vm5, %v5604_v24 }
 0x3aa   :  { %2169 = vmatmul.mubr.f32.gmra.mrb[84].mxu1 %v5603_v25 }
 0x3ab   :  { %5619 = vmatprep.mubr.msk.f32.mxu1 %vm2013_vm5, %v5606_v27 }
 0x3ae   :  { %2174 = vmatmul.mubr.f32.gmra.mrb[86].mxu1 %v5605_v29 }
 0x3af   :  { %6779 = vmatprep.mubr.msk.f32.mxu1 %vm1505_vm4, %v8678_v28 }
 0x3b2   :  { %6780 = vmatmul.mubr.msk.f32.vlgmr.msra.gmra.mrb[88].mxu1 %vm1505_vm4, %v8680_v30 }
 0x3b3   :  { %6782 = vmatprep.mubr.msk.f32.mxu1 %vm1505_vm4, %v8692_v38  ;;  %7533 = vmatpush3.bf16.msra.mxu1 %v7530_v2 }
 0x3b6   :  { %6783 = vmatmul.mubr.msk.f32.gmra.mrb[90].mxu1 %vm1505_vm4, %v8694_v41 }
 0x3b7   :  { %6785 = vmatprep.mubr.msk.f32.mxu1 %vm1505_vm4, %v8706_v48 }
 0x3ba   :  { %6786 = vmatmul.mubr.msk.f32.gmra.mrb[92].mxu1 %vm1505_vm4, %v8708_v50 }
 0x3bb   :  { %6788 = vmatprep.mubr.msk.f32.mxu1 %vm1505_vm4, %v8714_v57 }
 0x3be   :  { %6789 = vmatmul.mubr.msk.f32.gmra.mrb[94].mxu1 %vm1505_vm4, %v8716_v59 }
 0x3bf   :  { %6791 = vmatprep.mubr.msk.f32.mxu1 %vm1505_vm4, %v8724_v0 }
 0x3c2   :  { %6792 = vmatmul.mubr.msk.f32.gmra.mrb[96].mxu1 %vm1505_vm4, %v8728_v3  ;;  %v5667_v3 = vld [vmem:[%s9885_s5 + $0x188] sm:$0xff] }
 0x3c3   :  { %6794 = vmatprep.mubr.msk.f32.mxu1 %vm1505_vm4, %v8734_v7  ;;  %5691 = vmatprep.mubr.msk.f32.mxu0 %vm2013_vm5, %v5667_v3 }
 0x3c6   :  { %6795 = vmatmul.mubr.msk.f32.gmra.mrb[98].mxu1 %vm1505_vm4, %v8736_v10 }
 0x3c7   :  { %6797 = vmatprep.mubr.msk.f32.mxu1 %vm1505_vm4, %v8742_v16 }
 0x3ca   :  { %6798 = vmatmul.mubr.msk.f32.gmra.mrb[100].mxu1 %vm1505_vm4, %v8744_v18 }
 0x3cb   :  { %6800 = vmatprep.mubr.msk.f32.mxu1 %vm1505_vm4, %v8750_v23 }
 0x3ce   :  { %6801 = vmatmul.mubr.msk.f32.gmra.mrb[102].mxu1 %vm1505_vm4, %v8752_v26 }
 0x3cf   :  { %6803 = vmatprep.mubr.msk.f32.mxu1 %vm1505_vm4, %v8758_v32 }
 0x3d2   :  { %6804 = vmatmul.mubr.msk.f32.gmra.mrb[104].mxu1 %vm1505_vm4, %v8760_v34 }
 0x3d3   :  { %6806 = vmatprep.mubr.msk.f32.mxu1 %vm1505_vm4, %v8766_v42 }
 0x3d6   :  { %6807 = vmatmul.mubr.msk.f32.gmra.mrb[106].mxu1 %vm1505_vm4, %v8768_v44 }
 0x3d7   :  { %6809 = vmatprep.mubr.msk.f32.mxu1 %vm1505_vm4, %v8774_v51 }
 0x3da   :  { %6810 = vmatmul.mubr.msk.f32.gmra.mrb[108].mxu1 %vm1505_vm4, %v8776_v54 }
 0x3db   :  { %6812 = vmatprep.mubr.msk.f32.mxu1 %vm1505_vm4, %v8782_v60 }
 0x3de   :  { %6813 = vmatmul.mubr.msk.f32.gmra.mrb[110].mxu1 %vm1505_vm4, %v8784_v61 }
 0x425   :  { %v2284_v28 = vpop.f32.mrb[32].mxu0 }
 0x426   :  { %v2286_v30 = vpop.f32.mrb[33].mxu0 }
 0x429   :  { %v2289_v38 = vpop.f32.mrb[34].mxu0 }
 0x42a   :  { %v2291_v41 = vpop.f32.mrb[35].mxu0 }
 0x42d   :  { %v2294_v48 = vpop.f32.mrb[36].mxu0 }
 0x42e   :  { %v2296_v50 = vpop.f32.mrb[37].mxu0 }
 0x431   :  { %v2299_v57 = vpop.f32.mrb[38].mxu0 }
 0x432   :  { %v2301_v59 = vpop.f32.mrb[39].mxu0 }
 0x435   :  { %v2304_v0 = vpop.f32.mrb[40].mxu0 }
 0x436   :  { %v2306_v7 = vpop.f32.mrb[41].mxu0 }
 0x439   :  { %v2309_v10 = vpop.f32.mrb[42].mxu0 }
 0x43a   :  { %v2311_v16 = vpop.f32.mrb[43].mxu0 }
 0x43d   :  { %v2314_v18 = vpop.f32.mrb[44].mxu0 }
 0x43e   :  { %v2316_v23 = vpop.f32.mrb[45].mxu0 }
 0x441   :  { %v2319_v26 = vpop.f32.mrb[46].mxu0 }
 0x442   :  { %v2321_v32 = vpop.f32.mrb[47].mxu0 }
 0x445   :  { %v2324_v34 = vpop.f32.mrb[48].mxu0 }
 0x446   :  { %v2326_v42 = vpop.f32.mrb[49].mxu0 }
 0x449   :  { %v2329_v44 = vpop.f32.mrb[50].mxu0 }
 0x44a   :  { %v2331_v51 = vpop.f32.mrb[51].mxu0 }
 0x44d   :  { %v2334_v54 = vpop.f32.mrb[52].mxu0 }
 0x44e   :  { %v2336_v60 = vpop.f32.mrb[53].mxu0 }
 0x451   :  { %v2339_v61 = vpop.f32.mrb[54].mxu0 }
 0x452   :  { %v2341_v31 = vpop.f32.mrb[55].mxu0 }
 0x455   :  { %v2120_v33 = vpop.f32.mrb[64].mxu1 }
 0x456   :  { %v9120_v35 = vadd.f32 %v2284_v28, %v2120_v33  ;;  %v2122_v36 = vpop.f32.mrb[65].mxu1 }
 0x459   :  { %v2125_v37 = vpop.f32.mrb[66].mxu1 }
 0x45a   :  { %v9122_v39 = vadd.f32 %v2289_v38, %v2125_v37  ;;  %v2127_v40 = vpop.f32.mrb[67].mxu1 }
 0x45d   :  { %v2130_v43 = vpop.f32.mrb[68].mxu1 }
 0x45e   :  { %v9124_v45 = vadd.f32 %v2294_v48, %v2130_v43  ;;  %v2132_v46 = vpop.f32.mrb[69].mxu1 }
 0x461   :  { %v2135_v47 = vpop.f32.mrb[70].mxu1 }
 0x462   :  { %v9126_v49 = vadd.f32 %v2299_v57, %v2135_v47  ;;  %v2137_v52 = vpop.f32.mrb[71].mxu1 }
 0x465   :  { %v2140_v53 = vpop.f32.mrb[72].mxu1 }
 0x466   :  { %v9134_v63 = vadd.f32 %v2304_v0, %v2140_v53  ;;  %v2142_v1 = vpop.f32.mrb[73].mxu1 }
 0x469   :  { %v2145_v4 = vpop.f32.mrb[74].mxu1 }
 0x46a   :  { %v9136_v5 = vadd.f32 %v2309_v10, %v2145_v4  ;;  %v2147_v6 = vpop.f32.mrb[75].mxu1 }
 0x46b   :  { %v5666_v6 = vld [vmem:[%s9885_s5 + $0x180] sm:$0xff] }
 0x46d   :  { %v2150_v9 = vpop.f32.mrb[76].mxu1 }
 0x46e   :  { %v9138_v11 = vadd.f32 %v2314_v18, %v2150_v9  ;;  %v2152_v12 = vpop.f32.mrb[77].mxu1  ;;  %v5669_v9 = vld [vmem:[%s9885_s5 + $0x198] sm:$0xff] }
 0x46f   :  { %v5668_v12 = vld [vmem:[%s9885_s5 + $0x190] sm:$0xff] }
 0x471   :  { %v2155_v13 = vpop.f32.mrb[78].mxu1 }
 0x472   :  { %v9140_v14 = vadd.f32 %v2319_v26, %v2155_v13  ;;  %v2157_v15 = vpop.f32.mrb[79].mxu1  ;;  %v5671_v13 = vld [vmem:[%s9885_s5 + $0x1a8] sm:$0xff] }
 0x473   :  { %v5670_v15 = vld [vmem:[%s9885_s5 + $0x1a0] sm:$0xff] }
 0x475   :  { %v2160_v17 = vpop.f32.mrb[80].mxu1 }
 0x476   :  { %v9142_v19 = vadd.f32 %v2324_v34, %v2160_v17  ;;  %v2162_v20 = vpop.f32.mrb[81].mxu1  ;;  %v5673_v17 = vld [vmem:[%s9885_s5 + $0x1b8] sm:$0xff] }
 0x477   :  { %v5672_v20 = vld [vmem:[%s9885_s5 + $0x1b0] sm:$0xff] }
 0x479   :  { %v2165_v21 = vpop.f32.mrb[82].mxu1 }
 0x47a   :  { %v9144_v22 = vadd.f32 %v2329_v44, %v2165_v21  ;;  %v2167_v24 = vpop.f32.mrb[83].mxu1  ;;  %v5675_v21 = vld [vmem:[%s9885_s5 + $0x1c8] sm:$0xff] }
 0x47b   :  { %v5674_v24 = vld [vmem:[%s9885_s5 + $0x1c0] sm:$0xff] }
 0x47d   :  { %v2170_v25 = vpop.f32.mrb[84].mxu1 }
 0x47e   :  { %v9146_v27 = vadd.f32 %v2334_v54, %v2170_v25  ;;  %v2172_v29 = vpop.f32.mrb[85].mxu1  ;;  %v5677_v25 = vld [vmem:[%s9885_s5 + $0x1d8] sm:$0xff] }
 0x47f   :  { %v5676_v29 = vld [vmem:[%s9885_s5 + $0x1d0] sm:$0xff] }
 0x481   :  { %v2175_v28 = vpop.f32.mrb[86].mxu1 }
 0x482   :  { %v9148_v30 = vadd.f32 %v2339_v61, %v2175_v28  ;;  %v2177_v38 = vpop.f32.mrb[87].mxu1  ;;  %v5679_v28 = vld [vmem:[%s9885_s5 + $0x1e8] sm:$0xff] }
 0x483   :  { %v5678_v38 = vld [vmem:[%s9885_s5 + $0x1e0] sm:$0xff] }
 0x485   :  { %v6781_v41 = vpop.f32.mrb[88].mxu1 }
 0x486   :  { %v2421_v48 = vpop.f32.mrb[89].mxu1 }
 0x487   :  { %v7494_v50 = vpack.c.bf16 %v6781_v41, %v2421_v48  ;;  %v5681_v41 = vld [vmem:[%s9885_s5 + $0x1f8] sm:$0xff]  ;;  %v5680_v48 = vld [vmem:[%s9885_s5 + $0x1f0] sm:$0xff] }
 0x489   :  { %v6784_v57 = vpop.f32.mrb[90].mxu1  ;;  %7495 = vmatpush1.bf16.msra.mxu0 %v7494_v50  ;;  %v5683_v50 = vld [vmem:[%s9885_s5 + $0x208] sm:$0xff] }
 0x48a   :  { %v2431_v59 = vpop.f32.mrb[91].mxu1  ;;  %7496 = vmatprep.subr.bf16.mxu0 %v7863_v62 }
 0x48b   :  { %v7497_v0 = vpack.c.bf16 %v6784_v57, %v2431_v59  ;;  %v5682_v57 = vld [vmem:[%s9885_s5 + $0x200] sm:$0xff]  ;;  %v5685_v59 = vld [vmem:[%s9885_s5 + $0x218] sm:$0xff] }
 0x48d   :  { %v6787_v3 = vpop.f32.mrb[92].mxu1  ;;  %7498 = vmatpush1.bf16.msra.mxu0 %v7497_v0  ;;  %v5684_v0 = vld [vmem:[%s9885_s5 + $0x210] sm:$0xff] }
 0x48e   :  { %v2441_v7 = vpop.f32.mrb[93].mxu1  ;;  %7499 = vmatprep.subr.bf16.mxu0 %v7863_v62 }
 0x48f   :  { %v7500_v10 = vpack.c.bf16 %v6787_v3, %v2441_v7  ;;  %v5687_v3 = vld [vmem:[%s9885_s5 + $0x228] sm:$0xff]  ;;  %v5686_v7 = vld [vmem:[%s9885_s5 + $0x220] sm:$0xff] }
 0x491   :  { %v6790_v16 = vpop.f32.mrb[94].mxu1  ;;  %7501 = vmatpush1.bf16.msra.mxu0 %v7500_v10  ;;  %v5689_v10 = vld [vmem:[%s9885_s5 + $0x238] sm:$0x3] }
 0x492   :  { %v2451_v18 = vpop.f32.mrb[95].mxu1  ;;  %7502 = vmatprep.subr.bf16.mxu0 %v7863_v62 }
 0x493   :  { %v7503_v23 = vpack.c.bf16 %v6790_v16, %v2451_v18  ;;  %v5688_v16 = vld [vmem:[%s9885_s5 + $0x230] sm:$0x3] }
 0x494   :  { %v2839_v18 = vld [vmem:[%s9886_s7 + $0x10] sm:$0xff] }
 0x495   :  { %v6793_v26 = vpop.f32.mrb[96].mxu1  ;;  %7504 = vmatpush1.bf16.msra.mxu0 %v7503_v23  ;;  %v2840_v23 = vld [vmem:[%s9886_s7 + $0x18] sm:$0x3f] }
 0x496   :  { %v2461_v32 = vpop.f32.mrb[97].mxu1  ;;  %7505 = vmatprep.subr.bf16.mxu0 %v7863_v62 }
 0x497   :  { %v7506_v34 = vpack.c.bf16 %v6793_v26, %v2461_v32  ;;  %v7534_v26 = vpack.c.bf16 %v2840_v23, %v2839_v18 }
 0x499   :  { %v6796_v42 = vpop.f32.mrb[98].mxu1  ;;  %7507 = vmatpush1.bf16.msra.mxu0 %v7506_v34  ;;  %7536 = vmatprep.subr.msk.bf16.mxu1 %vm8658_vm3, %v7534_v26 }
 0x49a   :  { %v2471_v44 = vpop.f32.mrb[99].mxu1  ;;  %7508 = vmatprep.subr.bf16.mxu0 %v7863_v62  ;;  %7539 = vmatpush3.bf16.msk.msra.mxu1 %vm8658_vm3, %v7534_v26 }
 0x49b   :  { %v7509_v51 = vpack.c.bf16 %v6796_v42, %v2471_v44  ;;  %v2756_v44 = vpop.permute.xlu0 %2755 }
 0x49d   :  { %v6799_v54 = vpop.f32.mrb[100].mxu1  ;;  %7510 = vmatpush1.bf16.msra.mxu0 %v7509_v51 }
 0x49e   :  { %v2481_v60 = vpop.f32.mrb[101].mxu1  ;;  %7511 = vmatprep.subr.bf16.mxu0 %v7863_v62 }
 0x49f   :  { %v7512_v61 = vpack.c.bf16 %v6799_v54, %v2481_v60 }
 0x4a1   :  { %v6802_v31 = vpop.f32.mrb[102].mxu1  ;;  %7513 = vmatpush1.bf16.msra.mxu0 %v7512_v61 }
 0x4a2   :  { %v2491_v33 = vpop.f32.mrb[103].mxu1  ;;  %7514 = vmatprep.subr.bf16.mxu0 %v7863_v62 }
 0x4a3   :  { %v7515_v36 = vpack.c.bf16 %v6802_v31, %v2491_v33  ;;  %v2761_v33 = vpop.permute.xlu1 %2760 }
 0x4a5   :  { %v6805_v37 = vpop.f32.mrb[104].mxu1  ;;  %7516 = vmatpush1.bf16.msra.mxu0 %v7515_v36 }
 0x4a6   :  { %v2501_v40 = vpop.f32.mrb[105].mxu1  ;;  %7517 = vmatprep.subr.bf16.mxu0 %v7863_v62 }
 0x4a7   :  { %v7518_v43 = vpack.c.bf16 %v6805_v37, %v2501_v40 }
 0x4a9   :  { %v6808_v46 = vpop.f32.mrb[106].mxu1  ;;  %7519 = vmatpush1.bf16.msra.mxu0 %v7518_v43 }
 0x4aa   :  { %v2511_v47 = vpop.f32.mrb[107].mxu1  ;;  %7520 = vmatprep.subr.bf16.mxu0 %v7863_v62 }
 0x4ab   :  { %v7521_v52 = vpack.c.bf16 %v6808_v46, %v2511_v47  ;;  %v2766_v46 = vpop.permute.xlu0 %2765 }
 0x4ad   :  { %v6811_v53 = vpop.f32.mrb[108].mxu1  ;;  %7522 = vmatpush1.bf16.msra.mxu0 %v7521_v52 }
 0x4ae   :  { %v2521_v55 = vpop.f32.mrb[109].mxu1  ;;  %7523 = vmatprep.subr.bf16.mxu0 %v7863_v62 }
 0x4af   :  { %v7524_v58 = vpack.c.bf16 %v6811_v53, %v2521_v55 }
 0x4b1   :  { %v6814_v1 = vpop.f32.mrb[110].mxu1  ;;  %7525 = vmatpush1.bf16.msra.mxu0 %v7524_v58  ;;  %v2771_v58 = vpop.permute.xlu1 %2770 }
 0x4b2   :  { %v2531_v2 = vpop.f32.mrb[111].mxu1  ;;  %7526 = vmatprep.subr.bf16.mxu0 %v7863_v62 }
 0x4b3   :  { %v7527_v4 = vpack.c.bf16 %v6814_v1, %v2531_v2 }
 0x4b5   :  { %7529 = vmatpush1.bf16.msk.msra.mxu0 %vm8859_vm7, %v7527_v4 }
 0x4b8   :  { %2669 = vmatmul.mubr.f32.vlgmr.msra.gmra.mrb[56].mxu0 %v5666_v6 }
 0x4b9   :  { %5692 = vmatprep.mubr.msk.f32.mxu0 %vm2013_vm5, %v5669_v9  ;;  %v2776_v9 = vpop.permute.xlu0 %2775 }
 0x4bc   :  { %2674 = vmatmul.mubr.f32.gmra.mrb[58].mxu0 %v5668_v12 }
 0x4bd   :  { %5693 = vmatprep.mubr.msk.f32.mxu0 %vm2013_vm5, %v5671_v13 }
 0x4c0   :  { %2679 = vmatmul.mubr.f32.gmra.mrb[60].mxu0 %v5670_v15 }
 0x4c1   :  { %5694 = vmatprep.mubr.msk.f32.mxu0 %vm2013_vm5, %v5673_v17 }
 0x4c4   :  { %2684 = vmatmul.mubr.f32.gmra.mrb[62].mxu0 %v5672_v20  ;;  %v2781_v20 = vpop.permute.xlu1 %2780 }
 0x4c5   :  { %5695 = vmatprep.mubr.msk.f32.mxu0 %vm2013_vm5, %v5675_v21 }
 0x4c8   :  { %2689 = vmatmul.mubr.f32.gmra.mrb[64].mxu0 %v5674_v24 }
 0x4c9   :  { %5696 = vmatprep.mubr.msk.f32.mxu0 %vm2013_vm5, %v5677_v25 }
 0x4cc   :  { %2694 = vmatmul.mubr.f32.gmra.mrb[66].mxu0 %v5676_v29 }
 0x4cd   :  { %5697 = vmatprep.mubr.msk.f32.mxu0 %vm2013_vm5, %v5679_v28  ;;  %v2786_v28 = vpop.permute.xlu0 %2785 }
 0x4d0   :  { %2699 = vmatmul.mubr.f32.gmra.mrb[68].mxu0 %v5678_v38 }
 0x4d1   :  { %5698 = vmatprep.mubr.msk.f32.mxu0 %vm2013_vm5, %v5681_v41 }
 0x4d4   :  { %2704 = vmatmul.mubr.f32.gmra.mrb[70].mxu0 %v5680_v48 }
 0x4d5   :  { %5699 = vmatprep.mubr.msk.f32.mxu0 %vm2013_vm5, %v5683_v50 }
 0x4d8   :  { %2709 = vmatmul.mubr.f32.gmra.mrb[72].mxu0 %v5682_v57  ;;  %v2791_v57 = vpop.permute.xlu1 %2790 }
 0x4d9   :  { %5700 = vmatprep.mubr.msk.f32.mxu0 %vm2013_vm5, %v5685_v59 }
 0x4dc   :  { %2714 = vmatmul.mubr.f32.gmra.mrb[74].mxu0 %v5684_v0 }
 0x4dd   :  { %5701 = vmatprep.mubr.msk.f32.mxu0 %vm2013_vm5, %v5687_v3 }
 0x4e0   :  { %2719 = vmatmul.mubr.f32.gmra.mrb[76].mxu0 %v5686_v7 }
 0x4e1   :  { %5702 = vmatprep.mubr.msk.f32.mxu0 %vm2013_vm5, %v5689_v10  ;;  %v2796_v10 = vpop.permute.xlu0 %2795 }
 0x4e4   :  { %2724 = vmatmul.mubr.f32.gmra.mrb[78].mxu0 %v5688_v16 }
 0x58b   :  { %v2670_v32 = vpop.f32.mrb[56].mxu0 }
 0x58c   :  { %v2729_v34 = vadd.f32 %v2670_v32, %v9120_v35  ;;  %v2672_v42 = vpop.f32.mrb[57].mxu0  ;;  %v2801_v32 = vpop.permute.xlu1 %2800 }
 0x58e   :  { %v9254_v51 = vadd.f32 %v2756_v44, %v2729_v34 }
 0x58f   :  { %v2675_v54 = vpop.f32.mrb[58].mxu0 }
 0x590   :  { %v2825_v60 = vmax.f32 %v9254_v51, 0.0  ;;  %v2730_v61 = vadd.f32 %v2675_v54, %v9122_v39  ;;  %v2677_v31 = vpop.f32.mrb[59].mxu0 }
 0x592   :  { %v9258_v36 = vadd.f32 %v2761_v33, %v2730_v61  ;;  %6823 = vmatprep.mubr.msk.f32.mxu1 %vm2841_vm8, %v2825_v60  ;;  %v2806_v61 = vpop.permute.xlu0 %2805 }
 0x593   :  { %v2680_v37 = vpop.f32.mrb[60].mxu0 }
 0x594   :  { %v2826_v35 = vmax.f32 %v9258_v36, 0.0  ;;  %v2731_v40 = vadd.f32 %v2680_v37, %v9124_v45  ;;  %v2682_v43 = vpop.f32.mrb[61].mxu0 }
 0x595   :  { %v2811_v43 = vpop.permute.xlu1 %2810 }
 0x596   :  { %v9265_v47 = vadd.f32 %v2766_v46, %v2731_v40  ;;  %6824 = vmatmul.mubr.msk.f32.vlgmr.msra.gmra.mrb[112].mxu1 %vm2841_vm8, %v2826_v35 }
 0x597   :  { %v2685_v39 = vpop.f32.mrb[62].mxu0 }
 0x598   :  { %v2827_v52 = vmax.f32 %v9265_v47, 0.0  ;;  %v2732_v53 = vadd.f32 %v2685_v39, %v9126_v49  ;;  %v2687_v55 = vpop.f32.mrb[63].mxu0  ;;  %v9340_v39 = vld [vmem:[%s9887_s8] sm:$0xff] }
 0x599   :  { %6865 = vmatprep.mubr.msk.f32.mxu0 %vm3012_vm9, %v9340_v39 }
 0x59a   :  { %v9272_v1 = vadd.f32 %v2771_v58, %v2732_v53  ;;  %6826 = vmatprep.mubr.msk.f32.mxu1 %vm2841_vm8, %v2827_v52 }
 0x59b   :  { %v2690_v45 = vpop.f32.mrb[64].mxu0 }
 0x59c   :  { %v2828_v2 = vmax.f32 %v9272_v1, 0.0  ;;  %v2733_v4 = vadd.f32 %v2690_v45, %v9134_v63  ;;  %v2692_v6 = vpop.f32.mrb[65].mxu0 }
 0x59e   :  { %v9279_v12 = vadd.f32 %v2776_v9, %v2733_v4  ;;  %6827 = vmatmul.mubr.msk.f32.gmra.mrb[114].mxu1 %vm2841_vm8, %v2828_v2 }
 0x59f   :  { %v2695_v49 = vpop.f32.mrb[66].mxu0 }
 0x5a0   :  { %v2829_v13 = vmax.f32 %v9279_v12, 0.0  ;;  %v2734_v15 = vadd.f32 %v2695_v49, %v9136_v5  ;;  %v2697_v17 = vpop.f32.mrb[67].mxu0 }
 0x5a2   :  { %v9286_v21 = vadd.f32 %v2781_v20, %v2734_v15  ;;  %6829 = vmatprep.mubr.msk.f32.mxu1 %vm2841_vm8, %v2829_v13 }
 0x5a3   :  { %v2700_v63 = vpop.f32.mrb[68].mxu0 }
 0x5a4   :  { %v2830_v24 = vmax.f32 %v9286_v21, 0.0  ;;  %v2735_v25 = vadd.f32 %v2700_v63, %v9138_v11  ;;  %v2702_v29 = vpop.f32.mrb[69].mxu0 }
 0x5a6   :  { %v9293_v38 = vadd.f32 %v2786_v28, %v2735_v25  ;;  %6830 = vmatmul.mubr.msk.f32.gmra.mrb[116].mxu1 %vm2841_vm8, %v2830_v24 }
 0x5a7   :  { %v2705_v5 = vpop.f32.mrb[70].mxu0 }
 0x5a8   :  { %v2831_v41 = vmax.f32 %v9293_v38, 0.0  ;;  %v2736_v48 = vadd.f32 %v2705_v5, %v9140_v14  ;;  %v2707_v50 = vpop.f32.mrb[71].mxu0  ;;  %v5736_v5 = vld [vmem:[%s9886_s7 + $0x20] sm:$0xff] }
 0x5aa   :  { %v9300_v59 = vadd.f32 %v2791_v57, %v2736_v48  ;;  %6832 = vmatprep.mubr.msk.f32.mxu1 %vm2841_vm8, %v2831_v41  ;;  %v5737_v48 = vld [vmem:[%s9886_s7 + $0x28] sm:$0xff] }
 0x5ab   :  { %v2710_v11 = vpop.f32.mrb[72].mxu0 }
 0x5ac   :  { %v2832_v0 = vmax.f32 %v9300_v59, 0.0  ;;  %v2737_v3 = vadd.f32 %v2710_v11, %v9142_v19  ;;  %v2712_v7 = vpop.f32.mrb[73].mxu0 }
 0x5ad   :  { %v5738_v7 = vld [vmem:[%s9886_s7 + $0x30] sm:$0xff] }
 0x5ae   :  { %v9307_v16 = vadd.f32 %v2796_v10, %v2737_v3  ;;  %6833 = vmatmul.mubr.msk.f32.gmra.mrb[118].mxu1 %vm2841_vm8, %v2832_v0  ;;  %v7592_v3 = vpack.c.bf16 %v5737_v48, %v5736_v5  ;;  %v5739_v10 = vld [vmem:[%s9886_s7 + $0x38] sm:$0x3f] }
 0x5af   :  { %v2715_v14 = vpop.f32.mrb[74].mxu0 }
 0x5b0   :  { %v2833_v18 = vmax.f32 %v9307_v16, 0.0  ;;  %v2738_v23 = vadd.f32 %v2715_v14, %v9144_v22  ;;  %v2717_v26 = vpop.f32.mrb[75].mxu0  ;;  %v9374_v14 = vld [vmem:[%s9887_s8 + $0x8] sm:$0xff] }
 0x5b1   :  { %v9384_v26 = vld [vmem:[%s9887_s8 + $0x10] sm:$0xff] }
 0x5b2   :  { %v9314_v34 = vadd.f32 %v2801_v32, %v2738_v23  ;;  %6835 = vmatprep.mubr.msk.f32.mxu1 %vm2841_vm8, %v2833_v18  ;;  %v9379_v23 = vld [vmem:[%s9887_s8 + $0x38] sm:$0xff]  ;;  %v7596_v32 = vpack.c.bf16 %v5739_v10, %v5738_v7 }
 0x5b3   :  { %v2720_v19 = vpop.f32.mrb[76].mxu0 }
 0x5b4   :  { %v2834_v42 = vmax.f32 %v9314_v34, 0.0  ;;  %v2739_v44 = vadd.f32 %v2720_v19, %v9146_v27  ;;  %v2722_v54 = vpop.f32.mrb[77].mxu0  ;;  %v9389_v19 = vld [vmem:[%s9887_s8 + $0x40] sm:$0xff] }
 0x5b5   :  { %v9405_v54 = vld [vmem:[%s9887_s8 + $0x48] sm:$0xff] }
 0x5b6   :  { %v9321_v31 = vadd.f32 %v2806_v61, %v2739_v44  ;;  %6836 = vmatmul.mubr.msk.f32.gmra.mrb[120].mxu1 %vm2841_vm8, %v2834_v42  ;;  %v9400_v44 = vld [vmem:[%s9887_s8 + $0x18] sm:$0xff]  ;;  %v9412_v61 = vld [vmem:[%s9887_s8 + $0x20] sm:$0xff] }
 0x5b7   :  { %v2725_v22 = vpop.f32.mrb[78].mxu0 }
 0x5b8   :  { %v2835_v33 = vmax.f32 %v9321_v31, 0.0  ;;  %v2740_v37 = vadd.f32 %v2725_v22, %v9148_v30  ;;  %v2727_v40 = vpop.f32.mrb[79].mxu0  ;;  %v9345_v30 = vld [vmem:[%s9887_s8 + $0x30] sm:$0xff] }
 0x5b9   :  { %v9419_v22 = vld [vmem:[%s9887_s8 + $0x50] sm:$0xff]  ;;  %v9437_v40 = vld [vmem:[%s9887_s8 + $0x58] sm:$0x3] }
 0x5ba   :  { %v9328_v46 = vadd.f32 %v2811_v43, %v2740_v37  ;;  %6838 = vmatprep.mubr.msk.f32.mxu1 %vm2841_vm8, %v2835_v33  ;;  %v9430_v37 = vld [vmem:[%s9887_s8 + $0x28] sm:$0x3] }
 0x5bc   :  { %v2836_v27 = vmax.f32 %v9328_v46, 0.0 }
 0x5be   :  { %6839 = vmatmul.mubr.msk.f32.gmra.mrb[122].mxu1 %vm2841_vm8, %v2836_v27 }
 0x5bf   :  { %6898 = vmatprep.mubr.msk.f32.mxu1 %vm3012_vm9, %v9345_v30 }
 0x669   :  { %v6825_v53 = vpop.f32.mrb[112].mxu1 }
 0x66a   :  { %v2947_v55 = vpop.f32.mrb[113].mxu1 }
 0x66b   :  { %v7540_v58 = vpack.c.bf16 %v6825_v53, %v2947_v55 }
 0x66d   :  { %7541 = vmatprep.subr.bf16.mxu0 %v7540_v58  ;;  %7567 = vmatprep.subr.bf16.mxu1 %v7540_v58 }
 0x66e   :  { %7543 = vmatpush3.bf16.msra.mxu0 %v7540_v58  ;;  %7569 = vmatpush3.bf16.msra.mxu1 %v7540_v58 }
 0x671   :  { %v6828_v45 = vpop.f32.mrb[114].mxu1 }
 0x672   :  { %v2957_v4 = vpop.f32.mrb[115].mxu1 }
 0x673   :  { %v7544_v6 = vpack.c.bf16 %v6828_v45, %v2957_v4 }
 0x675   :  { %7545 = vmatprep.subr.bf16.mxu0 %v7544_v6  ;;  %7571 = vmatprep.subr.bf16.mxu1 %v7544_v6 }
 0x676   :  { %7547 = vmatpush3.bf16.msra.mxu0 %v7544_v6  ;;  %7573 = vmatpush3.bf16.msra.mxu1 %v7544_v6 }
 0x679   :  { %v6831_v9 = vpop.f32.mrb[116].mxu1 }
 0x67a   :  { %v2967_v49 = vpop.f32.mrb[117].mxu1 }
 0x67b   :  { %v7548_v15 = vpack.c.bf16 %v6831_v9, %v2967_v49  ;;  %v5774_v9 = vld [vmem:[%s9888_s9 + $0x10] sm:$0xff]  ;;  %v5775_v49 = vld [vmem:[%s9888_s9 + $0x18] sm:$0x3f] }
 0x67d   :  { %7549 = vmatprep.subr.bf16.mxu0 %v7548_v15  ;;  %7575 = vmatprep.subr.bf16.mxu1 %v7548_v15 }
 0x67e   :  { %7551 = vmatpush3.bf16.msra.mxu0 %v7548_v15  ;;  %7577 = vmatpush3.bf16.msra.mxu1 %v7548_v15 }
 0x681   :  { %v6834_v17 = vpop.f32.mrb[118].mxu1 }
 0x682   :  { %v2977_v20 = vpop.f32.mrb[119].mxu1 }
 0x683   :  { %v7552_v63 = vpack.c.bf16 %v6834_v17, %v2977_v20 }
 0x685   :  { %7553 = vmatprep.subr.bf16.mxu0 %v7552_v63  ;;  %7579 = vmatprep.subr.bf16.mxu1 %v7552_v63 }
 0x686   :  { %7555 = vmatpush3.bf16.msra.mxu0 %v7552_v63  ;;  %7581 = vmatpush3.bf16.msra.mxu1 %v7552_v63  ;;  %v7660_v63 = vpack.c.bf16 %v5775_v49, %v5774_v9 }
 0x689   :  { %v6837_v25 = vpop.f32.mrb[120].mxu1 }
 0x68a   :  { %v2987_v29 = vpop.f32.mrb[121].mxu1 }
 0x68b   :  { %v7556_v28 = vpack.c.bf16 %v6837_v25, %v2987_v29  ;;  %v3593_v25 = vld [vmem:[%s9888_s9] sm:$0xff]  ;;  %v3594_v29 = vld [vmem:[%s9888_s9 + $0x8] sm:$0x3f] }
 0x68d   :  { %7557 = vmatprep.subr.bf16.mxu0 %v7556_v28  ;;  %7583 = vmatprep.subr.bf16.mxu1 %v7556_v28 }
 0x68e   :  { %7559 = vmatpush3.bf16.msra.mxu0 %v7556_v28  ;;  %7585 = vmatpush3.bf16.msra.mxu1 %v7556_v28  ;;  %v7654_v28 = vpack.c.bf16 %v3594_v29, %v3593_v25 }
 0x691   :  { %v6840_v50 = vpop.f32.mrb[122].mxu1 }
 0x692   :  { %v2997_v57 = vpop.f32.mrb[123].mxu1 }
 0x693   :  { %v7560_v11 = vpack.c.bf16 %v6840_v50, %v2997_v57 }
 0x695   :  { %7562 = vmatprep.subr.msk.bf16.mxu0 %vm8859_vm7, %v7560_v11  ;;  %7588 = vmatprep.subr.msk.bf16.mxu1 %vm8859_vm7, %v7560_v11 }
 0x696   :  { %7565 = vmatpush3.bf16.msk.msra.mxu0 %vm8859_vm7, %v7560_v11  ;;  %7591 = vmatpush3.bf16.msk.msra.mxu1 %vm8859_vm7, %v7560_v11 }
 0x697   :  { %7593 = vmatprep.subr.bf16.mxu0 %v7592_v3 }
 0x699   :  { %6866 = vmatmul.mubr.msk.f32.vlgmr.msra.gmra.mrb[80].mxu0 %vm3012_vm9, %v9374_v14  ;;  %6899 = vmatmul.mubr.msk.f32.vlgmr.msra.gmra.mrb[124].mxu1 %vm3012_vm9, %v9379_v23 }
 0x69a   :  { %6868 = vmatprep.mubr.msk.f32.mxu0 %vm3012_vm9, %v9384_v26  ;;  %7595 = vmatpush3.bf16.msra.mxu0 %v7592_v3 }
 0x69b   :  { %6901 = vmatprep.mubr.msk.f32.mxu1 %vm3012_vm9, %v9389_v19  ;;  %7598 = vmatprep.subr.msk.bf16.mxu0 %vm8658_vm3, %v7596_v32 }
 0x69d   :  { %6869 = vmatmul.mubr.msk.f32.gmra.mrb[82].mxu0 %vm3012_vm9, %v9400_v44  ;;  %6902 = vmatmul.mubr.msk.f32.gmra.mrb[126].mxu1 %vm3012_vm9, %v9405_v54 }
 0x69e   :  { %6871 = vmatprep.mubr.msk.f32.mxu0 %vm3012_vm9, %v9412_v61  ;;  %7601 = vmatpush3.bf16.msk.msra.mxu0 %vm8658_vm3, %v7596_v32 }
 0x69f   :  { %6904 = vmatprep.mubr.msk.f32.mxu1 %vm3012_vm9, %v9419_v22 }
 0x6a1   :  { %6872 = vmatmul.mubr.msk.f32.gmra.mrb[84].mxu0 %vm3012_vm9, %v9430_v37  ;;  %6905 = vmatmul.mubr.msk.f32.gmra.mrb[128].mxu1 %vm3012_vm9, %v9437_v40 }
 0x6a2   :  { %6915 = vmatprep.mubr.msk.f32.mxu0 %vm2841_vm8, %v2825_v60  ;;  %6957 = vmatprep.mubr.msk.f32.mxu1 %vm3012_vm9, %v9340_v39 }
 0x6a5   :  { %6916 = vmatmul.mubr.msk.f32.vlgmr.msra.gmra.mrb[86].mxu0 %vm2841_vm8, %v2826_v35 }
 0x6a6   :  { %6918 = vmatprep.mubr.msk.f32.mxu0 %vm2841_vm8, %v2827_v52 }
 0x6a9   :  { %6919 = vmatmul.mubr.msk.f32.gmra.mrb[88].mxu0 %vm2841_vm8, %v2828_v2 }
 0x6aa   :  { %6921 = vmatprep.mubr.msk.f32.mxu0 %vm2841_vm8, %v2829_v13 }
 0x6ad   :  { %6922 = vmatmul.mubr.msk.f32.gmra.mrb[90].mxu0 %vm2841_vm8, %v2830_v24 }
 0x6ae   :  { %6924 = vmatprep.mubr.msk.f32.mxu0 %vm2841_vm8, %v2831_v41 }
 0x6b1   :  { %6925 = vmatmul.mubr.msk.f32.gmra.mrb[92].mxu0 %vm2841_vm8, %v2832_v0 }
 0x6b2   :  { %6927 = vmatprep.mubr.msk.f32.mxu0 %vm2841_vm8, %v2833_v18 }
 0x6b5   :  { %6928 = vmatmul.mubr.msk.f32.gmra.mrb[94].mxu0 %vm2841_vm8, %v2834_v42 }
 0x6b6   :  { %6930 = vmatprep.mubr.msk.f32.mxu0 %vm2841_vm8, %v2835_v33 }
 0x6b9   :  { %6931 = vmatmul.mubr.msk.f32.gmra.mrb[96].mxu0 %vm2841_vm8, %v2836_v27 }
 0x6ba   :  { %6990 = vmatprep.mubr.msk.f32.mxu0 %vm3012_vm9, %v9345_v30 }
 0x76c   :  { %v9485_v51 = vpop.f32.mrb[80].mxu0  ;;  %v9487_v60 = vpop.f32.mrb[124].mxu1 }
 0x76d   :  { %v3250_v36 = vmax.f32 %v9485_v51, %v9487_v60  ;;  %v9491_v35 = vpop.f32.mrb[81].mxu0  ;;  %v9493_v47 = vpop.f32.mrb[125].mxu1 }
 0x76e   :  { %v3249_v52 = vmax.f32 %v9491_v35, %v9493_v47 }
 0x770   :  { %v9497_v1 = vpop.f32.mrb[82].mxu0  ;;  %v9499_v2 = vpop.f32.mrb[126].mxu1 }
 0x771   :  { %v3252_v12 = vmax.f32 %v9497_v1, %v9499_v2  ;;  %v9503_v13 = vpop.f32.mrb[83].mxu0  ;;  %v9505_v21 = vpop.f32.mrb[127].mxu1 }
 0x772   :  { %v3251_v24 = vmax.f32 %v9503_v13, %v9505_v21 }
 0x774   :  { %v9509_v38 = vpop.f32.mrb[84].mxu0  ;;  %v9511_v41 = vpop.f32.mrb[128].mxu1 }
 0x775   :  { %v9513_v59 = vpop.f32.mrb[85].mxu0  ;;  %v3254_v0 = vmax.f32 %v9509_v38, %v9511_v41  ;;  %v9517_v16 = vpop.f32.mrb[129].mxu1 }
 0x776   :  { %v3253_v18 = vmax.f32 %v9513_v59, %v9517_v16 }
 0x778   :  { %v6917_v34 = vpop.f32.mrb[86].mxu0 }
 0x779   :  { %v3329_v42 = vpop.f32.mrb[87].mxu0 }
 0x77a   :  { %v7602_v31 = vpack.c.bf16 %v6917_v34, %v3329_v42  ;;  %v5791_v34 = vld [vmem:[%s9888_s9 + $0x20] sm:$0xff]  ;;  %v5792_v42 = vld [vmem:[%s9888_s9 + $0x28] sm:$0x3f] }
 0x77c   :  { %v6920_v33 = vpop.f32.mrb[88].mxu0  ;;  %7603 = vmatprep.subr.bf16.mxu1 %v7602_v31  ;;  %7629 = vmatprep.subr.bf16.mxu0 %v7602_v31 }
 0x77d   :  { %v3339_v43 = vpop.f32.mrb[89].mxu0  ;;  %7605 = vmatpush3.bf16.msra.mxu1 %v7602_v31  ;;  %7631 = vmatpush3.bf16.msra.mxu0 %v7602_v31 }
 0x77e   :  { %v7606_v46 = vpack.c.bf16 %v6920_v33, %v3339_v43 }
 0x780   :  { %v6923_v27 = vpop.f32.mrb[90].mxu0  ;;  %7607 = vmatprep.subr.bf16.mxu1 %v7606_v46  ;;  %7633 = vmatprep.subr.bf16.mxu0 %v7606_v46 }
 0x781   :  { %v3349_v39 = vpop.f32.mrb[91].mxu0  ;;  %7609 = vmatpush3.bf16.msra.mxu1 %v7606_v46  ;;  %7635 = vmatpush3.bf16.msra.mxu0 %v7606_v46 }
 0x782   :  { %v7610_v30 = vpack.c.bf16 %v6923_v27, %v3349_v39 }
 0x784   :  { %v6926_v53 = vpop.f32.mrb[92].mxu0  ;;  %7611 = vmatprep.subr.bf16.mxu1 %v7610_v30  ;;  %7637 = vmatprep.subr.bf16.mxu0 %v7610_v30 }
 0x785   :  { %v3359_v55 = vpop.f32.mrb[93].mxu0  ;;  %7613 = vmatpush3.bf16.msra.mxu1 %v7610_v30  ;;  %7639 = vmatpush3.bf16.msra.mxu0 %v7610_v30  ;;  %v7694_v30 = vpack.c.bf16 %v5792_v42, %v5791_v34  ;;  %v5828_v34 = vld [vmem:[%s9891_s13 + $0x78] sm:$0xff]  ;;  %v5842_v42 = vld [vmem:[%s9891_s13 + $0x80] sm:$0xff] }
 0x786   :  { %v7614_v58 = vpack.c.bf16 %v6926_v53, %v3359_v55  ;;  %v5784_v53 = vld [vmem:[%s9889_s10 + $0x18] sm:$0x1]  ;;  %v3713_v55 = vld [vmem:[%s9889_s10 + $0x8] sm:$0x1] }
 0x788   :  { %v6929_v45 = vpop.f32.mrb[94].mxu0  ;;  %7615 = vmatprep.subr.bf16.mxu1 %v7614_v58  ;;  %7641 = vmatprep.subr.bf16.mxu0 %v7614_v58 }
 0x789   :  { %v3369_v4 = vpop.f32.mrb[95].mxu0  ;;  %7617 = vmatpush3.bf16.msra.mxu1 %v7614_v58  ;;  %7643 = vmatpush3.bf16.msra.mxu0 %v7614_v58  ;;  %v5800_v58 = vld [vmem:[%s9889_s10 + $0x20] sm:$0xff] }
 0x78a   :  { %v7618_v6 = vpack.c.bf16 %v6929_v45, %v3369_v4 }
 0x78c   :  { %v6932_v15 = vpop.f32.mrb[96].mxu0  ;;  %7619 = vmatprep.subr.bf16.mxu1 %v7618_v6  ;;  %7645 = vmatprep.subr.bf16.mxu0 %v7618_v6 }
 0x78d   :  { %v3379_v17 = vpop.f32.mrb[97].mxu0  ;;  %7621 = vmatpush3.bf16.msra.mxu1 %v7618_v6  ;;  %7647 = vmatpush3.bf16.msra.mxu0 %v7618_v6 }
 0x78e   :  { %v7622_v20 = vpack.c.bf16 %v6932_v15, %v3379_v17 }
 0x790   :  { %7624 = vmatprep.subr.msk.bf16.mxu1 %vm8859_vm7, %v7622_v20  ;;  %7650 = vmatprep.subr.msk.bf16.mxu0 %vm8859_vm7, %v7622_v20 }
 0x791   :  { %7627 = vmatpush3.bf16.msk.msra.mxu1 %vm8859_vm7, %v7622_v20  ;;  %7653 = vmatpush3.bf16.msk.msra.mxu0 %vm8859_vm7, %v7622_v20 }
 0x792   :  { %7662 = vmatprep.subr.msk.bf16.mxu0 %vm8658_vm3, %v7660_v63  ;;  %7656 = vmatprep.subr.msk.bf16.mxu1 %vm8658_vm3, %v7654_v28 }
 0x794   :  { %6958 = vmatmul.mubr.msk.f32.vlgmr.msra.gmra.mrb[130].mxu1 %vm3012_vm9, %v9374_v14  ;;  %6991 = vmatmul.mubr.msk.f32.vlgmr.msra.gmra.mrb[98].mxu0 %vm3012_vm9, %v9379_v23 }
 0x795   :  { %6960 = vmatprep.mubr.msk.f32.mxu1 %vm3012_vm9, %v9384_v26  ;;  %6993 = vmatprep.mubr.msk.f32.mxu0 %vm3012_vm9, %v9389_v19 }
 0x796   :  { %7665 = vmatpush3.bf16.msk.msra.mxu0 %vm8658_vm3, %v7660_v63  ;;  %7659 = vmatpush3.bf16.msk.msra.mxu1 %vm8658_vm3, %v7654_v28  ;;  %v5801_v28 = vld [vmem:[%s9889_s10 + $0x28] sm:$0x1] }
 0x798   :  { %6961 = vmatmul.mubr.msk.f32.gmra.mrb[132].mxu1 %vm3012_vm9, %v9400_v44  ;;  %6994 = vmatmul.mubr.msk.f32.gmra.mrb[100].mxu0 %vm3012_vm9, %v9405_v54 }
 0x799   :  { %6963 = vmatprep.mubr.msk.f32.mxu1 %vm3012_vm9, %v9412_v61  ;;  %6996 = vmatprep.mubr.msk.f32.mxu0 %vm3012_vm9, %v9419_v22 }
 0x79c   :  { %6964 = vmatmul.mubr.msk.f32.gmra.mrb[134].mxu1 %vm3012_vm9, %v9430_v37  ;;  %6997 = vmatmul.mubr.msk.f32.gmra.mrb[102].mxu0 %vm3012_vm9, %v9437_v40 }
 0x867   :  { %v6959_v5 = vpop.f32.mrb[130].mxu1  ;;  %v6992_v48 = vpop.f32.mrb[98].mxu0 }
 0x868   :  { %v3487_v50 = vmax.f32 %v3250_v36, %v6959_v5  ;;  %v3457_v57 = vpop.f32.mrb[131].mxu1  ;;  %v3558_v11 = vpop.f32.mrb[99].mxu0  ;;  %v4201_v5 = vld [vmem:[%s9890_s12] sm:$0x3f] }
 0x869   :  { %v3486_v3 = vmax.f32 %v3249_v52, %v3457_v57  ;;  %v5783_v52 = vld [vmem:[%s9889_s10 + $0x10] sm:$0xff] }
 0x86a   :  { %v9575_v7 = vmax.f32 %v3487_v50, %v6992_v48  ;;  %v5817_v48 = vld [vmem:[%s9890_s12 + $0x8] sm:$0x3f] }
 0x86b   :  { %v9577_v10 = vmax.f32 %v3486_v3, %v3558_v11  ;;  %v6962_v14 = vpop.f32.mrb[132].mxu1  ;;  %v6995_v23 = vpop.f32.mrb[100].mxu0 }
 0x86c   :  { %v3489_v26 = vmax.f32 %v3252_v12, %v6962_v14  ;;  %v3467_v32 = vpop.f32.mrb[133].mxu1  ;;  %v3568_v19 = vpop.f32.mrb[101].mxu0 }
 0x86d   :  { %v3488_v44 = vmax.f32 %v3251_v24, %v3467_v32  ;;  %7003 = vmatprep.mubr.msk.f32.mxu1 %vm3595_vm10, %v9577_v10  ;;  %7016 = vmatprep.mubr.msk.f32.mxu0 %vm3595_vm10, %v9577_v10  ;;  %v4187_v3 = vpop.permute.xlu1 %4186 }
 0x86e   :  { %v9589_v54 = vmax.f32 %v3489_v26, %v6995_v23  ;;  %7004 = vmatmul.mubr.msk.f32.vlgmr.msra.gmra.mrb[136].mxu1 %vm3595_vm10, %v9575_v7  ;;  %7017 = vmatmul.mubr.msk.f32.vlgmr.msra.gmra.mrb[104].mxu0 %vm3595_vm10, %v9575_v7 }
 0x86f   :  { %v3589_v61 = vmax.f32 %v3488_v44, %v3568_v19  ;;  %v6965_v22 = vpop.f32.mrb[134].mxu1  ;;  %v6998_v37 = vpop.f32.mrb[102].mxu0  ;;  %v4287_v19 = vld [vmem:[%s9891_s13] sm:$0xff] }
 0x870   :  { %v3491_v40 = vmax.f32 %v3254_v0, %v6965_v22  ;;  %v3477_v51 = vpop.f32.mrb[135].mxu1  ;;  %v3578_v60 = vpop.f32.mrb[103].mxu0 }
 0x871   :  { %v3490_v36 = vmax.f32 %v3253_v18, %v3477_v51  ;;  %7006 = vmatprep.mubr.msk.f32.mxu1 %vm3595_vm10, %v3589_v61  ;;  %7019 = vmatprep.mubr.msk.f32.mxu0 %vm3595_vm10, %v3589_v61 }
 0x872   :  { %v3592_v35 = vmax.f32 %v3491_v40, %v6998_v37  ;;  %7007 = vmatmul.mubr.msk.f32.gmra.mrb[138].mxu1 %vm3595_vm10, %v9589_v54  ;;  %7020 = vmatmul.mubr.msk.f32.gmra.mrb[106].mxu0 %vm3595_vm10, %v9589_v54 }
 0x873   :  { %v3591_v47 = vmax.f32 %v3490_v36, %v3578_v60 }
 0x875   :  { %7009 = vmatprep.mubr.msk.f32.mxu1 %vm3595_vm10, %v3591_v47  ;;  %7022 = vmatprep.mubr.msk.f32.mxu0 %vm3595_vm10, %v3591_v47 }
 0x876   :  { %7010 = vmatmul.mubr.msk.f32.gmra.mrb[140].mxu1 %vm3595_vm10, %v3592_v35  ;;  %7023 = vmatmul.mubr.msk.f32.gmra.mrb[108].mxu0 %vm3595_vm10, %v3592_v35 }
 0x877   :  { %7037 = vmatprep.mubr.msk.f32.mxu0 %vm3818_vm11, %v5783_v52  ;;  %7052 = vmatprep.mubr.msk.f32.mxu1 %vm3818_vm11, %v3712_v8  ;;  %v4289_v52 = vld [vmem:[%s9891_s13 + $0x10] sm:$0xff]  ;;  %v4437_v8 = vpop.permute.xlu1 %4436 }
 0x941   :  { %v7005_v1 = vpop.f32.mrb[136].mxu1  ;;  %v7018_v2 = vpop.f32.mrb[104].mxu0 }
 0x942   :  { %v3683_v12 = vpop.f32.mrb[137].mxu1  ;;  %v3786_v13 = vpop.f32.mrb[105].mxu0 }
 0x943   :  { %v7680_v21 = vpack.c.bf16 %v7005_v1, %v3683_v12  ;;  %v7666_v24 = vpack.c.bf16 %v7018_v2, %v3786_v13  ;;  %v4290_v1 = vld [vmem:[%s9891_s13 + $0x18] sm:$0xff]  ;;  %v4291_v2 = vld [vmem:[%s9891_s13 + $0x20] sm:$0xff]  ;;  %v4292_v12 = vld [vmem:[%s9891_s13 + $0x28] sm:$0xff] }
 0x944   :  { %v4293_v13 = vld [vmem:[%s9891_s13 + $0x30] sm:$0xff] }
 0x945   :  { %v7008_v38 = vpop.f32.mrb[138].mxu1  ;;  %v7021_v41 = vpop.f32.mrb[106].mxu0  ;;  %7667 = vmatprep.subr.bf16.mxu0 %v7666_v24  ;;  %7681 = vmatprep.subr.bf16.mxu1 %v7680_v21 }
 0x946   :  { %v3693_v59 = vpop.f32.mrb[139].mxu1  ;;  %v3796_v0 = vpop.f32.mrb[107].mxu0  ;;  %7669 = vmatpush3.bf16.msra.mxu0 %v7666_v24  ;;  %7683 = vmatpush3.bf16.msra.mxu1 %v7680_v21  ;;  %v4294_v21 = vld [vmem:[%s9891_s13 + $0x38] sm:$0xff]  ;;  %v5821_v24 = vld [vmem:[%s9891_s13 + $0x40] sm:$0xff] }
 0x947   :  { %v7684_v16 = vpack.c.bf16 %v7008_v38, %v3693_v59  ;;  %v7670_v18 = vpack.c.bf16 %v7021_v41, %v3796_v0  ;;  %v5822_v38 = vld [vmem:[%s9891_s13 + $0x48] sm:$0xff]  ;;  %v5823_v41 = vld [vmem:[%s9891_s13 + $0x50] sm:$0xff]  ;;  %v5824_v59 = vld [vmem:[%s9891_s13 + $0x58] sm:$0xff] }
 0x948   :  { %v5825_v0 = vld [vmem:[%s9891_s13 + $0x60] sm:$0xff] }
 0x949   :  { %v7011_v31 = vpop.f32.mrb[140].mxu1  ;;  %v7024_v33 = vpop.f32.mrb[108].mxu0  ;;  %7671 = vmatprep.subr.bf16.mxu0 %v7670_v18  ;;  %7685 = vmatprep.subr.bf16.mxu1 %v7684_v16 }
 0x94a   :  { %v3703_v43 = vpop.f32.mrb[141].mxu1  ;;  %v3806_v46 = vpop.f32.mrb[109].mxu0  ;;  %7673 = vmatpush3.bf16.msra.mxu0 %v7670_v18  ;;  %7687 = vmatpush3.bf16.msra.mxu1 %v7684_v16  ;;  %v5826_v16 = vld [vmem:[%s9891_s13 + $0x68] sm:$0xff]  ;;  %v5827_v18 = vld [vmem:[%s9891_s13 + $0x70] sm:$0xff] }
 0x94b   :  { %v7688_v27 = vpack.c.bf16 %v7011_v31, %v3703_v43  ;;  %v7674_v39 = vpack.c.bf16 %v7024_v33, %v3806_v46  ;;  %v5843_v31 = vld [vmem:[%s9891_s13 + $0x88] sm:$0xff]  ;;  %v5844_v33 = vld [vmem:[%s9891_s13 + $0x90] sm:$0xff]  ;;  %v5845_v43 = vld [vmem:[%s9891_s13 + $0x98] sm:$0xff] }
 0x94c   :  { %v5846_v46 = vld [vmem:[%s9891_s13 + $0xa0] sm:$0xff] }
 0x94d   :  { %7676 = vmatprep.subr.msk.bf16.mxu0 %vm8859_vm7, %v7674_v39  ;;  %7690 = vmatprep.subr.msk.bf16.mxu1 %vm8859_vm7, %v7688_v27 }
 0x94e   :  { %7679 = vmatpush3.bf16.msk.msra.mxu0 %vm8859_vm7, %v7674_v39  ;;  %7693 = vmatpush3.bf16.msk.msra.mxu1 %vm8859_vm7, %v7688_v27  ;;  %v5847_v27 = vld [vmem:[%s9891_s13 + $0xa8] sm:$0xff]  ;;  %v5848_v39 = vld [vmem:[%s9891_s13 + $0xb0] sm:$0xff] }
 0x94f   :  { %7696 = vmatprep.subr.msk.bf16.mxu0 %vm8658_vm3, %v7694_v30 }
 0x951   :  { %7038 = vmatmul.mubr.msk.f32.vlgmr.msra.gmra.mrb[110].mxu0 %vm3818_vm11, %v5784_v53  ;;  %7053 = vmatmul.mubr.msk.f32.vlgmr.msra.gmra.mrb[142].mxu1 %vm3818_vm11, %v3713_v55  ;;  %v4943_v53 = vld [vmem:[%s9892_s15] sm:$0xff] }
 0x952   :  { %7699 = vmatpush3.bf16.msk.msra.mxu0 %vm8658_vm3, %v7694_v30  ;;  %7059 = vmatprep.mubr.msk.f32.mxu0 %vm3595_vm10, %v9577_v10  ;;  %v4182_v10 = vpop.permute.xlu0 %4181  ;;  %v5849_v30 = vld [vmem:[%s9891_s13 + $0xb8] sm:$0xff] }
 0x953   :  { %7080 = vmatprep.mubr.msk.f32.mxu1 %vm3818_vm11, %v5800_v58  ;;  %7083 = vmatprep.subr.msk.mxu0 %vm1578_vm1, %v4201_v5  ;;  %v4447_v58 = vpop.permute.xlu1 %4446 }
 0x955   :  { %7060 = vmatmul.mubr.msk.f32.vlgmr.msra.gmra.mrb[112].mxu0 %vm3595_vm10, %v9575_v7 }
 0x956   :  { %7062 = vmatprep.mubr.msk.f32.mxu0 %vm3595_vm10, %v3589_v61  ;;  %7084 = vmatpush3.msk.msra.mxu0 %vm1578_vm1, %v4201_v5  ;;  %v4432_v55 = vpop.permute.xlu0 %4431 }
 0x959   :  { %7063 = vmatmul.mubr.msk.f32.gmra.mrb[114].mxu0 %vm3595_vm10, %v9589_v54 }
 0x95a   :  { %7065 = vmatprep.mubr.msk.f32.mxu0 %vm3595_vm10, %v3591_v47 }
 0x95d   :  { %7066 = vmatmul.mubr.msk.f32.gmra.mrb[116].mxu0 %vm3595_vm10, %v3592_v35  ;;  %v4288_v35 = vld [vmem:[%s9891_s13 + $0x8] sm:$0xff] }
 0xa24   :  { %v7039_v45 = vpop.f32.mrb[110].mxu0 }
 0xa25   :  { %v3894_v4 = vpop.f32.mrb[111].mxu0 }
 0xa28   :  { %v7061_v6 = vpop.f32.mrb[112].mxu0 }
 0xa29   :  { %v4059_v9 = vpop.f32.mrb[113].mxu0 }
 0xa2a   :  { %v7700_v49 = vpack.c.bf16 %v7061_v6, %v4059_v9 }
 0xa2c   :  { %v7064_v15 = vpop.f32.mrb[114].mxu0  ;;  %7701 = vmatprep.subr.bf16.mxu1 %v7700_v49 }
 0xa2d   :  { %v4069_v17 = vpop.f32.mrb[115].mxu0  ;;  %7703 = vmatpush3.bf16.msra.mxu1 %v7700_v49 }
 0xa2e   :  { %v7704_v20 = vpack.c.bf16 %v7064_v15, %v4069_v17 }
 0xa30   :  { %v7067_v63 = vpop.f32.mrb[116].mxu0  ;;  %7705 = vmatprep.subr.bf16.mxu1 %v7704_v20 }
 0xa31   :  { %v4079_v25 = vpop.f32.mrb[117].mxu0  ;;  %7707 = vmatpush3.bf16.msra.mxu1 %v7704_v20 }
 0xa32   :  { %v7708_v29 = vpack.c.bf16 %v7067_v63, %v4079_v25 }
 0xa34   :  { %7710 = vmatprep.subr.msk.bf16.mxu1 %vm8859_vm7, %v7708_v29 }
 0xa35   :  { %7713 = vmatpush3.bf16.msk.msra.mxu1 %vm8859_vm7, %v7708_v29  ;;  %v4457_v29 = vpop.permute.xlu1 %4456 }
 0xa36   :  { %7104 = vmatprep.subr.msk.mxu1 %vm1578_vm1, %v5817_v48 }
 0xa38   :  { %7081 = vmatmul.mubr.msk.f32.vlgmr.msra.gmra.mrb[142].mxu1 %vm3818_vm11, %v5801_v28 }
 0xa39   :  { %7105 = vmatpush3.msk.msra.mxu1 %vm1578_vm1, %v5817_v48 }
 0xa3a   :  { %7125 = vmatprep.subr.msk.mxu1 %vm1578_vm1, %v5838_v56 }
 0xb0b   :  { %v7082_v50 = vpop.f32.mrb[142].mxu1 }
 0xb0c   :  { %v7772_v57 = vadd.f32 %v7082_v50, %v7039_v45  ;;  %v4166_v11 = vpop.f32.mrb[143].mxu1 }
 0xb0d   :  { %v7773_v7 = vadd.f32 %v4166_v11, %v3894_v4  ;;  %v4442_v4 = vpop.permute.xlu0 %4441 }
 0xb0e   :  { %v4190_v14 = vadd.f32 %v7772_v57, %v4187_v3 }
 0xb0f   :  { %v4189_v23 = vadd.f32 %v7773_v7, %v4182_v10 }
 0xb10   :  { %v4192_v32 = vmax.f32 %v4190_v14, 0.0 }
 0xb11   :  { %v4191_v26 = vmax.f32 %v4189_v23, 0.0  ;;  %v4452_v48 = vpop.permute.xlu0 %4451  ;;  %v4467_v23 = vpop.permute.xlu1 %4466 }
 0xb13   :  { %7085 = vmatprep.mubr.msk.f32.mxu0 %vm4202_vm12, %v4191_v26  ;;  %7106 = vmatprep.mubr.msk.f32.mxu1 %vm4202_vm12, %v4191_v26 }
 0xb14   :  { %7086 = vmatmul.mubr.msk.f32.vlgmr.msra.gmra.mrb[118].mxu0 %vm4202_vm12, %v4192_v32  ;;  %7107 = vmatmul.mubr.msk.f32.vlgmr.msra.gmra.mrb[144].mxu1 %vm4202_vm12, %v4192_v32 }
 0xb15   :  { %7127 = vmatprep.mubr.msk.f32.mxu1 %vm4202_vm12, %v4191_v26  ;;  %7126 = vmatpush3.msk.msra.mxu1 %vm1578_vm1, %v5838_v56  ;;  %vm7864_vm1 = vmmov 0  }
 0xb16   :  { %7092 = vmatprep.mubr.msk.f32.mxu0 %vm4295_vm13, %v4287_v19  ;;  %v4462_v19 = vpop.permute.xlu0 %4461 }
 0xb18   :  { %7128 = vmatmul.mubr.msk.f32.vlgmr.msra.gmra.mrb[146].mxu1 %vm4202_vm12, %v4192_v32 }
 0xb19   :  { %7162 = vmatprep.mubr.msk.f32.mxu1 %vm362_vm0, %v4943_v53 }
 0xbe7   :  { %v7087_v44 = vpop.f32.mrb[118].mxu0  ;;  %v7108_v54 = vpop.f32.mrb[144].mxu1 }
 0xbe8   :  { %v4278_v61 = vpop.f32.mrb[119].mxu0  ;;  %v4548_v22 = vpop.f32.mrb[145].mxu1 }
 0xbe9   :  { %v7714_v40 = vpack.c.bf16 %v7087_v44, %v4278_v61  ;;  %v7720_v51 = vpack.c.bf16 %v7108_v54, %v4548_v22 }
 0xbeb   :  { %7716 = vmatprep.subr.msk.bf16.mxu0 %vm9686_vm15, %v7714_v40  ;;  %v7129_v60 = vpop.f32.mrb[146].mxu1 }
 0xbec   :  { %7719 = vmatpush3.bf16.msk.msra.mxu0 %vm9686_vm15, %v7714_v40  ;;  %v4777_v36 = vpop.f32.mrb[147].mxu1 }
 0xbed   :  { %v7726_v47 = vpack.c.bf16 %v7129_v60, %v4777_v36  ;;  %7722 = vmatprep.subr.msk.bf16.mxu0 %vm9686_vm15, %v7720_v51  ;;  %v4944_v60 = vld [vmem:[%s9892_s15 + $0x8] sm:$0xff]  ;;  %v4945_v36 = vld [vmem:[%s9892_s15 + $0x10] sm:$0xff] }
 0xbef   :  { %7093 = vmatmul.mubr.msk.f32.vlgmr.msra.gmra.mrb[120].mxu0 %vm4295_vm13, %v4288_v35  ;;  %v4946_v35 = vld [vmem:[%s9892_s15 + $0x18] sm:$0xff] }
 0xbf0   :  { %7725 = vmatpush3.bf16.msk.msra.mxu0 %vm9686_vm15, %v7720_v51  ;;  %7095 = vmatprep.mubr.msk.f32.mxu0 %vm4295_vm13, %v4289_v52  ;;  %v4948_v52 = vld [vmem:[%s9892_s15 + $0x28] sm:$0xff] }
 0xbf1   :  { %7728 = vmatprep.subr.msk.bf16.mxu0 %vm9686_vm15, %v7726_v47 }
 0xbf3   :  { %7096 = vmatmul.mubr.msk.f32.gmra.mrb[122].mxu0 %vm4295_vm13, %v4290_v1  ;;  %v4949_v1 = vld [vmem:[%s9892_s15 + $0x30] sm:$0xff] }
 0xbf4   :  { %7098 = vmatprep.mubr.msk.f32.mxu0 %vm4295_vm13, %v4291_v2  ;;  %v4950_v2 = vld [vmem:[%s9892_s15 + $0x38] sm:$0xff] }
 0xbf7   :  { %7099 = vmatmul.mubr.msk.f32.gmra.mrb[124].mxu0 %vm4295_vm13, %v4292_v12  ;;  %v4951_v12 = vld [vmem:[%s9892_s15 + $0x40] sm:$0xff] }
 0xbf8   :  { %7101 = vmatprep.mubr.msk.f32.mxu0 %vm4295_vm13, %v4293_v13  ;;  %v4952_v13 = vld [vmem:[%s9892_s15 + $0x48] sm:$0xff] }
 0xbfb   :  { %7102 = vmatmul.mubr.msk.f32.gmra.mrb[126].mxu0 %vm4295_vm13, %v4294_v21  ;;  %v4953_v21 = vld [vmem:[%s9892_s15 + $0x50] sm:$0xff] }
 0xbfc   :  { %7113 = vmatprep.mubr.msk.f32.mxu0 %vm4295_vm13, %v5821_v24  ;;  %v4954_v24 = vld [vmem:[%s9892_s15 + $0x58] sm:$0xff] }
 0xbff   :  { %7114 = vmatmul.mubr.msk.f32.vlgmr.msra.gmra.mrb[120].mxu0 %vm4295_vm13, %v5822_v38  ;;  %v4955_v38 = vld [vmem:[%s9892_s15 + $0x60] sm:$0xff] }
 0xc00   :  { %7731 = vmatpush3.bf16.msk.msra.mxu0 %vm9686_vm15, %v7726_v47  ;;  %7116 = vmatprep.mubr.msk.f32.mxu0 %vm4295_vm13, %v5823_v41  ;;  %v4947_v47 = vld [vmem:[%s9892_s15 + $0x20] sm:$0xff]  ;;  %v4956_v41 = vld [vmem:[%s9892_s15 + $0x68] sm:$0xff] }
 0xc03   :  { %7117 = vmatmul.mubr.msk.f32.gmra.mrb[122].mxu0 %vm4295_vm13, %v5824_v59  ;;  %v4957_v59 = vld [vmem:[%s9892_s15 + $0x70] sm:$0xff] }
 0xc04   :  { %7119 = vmatprep.mubr.msk.f32.mxu0 %vm4295_vm13, %v5825_v0  ;;  %v4958_v0 = vld [vmem:[%s9892_s15 + $0x78] sm:$0xff] }
 0xc07   :  { %7120 = vmatmul.mubr.msk.f32.gmra.mrb[124].mxu0 %vm4295_vm13, %v5826_v16  ;;  %v7865_v16 = vmov 0.0  }
 0xc08   :  { %7122 = vmatprep.mubr.msk.f32.mxu0 %vm4295_vm13, %v5827_v18  ;;  %v4983_v18 = vpop.permute.xlu1 %4982 }
 0xc0b   :  { %7123 = vmatmul.mubr.msk.f32.gmra.mrb[126].mxu0 %vm4295_vm13, %v5828_v34  ;;  %v4978_v34 = vpop.permute.xlu0 %4977 }
 0xc0c   :  { %7134 = vmatprep.mubr.msk.f32.mxu0 %vm4295_vm13, %v5842_v42  ;;  %v4993_v42 = vpop.permute.xlu1 %4992 }
 0xc0f   :  { %7135 = vmatmul.mubr.msk.f32.vlgmr.msra.gmra.mrb[120].mxu0 %vm4295_vm13, %v5843_v31  ;;  %v4988_v31 = vpop.permute.xlu0 %4987 }
 0xc10   :  { %7137 = vmatprep.mubr.msk.f32.mxu0 %vm4295_vm13, %v5844_v33  ;;  %v5003_v33 = vpop.permute.xlu1 %5002 }
 0xc13   :  { %7138 = vmatmul.mubr.msk.f32.gmra.mrb[122].mxu0 %vm4295_vm13, %v5845_v43  ;;  %v4998_v43 = vpop.permute.xlu0 %4997 }
 0xc14   :  { %7140 = vmatprep.mubr.msk.f32.mxu0 %vm4295_vm13, %v5846_v46 }
 0xc17   :  { %7141 = vmatmul.mubr.msk.f32.gmra.mrb[124].mxu0 %vm4295_vm13, %v5847_v27 }
 0xc18   :  { %7143 = vmatprep.mubr.msk.f32.mxu0 %vm4295_vm13, %v5848_v39 }
 0xc1b   :  { %7144 = vmatmul.mubr.msk.f32.gmra.mrb[126].mxu0 %vm4295_vm13, %v5849_v30 }
 0xce2   :  { %v7136_v45 = vpop.f32.mrb[120].mxu0 }
 0xce3   :  { %v7774_v6 = vadd.f32 %v7136_v45, %v4437_v8  ;;  %v4888_v9 = vpop.f32.mrb[121].mxu0  ;;  %v5013_v8 = vpop.permute.xlu1 %5012 }
 0xce4   :  { %v7775_v49 = vadd.f32 %v4888_v9, %v4432_v55  ;;  %v5008_v45 = vpop.permute.xlu0 %5007 }
 0xce5   :  { %v4936_v15 = vmax.f32 %v7774_v6, 0.0 }
 0xce6   :  { %v4935_v17 = vmax.f32 %v7775_v49, 0.0  ;;  %v7139_v20 = vpop.f32.mrb[122].mxu0 }
 0xce7   :  { %v7776_v63 = vadd.f32 %v7139_v20, %v4447_v58  ;;  %v4898_v25 = vpop.f32.mrb[123].mxu0 }
 0xce8   :  { %v7732_v28 = vpack.c.bf16 %v4936_v15, %v4935_v17  ;;  %v7777_v5 = vadd.f32 %v4898_v25, %v4442_v4 }
 0xce9   :  { %v4938_v56 = vmax.f32 %v7776_v63, 0.0 }
 0xcea   :  { %v4937_v50 = vmax.f32 %v7777_v5, 0.0  ;;  %v7142_v57 = vpop.f32.mrb[124].mxu0  ;;  %7733 = vmatprep.subr.bf16.mxu1 %v7732_v28 }
 0xceb   :  { %v7778_v11 = vadd.f32 %v7142_v57, %v4457_v29  ;;  %v4908_v3 = vpop.f32.mrb[125].mxu0  ;;  %7735 = vmatpush3.bf16.msra.mxu1 %v7732_v28  ;;  %v5023_v29 = vpop.permute.xlu1 %5022 }
 0xcec   :  { %v7736_v7 = vpack.c.bf16 %v4938_v56, %v4937_v50  ;;  %v7779_v10 = vadd.f32 %v4908_v3, %v4452_v48  ;;  %v5018_v48 = vpop.permute.xlu0 %5017 }
 0xced   :  { %v4940_v14 = vmax.f32 %v7778_v11, 0.0 }
 0xcee   :  { %v4939_v26 = vmax.f32 %v7779_v10, 0.0  ;;  %v7145_v32 = vpop.f32.mrb[126].mxu0  ;;  %7737 = vmatprep.subr.bf16.mxu1 %v7736_v7 }
 0xcef   :  { %v7780_v44 = vadd.f32 %v7145_v32, %v4467_v23  ;;  %v4918_v54 = vpop.f32.mrb[127].mxu0  ;;  %7739 = vmatpush3.bf16.msra.mxu1 %v7736_v7  ;;  %v5033_v23 = vpop.permute.xlu1 %5032 }
 0xcf0   :  { %v7740_v61 = vpack.c.bf16 %v4940_v14, %v4939_v26  ;;  %v7781_v22 = vadd.f32 %v4918_v54, %v4462_v19  ;;  %v5028_v19 = vpop.permute.xlu0 %5027 }
 0xcf1   :  { %v4942_v37 = vmax.f32 %v7780_v44, 0.0 }
 0xcf2   :  { %v4941_v40 = vmax.f32 %v7781_v22, 0.0  ;;  %7741 = vmatprep.subr.bf16.mxu1 %v7740_v61 }
 0xcf3   :  { %7743 = vmatpush3.bf16.msra.mxu1 %v7740_v61 }
 0xcf4   :  { %v7744_v51 = vpack.c.bf16 %v4942_v37, %v4941_v40 }
 0xcf6   :  { %7745 = vmatprep.subr.bf16.mxu1 %v7744_v51 }
 0xcf7   :  { %7747 = vmatpush3.bf16.msra.mxu1 %v7744_v51 }
 0xcf8   :  { %7748 = vmatprep.subr.bf16.mxu1 %v7863_v62 }
 0xcfa   :  { %7163 = vmatmul.mubr.msk.f32.vlgmr.msra.gmra.mrb[148].mxu1 %vm362_vm0, %v4944_v60 }
 0xcfb   :  { %7165 = vmatprep.mubr.msk.f32.mxu1 %vm362_vm0, %v4945_v36 }
 0xcfe   :  { %7166 = vmatmul.mubr.msk.f32.gmra.mrb[150].mxu1 %vm362_vm0, %v4946_v35  ;;  %v5043_v35 = vpop.permute.xlu1 %5042 }
 0xcff   :  { %7168 = vmatprep.mubr.msk.f32.mxu1 %vm362_vm0, %v4947_v47 }
 0xd02   :  { %7169 = vmatmul.mubr.msk.f32.gmra.mrb[152].mxu1 %vm362_vm0, %v4948_v52 }
 0xd03   :  { %7171 = vmatprep.mubr.msk.f32.mxu1 %vm362_vm0, %v4949_v1  ;;  %v5038_v1 = vpop.permute.xlu0 %5037 }
 0xd06   :  { %7172 = vmatmul.mubr.msk.f32.gmra.mrb[154].mxu1 %vm362_vm0, %v4950_v2 }
 0xd07   :  { %7174 = vmatprep.mubr.msk.f32.mxu1 %vm362_vm0, %v4951_v12 }
 0xd0a   :  { %7175 = vmatmul.mubr.msk.f32.gmra.mrb[156].mxu1 %vm362_vm0, %v4952_v13 }
 0xd0b   :  { %7177 = vmatprep.mubr.msk.f32.mxu1 %vm362_vm0, %v4953_v21 }
 0xd0e   :  { %7178 = vmatmul.mubr.msk.f32.gmra.mrb[158].mxu1 %vm362_vm0, %v4954_v24 }
 0xd0f   :  { %7180 = vmatprep.mubr.msk.f32.mxu1 %vm362_vm0, %v4955_v38 }
 0xd12   :  { %7181 = vmatmul.mubr.msk.f32.gmra.mrb[160].mxu1 %vm362_vm0, %v4956_v41 }
 0xd13   :  { %7183 = vmatprep.mubr.msk.f32.mxu1 %vm362_vm0, %v4957_v59 }
 0xd16   :  { %7184 = vmatmul.mubr.msk.f32.gmra.mrb[162].mxu1 %vm362_vm0, %v4958_v0  ;;  %v5053_v0 = vpop.permute.xlu1 %5052  ;;  %vm5361_vm0 = vcmask 8192  }
 0xd17   :  { %7218 = vmatprep.mubr.msk.f32.mxu1 %vm7864_vm1, %v7865_v16 }
 0xdcd   :  { %v7164_v46 = vpop.f32.mrb[148].mxu1 }
 0xdce   :  { %v5175_v27 = vadd.f32 %v7164_v46, %v4983_v18  ;;  %v5169_v39 = vpop.f32.mrb[149].mxu1 }
 0xdcf   :  { %v5170_v30 = vadd.f32 %v5169_v39, %v4978_v34  ;;  %v5048_v34 = vpop.permute.xlu0 %5047 }
 0xdd0   :  { %v5249_v53 = vmax.f32 %v5175_v27, 0.0 }
 0xdd1   :  { %v5248_v55 = vmax.f32 %v5170_v30, 0.0  ;;  %v7167_v58 = vpop.f32.mrb[150].mxu1  ;;  %v5264_v30 = vld [vmem:[%s9893_s17] sm:$0x3] }
 0xdd2   :  { %v5185_v4 = vadd.f32 %v7167_v58, %v4993_v42  ;;  %v5179_v6 = vpop.f32.mrb[151].mxu1 }
 0xdd3   :  { %v7749_v9 = vpack.c.bf16 %v5249_v53, %v5248_v55  ;;  %v5180_v49 = vadd.f32 %v5179_v6, %v4988_v31  ;;  %v5269_v53 = vpop.permute.xlu0 %5268 }
 0xdd4   :  { %v5251_v15 = vmax.f32 %v5185_v4, 0.0 }
 0xdd5   :  { %v5250_v17 = vmax.f32 %v5180_v49, 0.0  ;;  %v7170_v20 = vpop.f32.mrb[152].mxu1  ;;  %7750 = vmatpush3.bf16.msra.mxu1 %v7749_v9 }
 0xdd6   :  { %v5195_v63 = vadd.f32 %v7170_v20, %v5003_v33  ;;  %v5189_v25 = vpop.f32.mrb[153].mxu1  ;;  %7751 = vmatprep.subr.bf16.mxu1 %v7863_v62 }
 0xdd7   :  { %v7752_v28 = vpack.c.bf16 %v5251_v15, %v5250_v17  ;;  %v5190_v5 = vadd.f32 %v5189_v25, %v4998_v43 }
 0xdd8   :  { %v5253_v56 = vmax.f32 %v5195_v63, 0.0 }
 0xdd9   :  { %v5252_v50 = vmax.f32 %v5190_v5, 0.0  ;;  %v7173_v57 = vpop.f32.mrb[154].mxu1  ;;  %7753 = vmatpush3.bf16.msra.mxu1 %v7752_v28 }
 0xdda   :  { %v5205_v11 = vadd.f32 %v7173_v57, %v5013_v8  ;;  %v5199_v3 = vpop.f32.mrb[155].mxu1  ;;  %7754 = vmatprep.subr.bf16.mxu1 %v7863_v62 }
 0xddb   :  { %v7755_v7 = vpack.c.bf16 %v5253_v56, %v5252_v50  ;;  %v5200_v10 = vadd.f32 %v5199_v3, %v5008_v45 }
 0xddc   :  { %v5255_v14 = vmax.f32 %v5205_v11, 0.0 }
 0xddd   :  { %v5254_v26 = vmax.f32 %v5200_v10, 0.0  ;;  %v7176_v32 = vpop.f32.mrb[156].mxu1  ;;  %7756 = vmatpush3.bf16.msra.mxu1 %v7755_v7 }
 0xdde   :  { %v5215_v44 = vadd.f32 %v7176_v32, %v5023_v29  ;;  %v5209_v54 = vpop.f32.mrb[157].mxu1  ;;  %7757 = vmatprep.subr.bf16.mxu1 %v7863_v62 }
 0xddf   :  { %v7758_v61 = vpack.c.bf16 %v5255_v14, %v5254_v26  ;;  %v5210_v22 = vadd.f32 %v5209_v54, %v5018_v48 }
 0xde0   :  { %v5257_v37 = vmax.f32 %v5215_v44, 0.0 }
 0xde1   :  { %v5256_v40 = vmax.f32 %v5210_v22, 0.0  ;;  %v7179_v51 = vpop.f32.mrb[158].mxu1  ;;  %7759 = vmatpush3.bf16.msra.mxu1 %v7758_v61 }
 0xde2   :  { %v5225_v60 = vadd.f32 %v7179_v51, %v5033_v23  ;;  %v5219_v36 = vpop.f32.mrb[159].mxu1  ;;  %7760 = vmatprep.subr.bf16.mxu1 %v7863_v62 }
 0xde3   :  { %v7761_v47 = vpack.c.bf16 %v5257_v37, %v5256_v40  ;;  %v5220_v52 = vadd.f32 %v5219_v36, %v5028_v19 }
 0xde4   :  { %v5259_v2 = vmax.f32 %v5225_v60, 0.0 }
 0xde5   :  { %v5258_v12 = vmax.f32 %v5220_v52, 0.0  ;;  %v7182_v13 = vpop.f32.mrb[160].mxu1  ;;  %7762 = vmatpush3.bf16.msra.mxu1 %v7761_v47 }
 0xde6   :  { %v5235_v21 = vadd.f32 %v7182_v13, %v5043_v35  ;;  %v5229_v24 = vpop.f32.mrb[161].mxu1  ;;  %7763 = vmatprep.subr.bf16.mxu1 %v7863_v62 }
 0xde7   :  { %v7764_v38 = vpack.c.bf16 %v5259_v2, %v5258_v12  ;;  %v5230_v41 = vadd.f32 %v5229_v24, %v5038_v1 }
 0xde8   :  { %v5261_v59 = vmax.f32 %v5235_v21, 0.0 }
 0xde9   :  { %v5260_v16 = vmax.f32 %v5230_v41, 0.0  ;;  %v7185_v18 = vpop.f32.mrb[162].mxu1  ;;  %7765 = vmatpush3.bf16.msra.mxu1 %v7764_v38 }
 0xdea   :  { %v5245_v42 = vadd.f32 %v7185_v18, %v5053_v0  ;;  %v5239_v31 = vpop.f32.mrb[163].mxu1  ;;  %7766 = vmatprep.subr.bf16.mxu1 %v7863_v62 }
 0xdeb   :  { %v7767_v33 = vpack.c.bf16 %v5261_v59, %v5260_v16  ;;  %v5240_v43 = vadd.f32 %v5239_v31, %v5048_v34 }
 0xdec   :  { %v5263_v46 = vmax.f32 %v5245_v42, 0.0 }
 0xded   :  { %v5262_v27 = vmax.f32 %v5240_v43, 0.0  ;;  %7768 = vmatpush3.bf16.msra.mxu1 %v7767_v33 }
 0xdee   :  { %7769 = vmatprep.subr.bf16.mxu1 %v7863_v62 }
 0xdef   :  { %v7770_v39 = vpack.c.bf16 %v5263_v46, %v5262_v27 }
 0xdf1   :  { %7771 = vmatpush3.bf16.msra.mxu1 %v7770_v39 }
 0xdf4   :  { %7219 = vmatmul.mubr.f32.vlgmr.msra.gmra.mrb[164].mxu1 %v5264_v30 }
 0xec7   :  { %v5337_v8 = vpop.f32.mrb[164].mxu1 }
 0xec8   :  { %v5338_v55 = vadd.f32 %v5337_v8, %v5269_v53  ;;  %v7220_v58 = vpop.f32.mrb[165].mxu1 }
 0xeca   :  { %v5342_v45 = vrot.slane %v5338_v55, 1 }
 0xecc   :  { %v5344_v4 = vmax.f32 %v5338_v55, %v5342_v45 }
 0xece   :  { %v5345_v6 = vsub.f32 %v5338_v55, %v5344_v4  ;;  %v5349_v9 = vrot.slane %v5344_v4, 7 }
 0xed0   :  { %v5351_v49 = vsub.f32 %v5338_v55, %v5349_v9  ;;  %v5346_v15 = vmul.f32 1.442695, %v5345_v6 }
 0xed2   :  { %v5352_v17 = vmul.f32 1.442695, %v5351_v49 }
 0xed4   :  { %7855 = vpow2.f32 %v5352_v17 }
 0xed5   :  { %7857 = vpow2.f32 %v5346_v15 }
 0xede   :  { %v7856_v62 = vpop.eup %7855 }
 0xedf   :  { %v5355_v20 = vrot.slane %v7856_v62, 1  ;;  %v7858_v63 = vpop.eup %7857 }
 0xee1   :  { %v5357_v25 = vadd.f32 %v7858_v63, %v5355_v20 }
 0xee3   :  { %7859 = vrcp.f32 %v5357_v25 }
 0xeed   :  { %v7860_v29 = vpop.eup %7859 }
 0xeee   :  { %v5360_v28 = vmul.f32 %v7860_v29, %v7858_v63  ;;  %v5364_v5 = vrot.slane %v7860_v29, 7 }
 0xef0   :  { %5362 = vst.msk [vmem:[%s9894_s19] sm:$0x1] %vm5361_vm0, %v5360_v28  ;;  %v5366_v48 = vmul.f32 %v7856_v62, %v5364_v5 }
 0xef2   :  { %5368 = vst.msk [vmem:[%s9894_s19] sm:$0x2] %vm5367_vm2, %v5366_v48 }

</bundles_post_ra>
